<compile_context>
chip_gen: v7x
topology: tpu7x:2x2x1
jax: 0.10.0
libtpu: 0.0.40
codegen_flags: <defaults>
</compile_context>

<pallas_src>
import functools

import jax
import jax.numpy as jnp
import numpy as np
from jax.experimental import pallas as pl
from jax.experimental.pallas import tpu as pltpu

MODEL_DIM = 32
NUM_HEADS = 8
HEAD_DIM = MODEL_DIM // NUM_HEADS
FF_DIM = 64          # feed_forward_dim (kept small; module default is 2048)
LN_EPS = 1e-5        # torch.nn.LayerNorm default eps
BLOCK_SLABS = 8      # (b, t) slabs processed per grid step


def _layer_norm(x, gamma, beta):
    mean = jnp.mean(x, axis=-1, keepdims=True)
    var = jnp.mean((x - mean) ** 2, axis=-1, keepdims=True)
    return (x - mean) * jax.lax.rsqrt(var + LN_EPS) * gamma + beta


def _attention_constants(num_nodes):
    """Head mask (H*N, D) and block-diagonal ones (H*N, H*N), both compile-time."""
    hn = NUM_HEADS * num_nodes
    row_head = np.arange(hn)[:, None] // num_nodes          # head owning row h*N+m
    col_head = np.arange(MODEL_DIM)[None, :] // HEAD_DIM     # head owning column d
    hmask = (row_head == col_head).astype(np.float32)        # (HN, D)
    bd = (row_head == row_head.T).astype(np.float32)         # (HN, HN) block-diag
    return jnp.asarray(hmask), jnp.asarray(bd)


def self_attn_kernel(x_ref,
                     wqkv_ref, bqkv_ref,
                     wo_ref, w1_ref, b1_ref, w2_ref,
                     vecs_ref,          # (6, D): bo, g1, be1, b2, g2, be2
                     hmask_ref,         # (H*N, D) per-head column mask
                     bd_ref,            # (H*N, H*N) block-diagonal ones
                     o_ref):
    GB, N, D = x_ref.shape
    H, HD = NUM_HEADS, HEAD_DIM
    HN = H * N
    M = GB * N

    vecs = vecs_ref[...]
    bo, g1, be1 = vecs[0:1], vecs[1:2], vecs[2:3]
    b2, g2, be2 = vecs[3:4], vecs[4:5], vecs[5:6]

    # Flatten the Gb slabs into one large-M matrix for all row-wise ops.
    x2 = x_ref[...].reshape(M, D)                            # (M, D) f32

    # --- fused QKV projection (bf16 operands, f32 accumulate on the MXU) ---
    qkv = jnp.dot(x2.astype(jnp.bfloat16),
                  wqkv_ref[...].astype(jnp.bfloat16),
                  preferred_element_type=jnp.float32) + bqkv_ref[...]
    q = qkv[:, 0 * D:1 * D] * (1.0 / (HD ** 0.5))            # fold scale into q once
    k = qkv[:, 1 * D:2 * D]
    v = qkv[:, 2 * D:3 * D]

    q3 = q.reshape(GB, N, D).astype(jnp.bfloat16)
    k3 = k.reshape(GB, N, D)
    v3 = v.reshape(GB, N, D)

    # --- multi-head attention via masked "wide" K / V (no per-head loop) ---
    # k_big[g, h*N + m, d] = k[g, m, d] if column d belongs to head h else 0
    hmask = hmask_ref[...]
    k_big = (jnp.concatenate([k3] * H, axis=1) * hmask[None]).astype(jnp.bfloat16)
    v_big = (jnp.concatenate([v3] * H, axis=1) * hmask[None]).astype(jnp.bfloat16)

    # scores: (GB, N, H*N); lane index encodes (head, src node)
    s = jnp.einsum("gnd,gMd->gnM", q3, k_big,
                   preferred_element_type=jnp.float32)

    # Per-(row, head) softmax in f32.  Subtracting the global row max is exact
    # (softmax shift invariance within each head segment) and numerically safe
    # for any realistic score spread.
    s = s - jnp.max(s, axis=-1, keepdims=True)
    p = jnp.exp(s)                                           # (GB, N, HN) f32

    # Per-head denominators, broadcast back to the (M, HN) layout with one matmul
    # against the block-diagonal ones matrix.
    p2 = p.reshape(M, HN)
    denom = jnp.dot(p2.astype(jnp.bfloat16), bd_ref[...].astype(jnp.bfloat16),
                    preferred_element_type=jnp.float32)
    p2 = p2 * pl.reciprocal(denom, approx=True)
    p3 = p2.reshape(GB, N, HN).astype(jnp.bfloat16)

    # Context comes out already concatenated over heads along the last dim.
    ctx = jnp.einsum("gnM,gMc->gnc", p3, v_big,
                     preferred_element_type=jnp.float32)     # (GB, N, D)
    attn = ctx.reshape(M, D)

    # --- output projection, residual + LayerNorm 1 ---
    proj = jnp.dot(attn.astype(jnp.bfloat16), wo_ref[...].astype(jnp.bfloat16),
                   preferred_element_type=jnp.float32) + bo
    h1 = _layer_norm(x2 + proj, g1, be1)

    # --- feed-forward: Linear -> ReLU -> Linear ---
    f = jnp.dot(h1.astype(jnp.bfloat16), w1_ref[...].astype(jnp.bfloat16),
                preferred_element_type=jnp.float32) + b1_ref[...]
    f = jnp.maximum(f, 0.0)
    f = jnp.dot(f.astype(jnp.bfloat16), w2_ref[...].astype(jnp.bfloat16),
                preferred_element_type=jnp.float32) + b2

    # --- residual + LayerNorm 2 ---
    y = _layer_norm(h1 + f, g2, be2)
    o_ref[...] = y.reshape(GB, N, D)


@functools.partial(jax.jit, static_argnames=("block_slabs",))
def self_attention_layer(x, params, block_slabs=BLOCK_SLABS):
    """x: (B, T, N, D) float32. params: tuple of 16 arrays (see main)."""
    (wq, bq, wk, bk, wv, bv, wo, bo,
     g1, be1, w1, b1, w2, b2, g2, be2) = params
    B, T, N, D = x.shape
    G = B * T
    Gb = min(block_slabs, G)
    if G % Gb != 0:          # fall back to per-slab blocks if not divisible
        Gb = 1
    xf = x.reshape(G, N, D)

    # Parameter fusion / packing (done once at trace time, outside the kernel).
    wqkv = jnp.concatenate([wq, wk, wv], axis=1)               # (D, 3D)
    bqkv = jnp.concatenate([bq, bk, bv], axis=1)               # (1, 3D)
    vecs = jnp.concatenate([bo, g1, be1, b2, g2, be2], axis=0)  # (6, D)
    hmask, bd = _attention_constants(N)

    inputs = (xf, wqkv, bqkv, wo, w1, b1, w2, vecs, hmask, bd)

    in_specs = [pl.BlockSpec((Gb, N, D), lambda i: (i, 0, 0))]
    for p_ in inputs[1:]:
        in_specs.append(pl.BlockSpec(p_.shape, lambda i, n=p_.ndim: (0,) * n))

    out = pl.pallas_call(
        self_attn_kernel,
        out_shape=jax.ShapeDtypeStruct((G, N, D), jnp.float32),
        grid_spec=pltpu.PrefetchScalarGridSpec(
            num_scalar_prefetch=0,
            grid=(G // Gb,),
            in_specs=in_specs,
            out_specs=pl.BlockSpec((Gb, N, D), lambda i: (i, 0, 0)),
        ),
        compiler_params=pltpu.CompilerParams(
            dimension_semantics=("parallel",)),
    )(*inputs)
    return out.reshape(B, T, N, D)


def ref_forward(x, params):
    """Pure-JAX f32 reference mirroring the torch module semantics."""
    (wq, bq, wk, bk, wv, bv, wo, bo,
     g1, be1, w1, b1, w2, b2, g2, be2) = params
    B, T, N, D = x.shape
    H, hd = NUM_HEADS, HEAD_DIM

    q = x @ wq + bq
    k = x @ wk + bk
    v = x @ wv + bv
    q = q.reshape(B, T, N, H, hd)
    k = k.reshape(B, T, N, H, hd)
    v = v.reshape(B, T, N, H, hd)
    s = jnp.einsum("btnhd,btmhd->bthnm", q, k) / (hd ** 0.5)
    p = jax.nn.softmax(s, axis=-1)
    o = jnp.einsum("bthnm,btmhd->btnhd", p, v).reshape(B, T, N, D)
    o = o @ wo + bo

    h1 = _layer_norm(x + o, g1, be1)
    f = jnp.maximum(h1 @ w1 + b1, 0.0)
    f = f @ w2 + b2
    return _layer_norm(h1 + f, g2, be2)


if __name__ == "__main__":
    B, T, N = 2, 8, 16
    D, F = MODEL_DIM, FF_DIM

    key = jax.random.PRNGKey(0)
    keys = jax.random.split(key, 13)

    def nrm(k, shape, scale):
        return (scale * jax.random.normal(k, shape)).astype(jnp.float32)

    # Deterministic synthetic parameters (weights in (in, out) layout).
    wq = nrm(keys[0], (D, D), 0.1);  bq = nrm(keys[1], (1, D), 0.01)
    wk = nrm(keys[2], (D, D), 0.1);  bk = nrm(keys[3], (1, D), 0.01)
    wv = nrm(keys[4], (D, D), 0.1);  bv = nrm(keys[5], (1, D), 0.01)
    wo = nrm(keys[6], (D, D), 0.1);  bo = nrm(keys[7], (1, D), 0.01)
    g1 = jnp.ones((1, D), jnp.float32); be1 = jnp.zeros((1, D), jnp.float32)
    w1 = nrm(keys[8], (D, F), 0.1);  b1 = nrm(keys[9], (1, F), 0.01)
    w2 = nrm(keys[10], (F, D), 0.1); b2 = nrm(keys[11], (1, D), 0.01)
    g2 = jnp.ones((1, D), jnp.float32); be2 = jnp.zeros((1, D), jnp.float32)

    params = (wq, bq, wk, bk, wv, bv, wo, bo,
              g1, be1, w1, b1, w2, b2, g2, be2)

    x = jax.random.normal(keys[12], (B, T, N, D), jnp.float32)

    out = jax.block_until_ready(self_attention_layer(x, params))
    ref = jax.block_until_ready(ref_forward(x, params))

    assert out.shape == x.shape == (B, T, N, D)
    assert np.all(np.isfinite(np.asarray(out)))
    # Tolerance intentionally covers bf16 MXU operands (f32 accumulation).
    if not np.allclose(np.asarray(out), np.asarray(ref), atol=5e-2, rtol=5e-2):
        raise AssertionError("Pallas output does not match JAX reference")

    print("KERNEL_OK")
</pallas_src>

<mosaic_0001>
module attributes {stable_mosaic.version = 11 : i64} {
  func.func @self_attn_kernel(%arg0: i32, %arg1: memref<8x16x32xf32, #tpu.memory_space<vmem>>, %arg2: memref<32x96xf32, #tpu.memory_space<vmem>>, %arg3: memref<1x96xf32, #tpu.memory_space<vmem>>, %arg4: memref<32x32xf32, #tpu.memory_space<vmem>>, %arg5: memref<32x64xf32, #tpu.memory_space<vmem>>, %arg6: memref<1x64xf32, #tpu.memory_space<vmem>>, %arg7: memref<64x32xf32, #tpu.memory_space<vmem>>, %arg8: memref<6x32xf32, #tpu.memory_space<vmem>>, %arg9: memref<128x32xf32, #tpu.memory_space<vmem>>, %arg10: memref<128x128xf32, #tpu.memory_space<vmem>>, %arg11: memref<8x16x32xf32, #tpu.memory_space<vmem>>) attributes {dimension_semantics = [#tpu.dimension_semantics<parallel>], iteration_bounds = array<i64: 2>, scalar_prefetch = 0 : i64, scratch_operands = 0 : i64, tpu.core_type = #tpu.core_type<tc>, window_params = [{transform_indices = @transform_0, window_bounds = array<i64: 8, 16, 32>}, {pipeline_mode = #tpu.pipeline_mode<synchronous>, transform_indices = @transform_1, window_bounds = array<i64: 32, 96>}, {pipeline_mode = #tpu.pipeline_mode<synchronous>, transform_indices = @transform_2, window_bounds = array<i64: 1, 96>}, {pipeline_mode = #tpu.pipeline_mode<synchronous>, transform_indices = @transform_3, window_bounds = array<i64: 32, 32>}, {pipeline_mode = #tpu.pipeline_mode<synchronous>, transform_indices = @transform_4, window_bounds = array<i64: 32, 64>}, {pipeline_mode = #tpu.pipeline_mode<synchronous>, transform_indices = @transform_5, window_bounds = array<i64: 1, 64>}, {pipeline_mode = #tpu.pipeline_mode<synchronous>, transform_indices = @transform_6, window_bounds = array<i64: 64, 32>}, {pipeline_mode = #tpu.pipeline_mode<synchronous>, transform_indices = @transform_7, window_bounds = array<i64: 6, 32>}, {pipeline_mode = #tpu.pipeline_mode<synchronous>, transform_indices = @transform_8, window_bounds = array<i64: 128, 32>}, {pipeline_mode = #tpu.pipeline_mode<synchronous>, transform_indices = @transform_9, window_bounds = array<i64: 128, 128>}, {transform_indices = @transform_10, window_bounds = array<i64: 8, 16, 32>}]} {
    %c0 = arith.constant 0 : index
    %c0_0 = arith.constant 0 : index
    %0 = vector.load %arg8[%c0, %c0_0] : memref<6x32xf32, #tpu.memory_space<vmem>>, vector<6x32xf32>
    %1 = vector.extract_strided_slice %0 {offsets = [0, 0], sizes = [1, 32], strides = [1, 1]} : vector<6x32xf32> to vector<1x32xf32>
    %2 = vector.extract_strided_slice %0 {offsets = [1, 0], sizes = [1, 32], strides = [1, 1]} : vector<6x32xf32> to vector<1x32xf32>
    %3 = vector.extract_strided_slice %0 {offsets = [2, 0], sizes = [1, 32], strides = [1, 1]} : vector<6x32xf32> to vector<1x32xf32>
    %4 = vector.extract_strided_slice %0 {offsets = [3, 0], sizes = [1, 32], strides = [1, 1]} : vector<6x32xf32> to vector<1x32xf32>
    %5 = vector.extract_strided_slice %0 {offsets = [4, 0], sizes = [1, 32], strides = [1, 1]} : vector<6x32xf32> to vector<1x32xf32>
    %6 = vector.extract_strided_slice %0 {offsets = [5, 0], sizes = [1, 32], strides = [1, 1]} : vector<6x32xf32> to vector<1x32xf32>
    %c0_1 = arith.constant 0 : index
    %c0_2 = arith.constant 0 : index
    %c0_3 = arith.constant 0 : index
    %7 = vector.load %arg1[%c0_1, %c0_2, %c0_3] : memref<8x16x32xf32, #tpu.memory_space<vmem>>, vector<8x16x32xf32>
    %8 = vector.shape_cast %7 : vector<8x16x32xf32> to vector<128x32xf32>
    %9 = arith.truncf %8 : vector<128x32xf32> to vector<128x32xbf16>
    %c0_4 = arith.constant 0 : index
    %c0_5 = arith.constant 0 : index
    %10 = vector.load %arg2[%c0_4, %c0_5] : memref<32x96xf32, #tpu.memory_space<vmem>>, vector<32x96xf32>
    %11 = arith.truncf %10 : vector<32x96xf32> to vector<32x96xbf16>
    %cst = arith.constant dense<0.000000e+00> : vector<128x96xf32>
    %12 = tpu.matmul %9, %11, %cst {dimension_numbers = #tpu.dot_dimension_numbers<[1], [0], [0], [1], [0, 0, 1, 1], [], []>} : vector<128x32xbf16>, vector<32x96xbf16>, vector<128x96xf32> -> vector<128x96xf32>
    %c0_6 = arith.constant 0 : index
    %c0_7 = arith.constant 0 : index
    %13 = vector.load %arg3[%c0_6, %c0_7] : memref<1x96xf32, #tpu.memory_space<vmem>>, vector<1x96xf32>
    %14 = vector.broadcast %13 : vector<1x96xf32> to vector<128x96xf32>
    %15 = arith.addf %12, %14 : vector<128x96xf32>
    %16 = vector.extract_strided_slice %15 {offsets = [0, 0], sizes = [128, 32], strides = [1, 1]} : vector<128x96xf32> to vector<128x32xf32>
    %cst_8 = arith.constant 5.000000e-01 : f32
    %17 = vector.broadcast %cst_8 : f32 to vector<128x32xf32>
    %18 = arith.mulf %16, %17 : vector<128x32xf32>
    %19 = vector.extract_strided_slice %15 {offsets = [0, 32], sizes = [128, 32], strides = [1, 1]} : vector<128x96xf32> to vector<128x32xf32>
    %20 = vector.extract_strided_slice %15 {offsets = [0, 64], sizes = [128, 32], strides = [1, 1]} : vector<128x96xf32> to vector<128x32xf32>
    %21 = vector.shape_cast %18 : vector<128x32xf32> to vector<8x16x32xf32>
    %22 = arith.truncf %21 : vector<8x16x32xf32> to vector<8x16x32xbf16>
    %23 = vector.shape_cast %19 : vector<128x32xf32> to vector<8x16x32xf32>
    %24 = vector.shape_cast %20 : vector<128x32xf32> to vector<8x16x32xf32>
    %c0_9 = arith.constant 0 : index
    %c0_10 = arith.constant 0 : index
    %25 = vector.load %arg9[%c0_9, %c0_10] : memref<128x32xf32, #tpu.memory_space<vmem>>, vector<128x32xf32>
    %26 = tpu.concatenate %23, %23, %23, %23, %23, %23, %23, %23 in 1 : vector<8x16x32xf32>, vector<8x16x32xf32>, vector<8x16x32xf32>, vector<8x16x32xf32>, vector<8x16x32xf32>, vector<8x16x32xf32>, vector<8x16x32xf32>, vector<8x16x32xf32> -> vector<8x128x32xf32>
    %27 = vector.shape_cast %25 : vector<128x32xf32> to vector<1x128x32xf32>
    %28 = vector.broadcast %27 : vector<1x128x32xf32> to vector<8x128x32xf32>
    %29 = arith.mulf %26, %28 : vector<8x128x32xf32>
    %30 = arith.truncf %29 : vector<8x128x32xf32> to vector<8x128x32xbf16>
    %31 = tpu.concatenate %24, %24, %24, %24, %24, %24, %24, %24 in 1 : vector<8x16x32xf32>, vector<8x16x32xf32>, vector<8x16x32xf32>, vector<8x16x32xf32>, vector<8x16x32xf32>, vector<8x16x32xf32>, vector<8x16x32xf32>, vector<8x16x32xf32> -> vector<8x128x32xf32>
    %32 = vector.shape_cast %25 : vector<128x32xf32> to vector<1x128x32xf32>
    %33 = vector.broadcast %32 : vector<1x128x32xf32> to vector<8x128x32xf32>
    %34 = arith.mulf %31, %33 : vector<8x128x32xf32>
    %35 = arith.truncf %34 : vector<8x128x32xf32> to vector<8x128x32xbf16>
    "tpu.trace_start"() <{level = 10 : i32, message = "gnd,gMd->gnM"}> : () -> ()
    %cst_11 = arith.constant dense<0.000000e+00> : vector<8x16x128xf32>
    %36 = tpu.matmul %22, %30, %cst_11 {dimension_numbers = #tpu.dot_dimension_numbers<[2], [2], [1], [1], [0, 0, 0, 1, 1, 1], [0], [0]>} : vector<8x16x32xbf16>, vector<8x128x32xbf16>, vector<8x16x128xf32> -> vector<8x16x128xf32>
    "tpu.trace_stop"() : () -> ()
    %cst_12 = arith.constant dense<0xFF800000> : vector<8x16xf32>
    %37 = vector.multi_reduction <maximumf>, %36, %cst_12 [2] : vector<8x16x128xf32> to vector<8x16xf32>
    %38 = vector.shape_cast %37 : vector<8x16xf32> to vector<8x16x1xf32>
    %39 = vector.broadcast %38 : vector<8x16x1xf32> to vector<8x16x128xf32>
    %40 = arith.subf %36, %39 : vector<8x16x128xf32>
    %41 = math.exp %40 : vector<8x16x128xf32>
    %42 = vector.shape_cast %41 : vector<8x16x128xf32> to vector<128x128xf32>
    %43 = arith.truncf %42 : vector<128x128xf32> to vector<128x128xbf16>
    %c0_13 = arith.constant 0 : index
    %c0_14 = arith.constant 0 : index
    %44 = vector.load %arg10[%c0_13, %c0_14] : memref<128x128xf32, #tpu.memory_space<vmem>>, vector<128x128xf32>
    %45 = arith.truncf %44 : vector<128x128xf32> to vector<128x128xbf16>
    %cst_15 = arith.constant dense<0.000000e+00> : vector<128x128xf32>
    %46 = tpu.matmul %43, %45, %cst_15 {dimension_numbers = #tpu.dot_dimension_numbers<[1], [0], [0], [1], [0, 0, 1, 1], [], []>} : vector<128x128xbf16>, vector<128x128xbf16>, vector<128x128xf32> -> vector<128x128xf32>
    %47 = tpu.reciprocal %46 {approx = true} : vector<128x128xf32> -> vector<128x128xf32>
    %48 = arith.mulf %42, %47 : vector<128x128xf32>
    %49 = vector.shape_cast %48 : vector<128x128xf32> to vector<8x16x128xf32>
    %50 = arith.truncf %49 : vector<8x16x128xf32> to vector<8x16x128xbf16>
    "tpu.trace_start"() <{level = 10 : i32, message = "gnM,gMc->gnc"}> : () -> ()
    %cst_16 = arith.constant dense<0.000000e+00> : vector<8x16x32xf32>
    %51 = tpu.matmul %50, %35, %cst_16 {dimension_numbers = #tpu.dot_dimension_numbers<[2], [1], [1], [2], [0, 0, 0, 1, 1, 2], [0], [0]>} : vector<8x16x128xbf16>, vector<8x128x32xbf16>, vector<8x16x32xf32> -> vector<8x16x32xf32>
    "tpu.trace_stop"() : () -> ()
    %52 = vector.shape_cast %51 : vector<8x16x32xf32> to vector<128x32xf32>
    %53 = arith.truncf %52 : vector<128x32xf32> to vector<128x32xbf16>
    %c0_17 = arith.constant 0 : index
    %c0_18 = arith.constant 0 : index
    %54 = vector.load %arg4[%c0_17, %c0_18] : memref<32x32xf32, #tpu.memory_space<vmem>>, vector<32x32xf32>
    %55 = arith.truncf %54 : vector<32x32xf32> to vector<32x32xbf16>
    %cst_19 = arith.constant dense<0.000000e+00> : vector<128x32xf32>
    %56 = tpu.matmul %53, %55, %cst_19 {dimension_numbers = #tpu.dot_dimension_numbers<[1], [0], [0], [1], [0, 0, 1, 1], [], []>} : vector<128x32xbf16>, vector<32x32xbf16>, vector<128x32xf32> -> vector<128x32xf32>
    %57 = vector.broadcast %1 : vector<1x32xf32> to vector<128x32xf32>
    %58 = arith.addf %56, %57 : vector<128x32xf32>
    %59 = arith.addf %8, %58 : vector<128x32xf32>
    %cst_20 = arith.constant dense<0.000000e+00> : vector<128xf32>
    %60 = vector.multi_reduction <add>, %59, %cst_20 [1] : vector<128x32xf32> to vector<128xf32>
    %61 = vector.shape_cast %60 : vector<128xf32> to vector<128x1xf32>
    %cst_21 = arith.constant 3.200000e+01 : f32
    %62 = vector.broadcast %cst_21 : f32 to vector<128x1xf32>
    %63 = arith.divf %61, %62 : vector<128x1xf32>
    %64 = vector.broadcast %63 : vector<128x1xf32> to vector<128x32xf32>
    %65 = arith.subf %59, %64 : vector<128x32xf32>
    %66 = arith.mulf %65, %65 : vector<128x32xf32>
    %cst_22 = arith.constant dense<0.000000e+00> : vector<128xf32>
    %67 = vector.multi_reduction <add>, %66, %cst_22 [1] : vector<128x32xf32> to vector<128xf32>
    %68 = vector.shape_cast %67 : vector<128xf32> to vector<128x1xf32>
    %cst_23 = arith.constant 3.200000e+01 : f32
    %69 = vector.broadcast %cst_23 : f32 to vector<128x1xf32>
    %70 = arith.divf %68, %69 : vector<128x1xf32>
    %71 = vector.broadcast %63 : vector<128x1xf32> to vector<128x32xf32>
    %72 = arith.subf %59, %71 : vector<128x32xf32>
    %cst_24 = arith.constant 9.99999974E-6 : f32
    %73 = vector.broadcast %cst_24 : f32 to vector<128x1xf32>
    %74 = arith.addf %70, %73 : vector<128x1xf32>
    %75 = math.rsqrt %74 : vector<128x1xf32>
    %76 = vector.broadcast %75 : vector<128x1xf32> to vector<128x32xf32>
    %77 = arith.mulf %72, %76 : vector<128x32xf32>
    %78 = vector.broadcast %2 : vector<1x32xf32> to vector<128x32xf32>
    %79 = arith.mulf %77, %78 : vector<128x32xf32>
    %80 = vector.broadcast %3 : vector<1x32xf32> to vector<128x32xf32>
    %81 = arith.addf %79, %80 : vector<128x32xf32>
    %82 = arith.truncf %81 : vector<128x32xf32> to vector<128x32xbf16>
    %c0_25 = arith.constant 0 : index
    %c0_26 = arith.constant 0 : index
    %83 = vector.load %arg5[%c0_25, %c0_26] : memref<32x64xf32, #tpu.memory_space<vmem>>, vector<32x64xf32>
    %84 = arith.truncf %83 : vector<32x64xf32> to vector<32x64xbf16>
    %cst_27 = arith.constant dense<0.000000e+00> : vector<128x64xf32>
    %85 = tpu.matmul %82, %84, %cst_27 {dimension_numbers = #tpu.dot_dimension_numbers<[1], [0], [0], [1], [0, 0, 1, 1], [], []>} : vector<128x32xbf16>, vector<32x64xbf16>, vector<128x64xf32> -> vector<128x64xf32>
    %c0_28 = arith.constant 0 : index
    %c0_29 = arith.constant 0 : index
    %86 = vector.load %arg6[%c0_28, %c0_29] : memref<1x64xf32, #tpu.memory_space<vmem>>, vector<1x64xf32>
    %87 = vector.broadcast %86 : vector<1x64xf32> to vector<128x64xf32>
    %88 = arith.addf %85, %87 : vector<128x64xf32>
    %cst_30 = arith.constant 0.000000e+00 : f32
    %89 = vector.broadcast %cst_30 : f32 to vector<128x64xf32>
    %90 = arith.maximumf %88, %89 : vector<128x64xf32>
    %91 = arith.truncf %90 : vector<128x64xf32> to vector<128x64xbf16>
    %c0_31 = arith.constant 0 : index
    %c0_32 = arith.constant 0 : index
    %92 = vector.load %arg7[%c0_31, %c0_32] : memref<64x32xf32, #tpu.memory_space<vmem>>, vector<64x32xf32>
    %93 = arith.truncf %92 : vector<64x32xf32> to vector<64x32xbf16>
    %cst_33 = arith.constant dense<0.000000e+00> : vector<128x32xf32>
    %94 = tpu.matmul %91, %93, %cst_33 {dimension_numbers = #tpu.dot_dimension_numbers<[1], [0], [0], [1], [0, 0, 1, 1], [], []>} : vector<128x64xbf16>, vector<64x32xbf16>, vector<128x32xf32> -> vector<128x32xf32>
    %95 = vector.broadcast %4 : vector<1x32xf32> to vector<128x32xf32>
    %96 = arith.addf %94, %95 : vector<128x32xf32>
    %97 = arith.addf %81, %96 : vector<128x32xf32>
    %cst_34 = arith.constant dense<0.000000e+00> : vector<128xf32>
    %98 = vector.multi_reduction <add>, %97, %cst_34 [1] : vector<128x32xf32> to vector<128xf32>
    %99 = vector.shape_cast %98 : vector<128xf32> to vector<128x1xf32>
    %cst_35 = arith.constant 3.200000e+01 : f32
    %100 = vector.broadcast %cst_35 : f32 to vector<128x1xf32>
    %101 = arith.divf %99, %100 : vector<128x1xf32>
    %102 = vector.broadcast %101 : vector<128x1xf32> to vector<128x32xf32>
    %103 = arith.subf %97, %102 : vector<128x32xf32>
    %104 = arith.mulf %103, %103 : vector<128x32xf32>
    %cst_36 = arith.constant dense<0.000000e+00> : vector<128xf32>
    %105 = vector.multi_reduction <add>, %104, %cst_36 [1] : vector<128x32xf32> to vector<128xf32>
    %106 = vector.shape_cast %105 : vector<128xf32> to vector<128x1xf32>
    %cst_37 = arith.constant 3.200000e+01 : f32
    %107 = vector.broadcast %cst_37 : f32 to vector<128x1xf32>
    %108 = arith.divf %106, %107 : vector<128x1xf32>
    %109 = vector.broadcast %101 : vector<128x1xf32> to vector<128x32xf32>
    %110 = arith.subf %97, %109 : vector<128x32xf32>
    %cst_38 = arith.constant 9.99999974E-6 : f32
    %111 = vector.broadcast %cst_38 : f32 to vector<128x1xf32>
    %112 = arith.addf %108, %111 : vector<128x1xf32>
    %113 = math.rsqrt %112 : vector<128x1xf32>
    %114 = vector.broadcast %113 : vector<128x1xf32> to vector<128x32xf32>
    %115 = arith.mulf %110, %114 : vector<128x32xf32>
    %116 = vector.broadcast %5 : vector<1x32xf32> to vector<128x32xf32>
    %117 = arith.mulf %115, %116 : vector<128x32xf32>
    %118 = vector.broadcast %6 : vector<1x32xf32> to vector<128x32xf32>
    %119 = arith.addf %117, %118 : vector<128x32xf32>
    %120 = vector.shape_cast %119 : vector<128x32xf32> to vector<8x16x32xf32>
    %c0_39 = arith.constant 0 : index
    %c0_40 = arith.constant 0 : index
    %c0_41 = arith.constant 0 : index
    %121 = vector.load %arg11[%c0_39, %c0_40, %c0_41] : memref<8x16x32xf32, #tpu.memory_space<vmem>>, vector<8x16x32xf32>
    tpu.vector_store %arg11[%c0_39, %c0_40, %c0_41], %120 {strides = array<i32>} : memref<8x16x32xf32, #tpu.memory_space<vmem>>, vector<8x16x32xf32>,
    return
  }
  func.func @transform_0(%arg0: i32) -> (i32, i32, i32) {
    %c0_i32 = arith.constant 0 : i32
    %c0_i32_0 = arith.constant 0 : i32
    %c0_i32_1 = arith.constant 0 : i32
    return %arg0, %c0_i32, %c0_i32_0 : i32, i32, i32
  }
  func.func @transform_1(%arg0: i32) -> (i32, i32) {
    %c0_i32 = arith.constant 0 : i32
    %c0_i32_0 = arith.constant 0 : i32
    %c0_i32_1 = arith.constant 0 : i32
    return %c0_i32, %c0_i32_0 : i32, i32
  }
  func.func @transform_2(%arg0: i32) -> (i32, i32) {
    %c0_i32 = arith.constant 0 : i32
    %c0_i32_0 = arith.constant 0 : i32
    %c0_i32_1 = arith.constant 0 : i32
    return %c0_i32, %c0_i32_0 : i32, i32
  }
  func.func @transform_3(%arg0: i32) -> (i32, i32) {
    %c0_i32 = arith.constant 0 : i32
    %c0_i32_0 = arith.constant 0 : i32
    %c0_i32_1 = arith.constant 0 : i32
    return %c0_i32, %c0_i32_0 : i32, i32
  }
  func.func @transform_4(%arg0: i32) -> (i32, i32) {
    %c0_i32 = arith.constant 0 : i32
    %c0_i32_0 = arith.constant 0 : i32
    %c0_i32_1 = arith.constant 0 : i32
    return %c0_i32, %c0_i32_0 : i32, i32
  }
  func.func @transform_5(%arg0: i32) -> (i32, i32) {
    %c0_i32 = arith.constant 0 : i32
    %c0_i32_0 = arith.constant 0 : i32
    %c0_i32_1 = arith.constant 0 : i32
    return %c0_i32, %c0_i32_0 : i32, i32
  }
  func.func @transform_6(%arg0: i32) -> (i32, i32) {
    %c0_i32 = arith.constant 0 : i32
    %c0_i32_0 = arith.constant 0 : i32
    %c0_i32_1 = arith.constant 0 : i32
    return %c0_i32, %c0_i32_0 : i32, i32
  }
  func.func @transform_7(%arg0: i32) -> (i32, i32) {
    %c0_i32 = arith.constant 0 : i32
    %c0_i32_0 = arith.constant 0 : i32
    %c0_i32_1 = arith.constant 0 : i32
    return %c0_i32, %c0_i32_0 : i32, i32
  }
  func.func @transform_8(%arg0: i32) -> (i32, i32) {
    %c0_i32 = arith.constant 0 : i32
    %c0_i32_0 = arith.constant 0 : i32
    %c0_i32_1 = arith.constant 0 : i32
    return %c0_i32, %c0_i32_0 : i32, i32
  }
  func.func @transform_9(%arg0: i32) -> (i32, i32) {
    %c0_i32 = arith.constant 0 : i32
    %c0_i32_0 = arith.constant 0 : i32
    %c0_i32_1 = arith.constant 0 : i32
    return %c0_i32, %c0_i32_0 : i32, i32
  }
  func.func @transform_10(%arg0: i32) -> (i32, i32, i32) {
    %c0_i32 = arith.constant 0 : i32
    %c0_i32_0 = arith.constant 0 : i32
    %c0_i32_1 = arith.constant 0 : i32
    return %arg0, %c0_i32, %c0_i32_0 : i32, i32, i32
  }
}

</mosaic_0001>

<bundles_post_ra>
// kernel: self_attention_layer.1
= control target key start
LH: loop header
LB: loop body
LE: loop exit
PB: predicated region body
PF: predicated region fallthrough
CT: control target
= control target key end

     0   :  { %s7323_s0 = inlined_call_operand.hbm [shape: f32[16,16,32], index: 0, kind: input, shape index: {}]   ;;  %s7324_s1 = inlined_call_operand.vmem [shape: f32[32,96], index: 1, kind: input, shape index: {}]   ;;  %s7325_s2 = inlined_call_operand.vmem [shape: f32[1,96], index: 2, kind: input, shape index: {}]   ;;  %s7326_s3 = inlined_call_operand.hbm [shape: f32[32,32], index: 3, kind: input, shape index: {}]   ;;  %s7327_s4 = inlined_call_operand.hbm [shape: f32[32,64], index: 4, kind: input, shape index: {}]   ;;  %s7328_s5 = inlined_call_operand.hbm [shape: f32[1,64], index: 5, kind: input, shape index: {}]   ;;  %s7329_s6 = inlined_call_operand.vmem [shape: f32[64,32], index: 6, kind: input, shape index: {}]   ;;  %s7330_s7 = inlined_call_operand.vmem [shape: f32[6,32], index: 7, kind: input, shape index: {}]   ;;  %s7331_s8 = inlined_call_operand.vmem [shape: f32[128,32], index: 8, kind: input, shape index: {}]   ;;  %s7332_s9 = inlined_call_operand.vmem [shape: f32[128,128], index: 9, kind: input, shape index: {}]   ;;  %s7333_s10 = inlined_call_operand.hbm [shape: f32[16,16,32], index: 10, kind: output, shape index: {}]  }
   0x1   :  { %7341 = sst [smem:[#allocation17_spill]] %s7329_s6 }
   0x2   :  { %7342 = sst [smem:[#allocation18_spill]] %s7333_s10 }
   0x3   :  { %15 = vsyncpa [#allocation3], 0 }
   0x4   :  { %17 = vsyncpa [#allocation3 + $0x1], 0 }
   0x5   :  { %18 = vsyncpa [#allocation6], 0 }
   0x6   :  { %19 = vsyncpa [#allocation9], 0 }
   0x7   :  { %20 = vsyncpa [#allocation4], 0 }
   0x8   :  { %22 = vsyncpa [#allocation4 + $0x1], 0  ;;  %s5006_s13 = smov 0   ;;  %s5008_s14 = smov 0  }
   0x9   :  { %s5010_s15 = smov 0   ;;  %s5012_s16 = smov 0  }
   0xa LB: > { %7343 = sst [smem:[#allocation15_spill]] %s4923_s13  ;;  %s5027_s17 = sadd.s32 4294967295, %s4935_s16   ;;  %s4935_s16 = sphi %s5012_s16, %s7368_s16   ;;  %s4931_s15 = sphi %s5010_s15, %s7367_s15   ;;  %s4927_s14 = sphi %s5008_s14, %s7366_s14   ;;  %s4923_s13 = sphi %s5006_s13, %s7365_s13  }
   0xb   : > { %s3794_s18 = sadd.s32 4294967294, %s4935_s16   ;;  %p48_p0 = scmp.ne.s32.totalorder %s4927_s14, %s4923_s13 }
   0xc   : > { %p7334_p1 = scmp.eq.s32.totalorder %s5027_s17, 0  ;;  %p267_p3 = scmp.eq.s32.totalorder %s3794_s18, 1 }
   0xd   : > { %p3795_p5 = scmp.ge.s32.totalorder %s4935_s16, 1  ;;  %p274_p7 = scmp.lt.s32.totalorder %s4935_s16, 3 }
   0xe   : > { %p5036_p4 = por %p7334_p1, %p48_p0  ;;  %p5041_p6 = por %p267_p3, %p48_p0 }
   0xf   : > { %p5046_p8 = pnand %p3795_p5, %p274_p7  ;;  %s4937_s22 = smov [#allocation5]  }
  0x10   : > { %s7344_s19 = scalar_select %p5036_p4, 1, 0 }
  0x11   : > { %s7345_s20 = scalar_select %p5041_p6, 1, 0 }
  0x12   : > { %s7347_s21 = scalar_select %p5046_p8, 1, 0 }
  0x13   : > { %7346 = sst [smem:[#allocation16_spill]] %s7345_s20  ;;  %s292_s23 = sshll.u32 %s4937_s22, 4  ;;  %s5050_s23 = int_to_ptr.vmem [resolvable:$true] %s292_s23 }
  0x14   : > { %p4516_p9 = pneg %p5046_p8  ;;  %s4938_s25 = smov [#allocation7]  }
  0x15   : > { %s305_s26 = sshll.u32 %s4938_s25, 4  ;;  %s4939_s27 = smov [#allocation8]   ;;  %s5061_s26 = int_to_ptr.vmem [resolvable:$true] %s305_s26 }
  0x16   : > { %p5057_p11 = pnand %p4516_p9, %p7334_p1  ;;  %s5063_s28 = sshll.u32 %s4939_s27, 4  ;;  %s320_s28 = int_to_ptr.vmem [resolvable:$true] %s5063_s28 }
  0x17   : > { %s4747_s11 = scalar_lea.hbm %s7326_s3, 512 }
  0x18   : > { %p4748_p12 = scmp.ne.s32.totalorder %s7326_s3, %s4747_s11  ;;  %p5073_p13 = pneg %p5057_p11 }
  0x19   : > { %p4754_p5 = scmp.lt.u32.totalorder %s4747_s11, %s7326_s3 }
  0x1a   : > { %p4750_p0 = pnand %p5073_p13, %p4748_p12 }
  0x1c   : > { %p4751_p3 = pneg %p4750_p0 }
  0x1e   : > { %p4756_p7 = pnand %p4754_p5, %p4751_p3 }
  0x20   : > { %4759 = shalt.err (!%p4756_p7)
}
  0x21   : > { %s4760_s29 = scalar_lea.vmem %s5050_s23, 512  ;;  %p4768_p2 = scmp.lt.s32.totalorder %s5050_s23, %s5050_s23 }
  0x22   : > { %p4761_p9 = scmp.ne.s32.totalorder %s5050_s23, %s4760_s29  ;;  %p4769_p6 = scmp.lt.s32.totalorder %s4760_s29, %s4760_s29 }
  0x24   : > { %p4763_p10 = pnand %p4761_p9, %p5073_p13  ;;  %p4770_p12 = por %p4769_p6, %p4768_p2 }
  0x26   : > { %p4764_p1 = pneg %p4763_p10 }
  0x28   : > { %p4771_p0 = pnand %p4770_p12, %p4764_p1 }
  0x2a   : > { %4774 = shalt.err (!%p4771_p0)
}
  0x2b   : > { %s4940_s30 = smov 128   ;;  %s4941_s11 = smov 8  }
  0x2c   : > { %4519 = dma.hbm_to_vmem [thread:$0]  (!%p5057_p11), %s7326_s3, 512, %s5050_s23, [#allocation6], %s4940_s30, %s4940_s30, %s4941_s11  }
  0x2d   : > { %s4775_s29 = scalar_lea.hbm %s7327_s4, 512 }
  0x2e   : > { %p4776_p1 = scmp.ne.s32.totalorder %s7327_s4, %s4775_s29  ;;  %p4782_p10 = scmp.lt.u32.totalorder %s4775_s29, %s7327_s4 }
  0x30   : > { %p4778_p2 = pnand %p4776_p1, %p5073_p13 }
  0x32   : > { %p4779_p6 = pneg %p4778_p2 }
  0x34   : > { %p4784_p3 = pnand %p4782_p10, %p4779_p6 }
  0x36   : > { %4787 = shalt.err (!%p4784_p3)
}
  0x37   : > { %s4788_s23 = scalar_lea.vmem %s5061_s26, 512  ;;  %p4796_p12 = scmp.lt.s32.totalorder %s5061_s26, %s5061_s26 }
  0x38   : > { %p4789_p5 = scmp.ne.s32.totalorder %s5061_s26, %s4788_s23  ;;  %p4797_p0 = scmp.lt.s32.totalorder %s4788_s23, %s4788_s23 }
  0x3a   : > { %p4791_p7 = pnand %p4789_p5, %p5073_p13  ;;  %p4798_p1 = por %p4797_p0, %p4796_p12 }
  0x3c   : > { %p4792_p9 = pneg %p4791_p7 }
  0x3e   : > { %p4799_p2 = pnand %p4798_p1, %p4792_p9 }
  0x40   : > { %4802 = shalt.err (!%p4799_p2)
}
  0x41   : > { %4522 = dma.hbm_to_vmem [thread:$0]  (!%p5057_p11), %s7327_s4, 512, %s5061_s26, [#allocation6], %s4940_s30, %s4940_s30, %s4941_s11  }
  0x42   : > { %s4803_s12 = scalar_lea.hbm %s7328_s5, 16 }
  0x43   : > { %p4804_p6 = scmp.ne.s32.totalorder %s7328_s5, %s4803_s12  ;;  %p4810_p5 = scmp.lt.u32.totalorder %s4803_s12, %s7328_s5 }
  0x45   : > { %p4806_p10 = pnand %p4804_p6, %p5073_p13 }
  0x47   : > { %p4807_p3 = pneg %p4806_p10 }
  0x49   : > { %p4812_p7 = pnand %p4810_p5, %p4807_p3 }
  0x4b   : > { %4815 = shalt.err (!%p4812_p7)
}
  0x4c   : > { %s4816_s23 = scalar_lea.vmem %s320_s28, 16  ;;  %s4823_s26 = scalar_lea.vmem %s320_s28, 32 }
  0x4d   : > { %p4817_p9 = scmp.ne.s32.totalorder %s320_s28, %s4816_s23  ;;  %p4824_p1 = scmp.lt.s32.totalorder %s320_s28, %s320_s28 }
  0x4e   : > { %p4825_p2 = scmp.lt.s32.totalorder %s4823_s26, %s4816_s23 }
  0x4f   : > { %p4819_p12 = pnand %p4817_p9, %p5073_p13 }
  0x50   : > { %p4826_p4 = por %p4825_p2, %p4824_p1 }
  0x51   : > { %p4820_p0 = pneg %p4819_p12 }
  0x53   : > { %p4827_p8 = pnand %p4826_p4, %p4820_p0 }
  0x55   : > { %4830 = shalt.err (!%p4827_p8)
}
  0x56   : > { %4525 = dma.hbm_to_vmem [thread:$0]  (!%p5057_p11), %s7328_s5, 16, %s320_s28, [#allocation9]  }
  0x57   : > { %s5143_s22 = sadd.s32 1, %s4935_s16   ;;  %s35_s24 = sadd.s32 1, %s4931_s15 }
  0x58   : > { %s32_s13 = ssub.s32 %s4935_s16, %s5143_s22  ;;  %p42_p8 = scmp.ne.s32.totalorder %s4931_s15, %s4927_s14 }
  0x59   : > { %p33_p4 = scmp.eq.s32.totalorder %s32_s13, 0  ;;  %p43_p13 = scmp.eq.s32.totalorder %s4935_s16, 0 }
  0x5a   : > { %p4537_p6 = scmp.lt.s32.totalorder %s4935_s16, 2  ;;  %p7350_p3 = scmp.eq.s32.totalorder %s5027_s17, 1 }
  0x5b   : > { %s5153_s20 = scalar_select %p33_p4, %s4931_s15, %s35_s24  }
  0x5c   : > { %p44_p10 = por %p43_p13, %p42_p8  ;;  %p5157_p5 = por %p7350_p3, %p42_p8 }
  0x5d   : > { %s342_s18 = sand.u32 1, %s4931_s15   ;;  %s3859_s25 = sshll.u32 %s4935_s16, 11 }
  0x5e   : > { %s3800_s28 = sshll.u32 %s342_s18, 7  ;;  %s5166_s23 = scalar_lea.hbm %s7323_s0, %s3859_s25 }
  0x5f   : > { %s346_s26 = scalar_lea.vmem [#allocation2], %s3800_s28  ;;  %p5168_p11 = pnand %p4537_p6, %p44_p10 }
  0x60   : > { %s354_s6 = sshll.u32 %s346_s26, 4  ;;  %s5174_s13 = scalar_lea.sflag [#allocation3], %s342_s18  ;;  %s5172_s6 = int_to_ptr.vmem [resolvable:$true] %s354_s6 }
  0x61   : > { %s4831_s24 = scalar_lea.hbm %s5166_s23, 2048  ;;  %p4833_p9 = pneg %p5168_p11 }
  0x62   : > { %p4832_p7 = scmp.ne.s32.totalorder %s5166_s23, %s4831_s24  ;;  %s4836_s27 = scalar_lea.hbm %s7323_s0, 4096 }
  0x63   : > { %p4837_p1 = scmp.lt.u32.totalorder %s5166_s23, %s7323_s0  ;;  %p4838_p2 = scmp.lt.u32.totalorder %s4836_s27, %s4831_s24 }
  0x64   : > { %p4834_p12 = pnand %p4833_p9, %p4832_p7  ;;  %p4840_p8 = scmp.lt.u32.totalorder %s4831_s24, %s5166_s23 }
  0x65   : > { %p4839_p4 = por %p4838_p2, %p4837_p1 }
  0x66   : > { %p4835_p0 = pneg %p4834_p12 }
  0x67   : > { %p4841_p13 = por %p4840_p8, %p4839_p4 }
  0x69   : > { %p4842_p6 = pnand %p4841_p13, %p4835_p0 }
  0x6b   : > { %4845 = shalt.err (!%p4842_p6)
}
  0x6c   : > { %s4846_s18 = scalar_lea.vmem %s5172_s6, 2048  ;;  %s4942_s25 = smov [#allocation2]  }
  0x6d   : > { %p4847_p10 = scmp.ne.s32.totalorder %s5172_s6, %s4846_s18  ;;  %s4851_s28 = sshll.u32 %s4942_s25, 4  ;;  %s4852_s28 = int_to_ptr.vmem [resolvable:$false] %s4851_s28 }
  0x6e   : > { %s4853_s29 = scalar_lea.vmem %s4852_s28, 4096  ;;  %p4854_p12 = scmp.lt.s32.totalorder %s5172_s6, %s4852_s28 }
  0x6f   : > { %p4849_p3 = pnand %p4847_p10, %p4833_p9  ;;  %p4855_p1 = scmp.lt.s32.totalorder %s4853_s29, %s4846_s18 }
  0x71   : > { %p4850_p7 = pneg %p4849_p3  ;;  %p4856_p2 = por %p4855_p1, %p4854_p12 }
  0x73   : > { %p4857_p4 = pnand %p4856_p2, %p4850_p7 }
  0x75   : > { %4860 = shalt.err (!%p4857_p4)
}
  0x76   : > { %4529 = dma.hbm_to_vmem [thread:$0]  (!%p5168_p11), %s5166_s23, 2048, %s5172_s6, %s5174_s13, %s4940_s30, %s4940_s30, %s4941_s11  }
  0x77   : > { %p7353_p9 = scmp.ne.s32.totalorder %s7347_s21, 0 }
  0x78   : > { %s5208_s24 = sand.u32 (!%p7353_p9), 1, %s4927_s14   ;;  %p7354_p0 = scmp.ne.s32.totalorder (!%p7353_p9), %s7344_s19, 0 }
  0x79   : > { %366 = sbr.rel (%p7353_p9) target bundleno = 2880 (0xb40), region = 60  ;;  %s3805_s27 = sshll.u32 (!%p7353_p9), %s5208_s24, 7 }
  0x7a   : > { %s369_s26 = scalar_lea.sflag (!%p7353_p9), [#allocation3], %s5208_s24  ;;  %s5214_s10 = scalar_lea.vmem (!%p7353_p9), [#allocation2], %s3805_s27 }
  0x80   : > { %4906 = dma.done.wait (%p7354_p0), %s369_s26, 2048  }
  0x81   : > { %4908 = vsyncadd (%p7354_p0), %s369_s26, 4294965248  ;;  %p7355_p11 = scmp.eq.s32.totalorder %s5027_s17, 0 }
  0x83   : > { %4910 = dma.done.wait (%p7355_p11), [#allocation6], 1024   ;;  %p7356_p8 = pmov %p7355_p11 }
  0x85   : > { %4912 = vsyncadd (%p7356_p8), [#allocation6], 4294966272  ;;  %p7357_p13 = pmov %p7356_p8 }
  0x86   : > { %p7358_p6 = pmov %p7356_p8 }
  0x87   : > { %4914 = dma.done.wait (%p7357_p13), [#allocation9], 16  }
  0x88   : > { %4916 = vsyncadd (%p7358_p6), [#allocation9], 4294967280  ;;  %v449_v0 = vld [vmem:[%s7324_s1] sm:$0xff]  ;;  %v450_v1 = vld [vmem:[%s7324_s1 + $0x8] sm:$0xff]  ;;  %vm462_vm0 = vcmask 261120   ;;  %s4943_s29 = smov 32  }
  0x89   : > { %v451_v2 = vld [vmem:[%s7324_s1 + $0x10] sm:$0xff]  ;;  %v453_v3 = vpack.c.bf16 %v450_v1, %v449_v0  ;;  %v452_v4 = vld [vmem:[%s7324_s1 + $0x18] sm:$0xff]  ;;  %v425_v5 = vld [vmem:[%s5214_s10] sm:$0xff]  ;;  %v4944_v50 = vmov 0.0   ;;  %vm4946_vm1 = vmmov 0   ;;  %s4947_s25 = smov 64  }
  0x8a   : > { %v426_v6 = vld [vmem:[%s5214_s10 + $0x8] sm:$0xff]  ;;  %v454_v7 = vpack.c.bf16 %v452_v4, %v451_v2  ;;  %v427_v9 = vld [vmem:[%s5214_s10 + $0x10] sm:$0xff]  ;;  %v428_v10 = vld [vmem:[%s5214_s10 + $0x18] sm:$0xff]  ;;  %4084 = vmatprep.subr.bf16.mxu1 %v4944_v50  ;;  %4100 = vmatprep.mubr.msk.bf16.mxu1 %vm4946_vm1, %v4944_v50  ;;  %s7359_s18 = sld [smem:[#allocation17_spill]]  ;;  %vm3275_vm2 = vcmask 523264   ;;  %s7196_s30 = scalar_lea.vmem [#allocation10], %s3805_s27 }
  0x8b   : > { %v441_v8 = vpack.c.bf16 %v426_v6, %v425_v5  ;;  %4064 = vmatprep.subr.bf16.mxu0 %v453_v3  ;;  %v429_v11 = vld [vmem:[%s5214_s10 + $0x20] sm:$0xff]  ;;  %v430_v12 = vld [vmem:[%s5214_s10 + $0x28] sm:$0xff]  ;;  %v442_v14 = vpack.c.bf16 %v428_v10, %v427_v9  ;;  %v610_v15 = vld [vmem:[%s7331_s8 + $0x10] sm:$0xff]  ;;  %s3861_s27 = sshll.u32 %s5027_s17, 11  ;;  %s3692_s19 = sshll.u32 %s7196_s30, 4  ;;  %s7274_s19 = int_to_ptr.vmem [resolvable:$true] %s3692_s19 }
  0x8c   : > { %4065 = vmatpush3.bf16.msra.mxu0 %v453_v3  ;;  %v608_v13 = vld [vmem:[%s7331_s8] sm:$0xff]  ;;  %v443_v16 = vpack.c.bf16 %v430_v12, %v429_v11  ;;  %644 = vrot.lane.b32.xlu1 %v610_v15, %s4943_s29  ;;  %v609_v17 = vld [vmem:[%s7331_s8 + $0x8] sm:$0xff]  ;;  %v611_v18 = vld [vmem:[%s7331_s8 + $0x18] sm:$0xff]  ;;  %s3678_s17 = scalar_lea.sflag [#allocation4], %s5208_s24  ;;  %s4948_s13 = smov [#allocation10]  }
  0x8d   : > { %4068 = vmatprep.mubr.msk.bf16.mxu0 %vm462_vm0, %v441_v8  ;;  %4066 = vmatprep.subr.bf16.mxu0 %v454_v7  ;;  %v431_v19 = vld [vmem:[%s5214_s10 + $0x30] sm:$0xff]  ;;  %v432_v20 = vld [vmem:[%s5214_s10 + $0x38] sm:$0xff]  ;;  %v612_v21 = vld [vmem:[%s7331_s8 + $0x20] sm:$0xff] }
  0x8e   : > { %640 = vrot.lane.b32.xlu0 %v608_v13, %s4943_s29  ;;  %v433_v22 = vld [vmem:[%s5214_s10 + $0x40] sm:$0xff]  ;;  %v434_v23 = vld [vmem:[%s5214_s10 + $0x48] sm:$0xff]  ;;  %v444_v25 = vpack.c.bf16 %v432_v20, %v431_v19  ;;  %v614_v27 = vld [vmem:[%s7331_s8 + $0x30] sm:$0xff] }
  0x8f   : > { %v613_v24 = vld [vmem:[%s7331_s8 + $0x28] sm:$0xff]  ;;  %v445_v26 = vpack.c.bf16 %v434_v23, %v433_v22  ;;  %v615_v28 = vld [vmem:[%s7331_s8 + $0x38] sm:$0xff]  ;;  %v435_v29 = vld [vmem:[%s5214_s10 + $0x50] sm:$0xff] }
  0x90   : > { %4067 = vmatpush3.bf16.msra.mxu0 %v454_v7  ;;  %646 = vrot.lane.b32.xlu1 %v611_v18, %s4943_s29  ;;  %v436_v30 = vld [vmem:[%s5214_s10 + $0x58] sm:$0xff]  ;;  %v616_v31 = vld [vmem:[%s7331_s8 + $0x40] sm:$0xff]  ;;  %v438_v33 = vld [vmem:[%s5214_s10 + $0x68] sm:$0xff] }
  0x91   : > { %v437_v32 = vld [vmem:[%s5214_s10 + $0x60] sm:$0xff]  ;;  %v617_v34 = vld [vmem:[%s7331_s8 + $0x48] sm:$0xff]  ;;  %v446_v35 = vpack.c.bf16 %v436_v30, %v435_v29  ;;  %v618_v37 = vld [vmem:[%s7331_s8 + $0x50] sm:$0xff]  ;;  %4104 = vmatprep.subr.bf16.mxu0 %v4944_v50 }
  0x92   : > { %642 = vrot.lane.b32.xlu0 %v609_v17, %s4943_s29  ;;  %v447_v36 = vpack.c.bf16 %v438_v33, %v437_v32  ;;  %v619_v38 = vld [vmem:[%s7331_s8 + $0x58] sm:$0xff]  ;;  %v439_v39 = vld [vmem:[%s5214_s10 + $0x70] sm:$0xff]  ;;  %v620_v41 = vld [vmem:[%s7331_s8 + $0x60] sm:$0xff] }
  0x93   : > { %4069 = vmatmul.mubr.msk.bf16.vlgmr.msra.gmra.mrb[0].mxu0 %vm462_vm0, %v442_v14  ;;  %v440_v40 = vld [vmem:[%s5214_s10 + $0x78] sm:$0xff]  ;;  %v621_v42 = vld [vmem:[%s7331_s8 + $0x68] sm:$0xff]  ;;  %v622_v44 = vld [vmem:[%s7331_s8 + $0x70] sm:$0xff] }
  0x94   : > { %4072 = vmatprep.mubr.msk.bf16.mxu0 %vm462_vm0, %v443_v16  ;;  %650 = vrot.lane.b32.xlu1 %v613_v24, %s4943_s29  ;;  %v448_v43 = vpack.c.bf16 %v440_v40, %v439_v39  ;;  %v623_v45 = vld [vmem:[%s7331_s8 + $0x78] sm:$0xff]  ;;  %v5343_v52 = vld [vmem:[%s7325_s2] ss:$0 sm:$0xff] }
  0x96   : > { %648 = vrot.lane.b32.xlu0 %v612_v21, %s4943_s29 }
  0x98   : > { %654 = vrot.lane.b32.xlu1 %v615_v28, %s4943_s29 }
  0x9a   : > { %652 = vrot.lane.b32.xlu0 %v614_v27, %s4943_s29 }
  0x9b   : > { %4073 = vmatmul.mubr.msk.bf16.gmra.mrb[4].mxu0 %vm462_vm0, %v444_v25 }
  0x9c   : > { %4076 = vmatprep.mubr.msk.bf16.mxu0 %vm462_vm0, %v445_v26  ;;  %658 = vrot.lane.b32.xlu1 %v617_v34, %s4943_s29 }
  0x9e   : > { %656 = vrot.lane.b32.xlu0 %v616_v31, %s4943_s29 }
  0xa0   : > { %662 = vrot.lane.b32.xlu1 %v619_v38, %s4943_s29 }
  0xa2   : > { %660 = vrot.lane.b32.xlu0 %v618_v37, %s4943_s29 }
  0xa3   : > { %4077 = vmatmul.mubr.msk.bf16.gmra.mrb[8].mxu0 %vm462_vm0, %v446_v35 }
  0xa4   : > { %4080 = vmatprep.mubr.msk.bf16.mxu0 %vm462_vm0, %v447_v36  ;;  %666 = vrot.lane.b32.xlu1 %v621_v42, %s4943_s29 }
  0xa6   : > { %664 = vrot.lane.b32.xlu0 %v620_v41, %s4943_s29 }
  0xa8   : > { %670 = vrot.lane.b32.xlu1 %v623_v45, %s4943_s29 }
  0xaa   : > { %668 = vrot.lane.b32.xlu0 %v622_v44, %s4943_s29  ;;  %s4945_s29 = smov 96  }
  0xab   : > { %4081 = vmatmul.mubr.msk.bf16.gmra.mrb[12].mxu0 %vm462_vm0, %v448_v43 }
  0xac   : > { %4120 = vmatprep.mubr.msk.bf16.mxu0 %vm4946_vm1, %v4944_v50 }
  0xfe   : > { %v5328_v46 = vpop.permute.xlu1 %644 }
 0x100   : > { %v5330_v47 = vpop.permute.xlu0 %640 }
 0x102   : > { %v5332_v48 = vpop.permute.xlu1 %646 }
 0x104   : > { %v5334_v49 = vpop.permute.xlu0 %642 }
 0x106   : > { %v5338_v51 = vpop.permute.xlu1 %650 }
 0x108   : > { %v5345_v53 = vpop.permute.xlu0 %648 }
 0x10a   : > { %v5356_v61 = vpop.permute.xlu1 %654 }
 0x10c   : > { %v5365_v1 = vpop.permute.xlu0 %652 }
 0x10e   : > { %v5382_v11 = vpop.permute.xlu1 %658 }
 0x110   : > { %v5393_v17 = vpop.permute.xlu0 %656 }
 0x112   : > { %v5405_v24 = vpop.permute.xlu1 %662 }
 0x114   : > { %v5415_v31 = vpop.permute.xlu0 %660 }
 0x116   : > { %v5436_v43 = vpop.permute.xlu1 %666 }
 0x166   : > { %v4070_v54 = vpop.f32.mrb[0].mxu0 }
 0x167   : > { %v5348_v55 = vadd.f32 %v4070_v54, %v5343_v52  ;;  %v521_v56 = vpop.f32.mrb[1].mxu0 }
 0x168   : > { %v5351_v57 = vadd.f32 %v5343_v52, %v521_v56  ;;  %v4071_v58 = vpop.f32.mrb[2].mxu0  ;;  %v5443_v56 = vpop.permute.xlu0 %664 }
 0x169   : > { %v5354_v59 = vadd.f32 %v4071_v58, %v5343_v52  ;;  %v524_v60 = vpop.f32.mrb[3].mxu0  ;;  %v704_v63 = vmul.f32 %v5330_v47, %v5348_v55  ;;  %v706_v10 = vmul.f32 %v5328_v46, %v5348_v55  ;;  %v708_v20 = vmul.f32 %v5345_v53, %v5348_v55 }
 0x16a   : > { %v5359_v62 = vadd.f32 %v5343_v52, %v524_v60  ;;  %v688_v2 = vmul.f32 %v5330_v47, %v5351_v57  ;;  %v690_v13 = vmul.f32 %v5328_v46, %v5351_v57  ;;  %v692_v21 = vmul.f32 %v5345_v53, %v5351_v57 }
 0x16b   : > { %v705_v0 = vmul.f32 %v5334_v49, %v5354_v59  ;;  %v707_v5 = vmul.f32 %v5332_v48, %v5354_v59  ;;  %v709_v16 = vmul.f32 %v5338_v51, %v5354_v59  ;;  %v711_v23 = vmul.f32 %v5356_v61, %v5354_v59 }
 0x16c   : > { %v689_v3 = vmul.f32 %v5334_v49, %v5359_v62  ;;  %v691_v8 = vmul.f32 %v5332_v48, %v5359_v62  ;;  %v693_v19 = vmul.f32 %v5338_v51, %v5359_v62  ;;  %v695_v27 = vmul.f32 %v5356_v61, %v5359_v62 }
 0x16d   : > { %v824_v4 = vpack.c.bf16 %v705_v0, %v704_v63  ;;  %v825_v15 = vpack.c.bf16 %v707_v5, %v706_v10  ;;  %v826_v22 = vpack.c.bf16 %v709_v16, %v708_v20  ;;  %v710_v30 = vmul.f32 %v5365_v1, %v5348_v55  ;;  %v5464_v16 = vpop.permute.xlu1 %670 }
 0x16e   : > { %v5373_v6 = vpop.f32.mrb[4].mxu0  ;;  %v816_v7 = vpack.c.bf16 %v689_v3, %v688_v2  ;;  %v817_v18 = vpack.c.bf16 %v691_v8, %v690_v13  ;;  %v818_v26 = vpack.c.bf16 %v693_v19, %v692_v21  ;;  %v694_v34 = vmul.f32 %v5365_v1, %v5351_v57 }
 0x16f   : > { %1220 = vrot.lane.b32.xlu1 %v824_v4, %s4945_s29  ;;  %v5378_v9 = vpop.f32.mrb[5].mxu0  ;;  %v827_v37 = vpack.c.bf16 %v711_v23, %v710_v30  ;;  %v713_v38 = vmul.f32 %v5382_v11, %v5354_v59  ;;  %v697_v41 = vmul.f32 %v5382_v11, %v5359_v62  ;;  %v712_v42 = vmul.f32 %v5393_v17, %v5348_v55 }
 0x170   : > { %v5384_v12 = vpop.f32.mrb[6].mxu0  ;;  %1128 = vrot.lane.b32.xlu0 %v816_v7, %s4945_s29  ;;  %v819_v40 = vpack.c.bf16 %v695_v27, %v694_v34  ;;  %v696_v44 = vmul.f32 %v5393_v17, %v5351_v57  ;;  %v715_v54 = vmul.f32 %v5405_v24, %v5354_v59  ;;  %v699_v63 = vmul.f32 %v5405_v24, %v5359_v62 }
 0x171   : > { %v5389_v14 = vpop.f32.mrb[7].mxu0  ;;  %v828_v45 = vpack.c.bf16 %v713_v38, %v712_v42  ;;  %v714_v3 = vmul.f32 %v5415_v31, %v5348_v55  ;;  %v698_v7 = vmul.f32 %v5415_v31, %v5351_v57  ;;  %v701_v20 = vmul.f32 %v5436_v43, %v5359_v62 }
 0x172   : > { %v820_v60 = vpack.c.bf16 %v697_v41, %v696_v44  ;;  %v716_v21 = vmul.f32 %v5443_v56, %v5348_v55  ;;  %v700_v23 = vmul.f32 %v5443_v56, %v5351_v57  ;;  %v719_v27 = vmul.f32 %v5464_v16, %v5354_v59 }
 0x173   : > { %1222 = vrot.lane.b32.xlu1 %v825_v15, %s4945_s29  ;;  %v829_v13 = vpack.c.bf16 %v715_v54, %v714_v3  ;;  %v717_v15 = vmul.f32 %v5436_v43, %v5354_v59  ;;  %v821_v19 = vpack.c.bf16 %v699_v63, %v698_v7  ;;  %v5493_v34 = vadd.f32 %v5373_v6, %v5343_v52 }
 0x174   : > { %1130 = vrot.lane.b32.xlu0 %v817_v18, %s4945_s29  ;;  %v822_v30 = vpack.c.bf16 %v701_v20, %v700_v23 }
 0x175   : > { %v736_v41 = vmul.f32 %v5330_v47, %v5493_v34  ;;  %v738_v54 = vmul.f32 %v5328_v46, %v5493_v34  ;;  %v740_v63 = vmul.f32 %v5345_v53, %v5493_v34 }
 0x176   : > { %v4078_v25 = vpop.f32.mrb[8].mxu0 }
 0x177   : > { %v5410_v28 = vadd.f32 %v4078_v25, %v5343_v52  ;;  %1224 = vrot.lane.b32.xlu1 %v826_v22, %s4945_s29  ;;  %v553_v29 = vpop.f32.mrb[9].mxu0  ;;  %v5474_v22 = vpop.permute.xlu0 %668  ;;  %v5481_v25 = vadd.f32 %v5384_v12, %v5343_v52 }
 0x178   : > { %v5418_v32 = vadd.f32 %v5343_v52, %v553_v29  ;;  %v4079_v33 = vpop.f32.mrb[10].mxu0  ;;  %1132 = vrot.lane.b32.xlu0 %v818_v26, %s4945_s29  ;;  %v830_v26 = vpack.c.bf16 %v717_v15, %v716_v21  ;;  %v5487_v29 = vadd.f32 %v5343_v52, %v5389_v14  ;;  %v718_v12 = vmul.f32 %v5474_v22, %v5348_v55 }
 0x179   : > { %v5424_v35 = vadd.f32 %v4079_v33, %v5343_v52  ;;  %v556_v36 = vpop.f32.mrb[11].mxu0  ;;  %v703_v33 = vmul.f32 %v5464_v16, %v5359_v62  ;;  %v702_v14 = vmul.f32 %v5474_v22, %v5351_v57  ;;  %v737_v38 = vmul.f32 %v5334_v49, %v5481_v25 }
 0x17a   : > { %v5429_v39 = vadd.f32 %v5343_v52, %v556_v36  ;;  %v5500_v36 = vadd.f32 %v5343_v52, %v5378_v9  ;;  %v739_v42 = vmul.f32 %v5332_v48, %v5481_v25  ;;  %v725_v7 = vmul.f32 %v5338_v51, %v5487_v29 }
 0x17b   : > { %1226 = vrot.lane.b32.xlu1 %v827_v37, %s4945_s29  ;;  %v831_v37 = vpack.c.bf16 %v719_v27, %v718_v12  ;;  %v823_v6 = vpack.c.bf16 %v703_v33, %v702_v14  ;;  %v840_v9 = vpack.c.bf16 %v737_v38, %v736_v41  ;;  %v743_v15 = vmul.f32 %v5356_v61, %v5481_v25 }
 0x17c   : > { %1134 = vrot.lane.b32.xlu0 %v819_v40, %s4945_s29  ;;  %v721_v40 = vmul.f32 %v5334_v49, %v5487_v29  ;;  %v726_v20 = vmul.f32 %v5365_v1, %v5500_v36  ;;  %v727_v21 = vmul.f32 %v5356_v61, %v5487_v29  ;;  %v745_v27 = vmul.f32 %v5382_v11, %v5481_v25 }
 0x17d   : > { %v728_v33 = vmul.f32 %v5393_v17, %v5500_v36  ;;  %v729_v12 = vmul.f32 %v5382_v11, %v5487_v29  ;;  %v747_v38 = vmul.f32 %v5405_v24, %v5481_v25  ;;  %v731_v41 = vmul.f32 %v5405_v24, %v5487_v29 }
 0x17e   : > { %v4082_v58 = vpop.f32.mrb[12].mxu0 }
 0x17f   : > { %v5448_v0 = vadd.f32 %v4082_v58, %v5343_v52  ;;  %1228 = vrot.lane.b32.xlu1 %v828_v45, %s4945_s29  ;;  %v569_v2 = vpop.f32.mrb[13].mxu0  ;;  %v723_v45 = vmul.f32 %v5332_v48, %v5487_v29  ;;  %v722_v58 = vmul.f32 %v5328_v46, %v5500_v36 }
 0x180   : > { %v5454_v4 = vadd.f32 %v5343_v52, %v569_v2  ;;  %v4083_v5 = vpop.f32.mrb[14].mxu0  ;;  %1136 = vrot.lane.b32.xlu0 %v820_v60, %s4945_s29  ;;  %v841_v60 = vpack.c.bf16 %v739_v42, %v738_v54  ;;  %v741_v2 = vmul.f32 %v5338_v51, %v5481_v25  ;;  %v749_v42 = vmul.f32 %v5436_v43, %v5481_v25 }
 0x181   : > { %v5460_v8 = vadd.f32 %v4083_v5, %v5343_v52  ;;  %v572_v10 = vpop.f32.mrb[15].mxu0  ;;  %v833_v3 = vpack.c.bf16 %v723_v45, %v722_v58  ;;  %v724_v5 = vmul.f32 %v5345_v53, %v5500_v36  ;;  %v732_v45 = vmul.f32 %v5443_v56, %v5500_v36 }
 0x182   : > { %v5467_v18 = vadd.f32 %v5343_v52, %v572_v10  ;;  %v720_v52 = vmul.f32 %v5330_v47, %v5500_v36  ;;  %v842_v10 = vpack.c.bf16 %v741_v2, %v740_v63  ;;  %v733_v54 = vmul.f32 %v5436_v43, %v5487_v29 }
 0x183   : > { %1230 = vrot.lane.b32.xlu1 %v829_v13, %s4945_s29  ;;  %v742_v13 = vmul.f32 %v5365_v1, %v5493_v34  ;;  %v751_v63 = vmul.f32 %v5464_v16, %v5481_v25 }
 0x184   : > { %1138 = vrot.lane.b32.xlu0 %v821_v19, %s4945_s29  ;;  %v832_v44 = vpack.c.bf16 %v721_v40, %v720_v52  ;;  %v834_v19 = vpack.c.bf16 %v725_v7, %v724_v5  ;;  %v730_v40 = vmul.f32 %v5415_v31, %v5500_v36  ;;  %v838_v2 = vpack.c.bf16 %v733_v54, %v732_v45 }
 0x185   : > { %v843_v23 = vpack.c.bf16 %v743_v15, %v742_v13  ;;  %v735_v5 = vmul.f32 %v5464_v16, %v5487_v29  ;;  %v753_v15 = vmul.f32 %v5334_v49, %v5429_v39  ;;  %v759_v45 = vmul.f32 %v5356_v61, %v5429_v39 }
 0x187   : > { %1232 = vrot.lane.b32.xlu1 %v830_v26, %s4945_s29  ;;  %v744_v26 = vmul.f32 %v5393_v17, %v5493_v34 }
 0x188   : > { %1140 = vrot.lane.b32.xlu0 %v822_v30, %s4945_s29  ;;  %v835_v30 = vpack.c.bf16 %v727_v21, %v726_v20  ;;  %v752_v20 = vmul.f32 %v5330_v47, %v5418_v32 }
 0x189   : > { %v844_v14 = vpack.c.bf16 %v745_v27, %v744_v26  ;;  %v755_v27 = vmul.f32 %v5332_v48, %v5429_v39 }
 0x18a   : > { %v848_v26 = vpack.c.bf16 %v753_v15, %v752_v20  ;;  %v762_v15 = vmul.f32 %v5415_v31, %v5418_v32 }
 0x18b   : > { %1234 = vrot.lane.b32.xlu1 %v831_v37, %s4945_s29  ;;  %v746_v37 = vmul.f32 %v5415_v31, %v5493_v34 }
 0x18c   : > { %1142 = vrot.lane.b32.xlu0 %v823_v6, %s4945_s29  ;;  %v836_v6 = vpack.c.bf16 %v729_v12, %v728_v33  ;;  %v754_v33 = vmul.f32 %v5328_v46, %v5418_v32 }
 0x18d   : > { %v845_v52 = vpack.c.bf16 %v747_v38, %v746_v37  ;;  %v773_v37 = vmul.f32 %v5338_v51, %v5424_v35 }
 0x18e   : > { %v849_v38 = vpack.c.bf16 %v755_v27, %v754_v33  ;;  %v764_v27 = vmul.f32 %v5443_v56, %v5418_v32 }
 0x18f   : > { %1404 = vrot.lane.b32.xlu1 %v840_v9, %s4945_s29  ;;  %v748_v9 = vmul.f32 %v5443_v56, %v5493_v34 }
 0x190   : > { %1312 = vrot.lane.b32.xlu0 %v832_v44, %s4945_s29  ;;  %v837_v44 = vpack.c.bf16 %v731_v41, %v730_v40  ;;  %v757_v40 = vmul.f32 %v5338_v51, %v5429_v39 }
 0x191   : > { %v846_v58 = vpack.c.bf16 %v749_v42, %v748_v9  ;;  %v775_v9 = vmul.f32 %v5356_v61, %v5424_v35 }
 0x193   : > { %1406 = vrot.lane.b32.xlu1 %v841_v60, %s4945_s29  ;;  %v750_v60 = vmul.f32 %v5474_v22, %v5493_v34 }
 0x194   : > { %1314 = vrot.lane.b32.xlu0 %v833_v3, %s4945_s29  ;;  %v734_v3 = vmul.f32 %v5474_v22, %v5500_v36 }
 0x195   : > { %v847_v7 = vpack.c.bf16 %v751_v63, %v750_v60  ;;  %v777_v60 = vmul.f32 %v5382_v11, %v5424_v35 }
 0x196   : > { %v839_v13 = vpack.c.bf16 %v735_v5, %v734_v3  ;;  %v761_v3 = vmul.f32 %v5382_v11, %v5429_v39 }
 0x197   : > { %1408 = vrot.lane.b32.xlu1 %v842_v10, %s4945_s29  ;;  %v769_v10 = vmul.f32 %v5334_v49, %v5424_v35 }
 0x198   : > { %1316 = vrot.lane.b32.xlu0 %v834_v19, %s4945_s29  ;;  %v768_v19 = vmul.f32 %v5330_v47, %v5410_v28 }
 0x19a   : > { %v856_v21 = vpack.c.bf16 %v769_v10, %v768_v19  ;;  %v779_v10 = vmul.f32 %v5405_v24, %v5424_v35  ;;  %v763_v19 = vmul.f32 %v5405_v24, %v5429_v39 }
 0x19b   : > { %1410 = vrot.lane.b32.xlu1 %v843_v23, %s4945_s29  ;;  %v771_v23 = vmul.f32 %v5332_v48, %v5424_v35 }
 0x19c   : > { %1318 = vrot.lane.b32.xlu0 %v835_v30, %s4945_s29  ;;  %v770_v30 = vmul.f32 %v5328_v46, %v5410_v28 }
 0x19e   : > { %v857_v12 = vpack.c.bf16 %v771_v23, %v770_v30  ;;  %v781_v23 = vmul.f32 %v5436_v43, %v5424_v35  ;;  %v765_v30 = vmul.f32 %v5436_v43, %v5429_v39 }
 0x19f   : > { %1412 = vrot.lane.b32.xlu1 %v844_v14, %s4945_s29  ;;  %v772_v14 = vmul.f32 %v5345_v53, %v5410_v28 }
 0x1a0   : > { %1320 = vrot.lane.b32.xlu0 %v836_v6, %s4945_s29  ;;  %v756_v6 = vmul.f32 %v5345_v53, %v5418_v32 }
 0x1a1   : > { %v858_v41 = vpack.c.bf16 %v773_v37, %v772_v14  ;;  %v783_v14 = vmul.f32 %v5464_v16, %v5424_v35  ;;  %v854_v37 = vpack.c.bf16 %v765_v30, %v764_v27  ;;  %v810_v27 = vmul.f32 %v5415_v31, %v5448_v0 }
 0x1a2   : > { %v850_v42 = vpack.c.bf16 %v757_v40, %v756_v6  ;;  %v767_v6 = vmul.f32 %v5464_v16, %v5429_v39  ;;  %v811_v30 = vmul.f32 %v5405_v24, %v5460_v8 }
 0x1a3   : > { %1414 = vrot.lane.b32.xlu1 %v845_v52, %s4945_s29  ;;  %v774_v52 = vmul.f32 %v5365_v1, %v5410_v28 }
 0x1a4   : > { %1322 = vrot.lane.b32.xlu0 %v837_v44, %s4945_s29  ;;  %v758_v44 = vmul.f32 %v5365_v1, %v5418_v32 }
 0x1a5   : > { %v859_v54 = vpack.c.bf16 %v775_v9, %v774_v52  ;;  %v785_v9 = vmul.f32 %v5334_v49, %v5467_v18 }
 0x1a6   : > { %v851_v63 = vpack.c.bf16 %v759_v45, %v758_v44  ;;  %v784_v44 = vmul.f32 %v5330_v47, %v5454_v4 }
 0x1a7   : > { %1416 = vrot.lane.b32.xlu1 %v846_v58, %s4945_s29  ;;  %v776_v58 = vmul.f32 %v5393_v17, %v5410_v28 }
 0x1a8   : > { %1324 = vrot.lane.b32.xlu0 %v838_v2, %s4945_s29  ;;  %v760_v2 = vmul.f32 %v5393_v17, %v5418_v32 }
 0x1a9   : > { %v860_v5 = vpack.c.bf16 %v777_v60, %v776_v58  ;;  %v864_v58 = vpack.c.bf16 %v785_v9, %v784_v44  ;;  %v787_v60 = vmul.f32 %v5332_v48, %v5467_v18  ;;  %v798_v44 = vmul.f32 %v5474_v22, %v5454_v4 }
 0x1ab   : > { %1418 = vrot.lane.b32.xlu1 %v847_v7, %s4945_s29  ;;  %v778_v7 = vmul.f32 %v5415_v31, %v5410_v28 }
 0x1ac   : > { %1326 = vrot.lane.b32.xlu0 %v839_v13, %s4945_s29  ;;  %v852_v13 = vpack.c.bf16 %v761_v3, %v760_v2 }
 0x1ad   : > { %v861_v20 = vpack.c.bf16 %v779_v10, %v778_v7  ;;  %v788_v7 = vmul.f32 %v5345_v53, %v5454_v4 }
 0x1af   : > { %1588 = vrot.lane.b32.xlu1 %v856_v21, %s4945_s29  ;;  %v780_v21 = vmul.f32 %v5443_v56, %v5410_v28 }
 0x1b0   : > { %1496 = vrot.lane.b32.xlu0 %v848_v26, %s4945_s29  ;;  %v853_v26 = vpack.c.bf16 %v763_v19, %v762_v15  ;;  %v791_v19 = vmul.f32 %v5356_v61, %v5467_v18 }
 0x1b1   : > { %v862_v33 = vpack.c.bf16 %v781_v23, %v780_v21  ;;  %v809_v21 = vmul.f32 %v5382_v11, %v5460_v8 }
 0x1b3   : > { %1590 = vrot.lane.b32.xlu1 %v857_v12, %s4945_s29  ;;  %v782_v12 = vmul.f32 %v5474_v22, %v5410_v28 }
 0x1b4   : > { %1498 = vrot.lane.b32.xlu0 %v849_v38, %s4945_s29  ;;  %v766_v38 = vmul.f32 %v5474_v22, %v5418_v32 }
 0x1b5   : > { %v863_v40 = vpack.c.bf16 %v783_v14, %v782_v12  ;;  %v794_v12 = vmul.f32 %v5415_v31, %v5454_v4  ;;  %v877_v14 = vpack.c.bf16 %v811_v30, %v810_v27  ;;  %v796_v31 = vmul.f32 %v5443_v56, %v5454_v4 }
 0x1b6   : > { %v855_v52 = vpack.c.bf16 %v767_v6, %v766_v38  ;;  %v813_v38 = vmul.f32 %v5436_v43, %v5460_v8 }
 0x1b7   : > { %1592 = vrot.lane.b32.xlu1 %v858_v41, %s4945_s29  ;;  %v801_v41 = vmul.f32 %v5334_v49, %v5460_v8  ;;  %v802_v49 = vmul.f32 %v5328_v46, %v5448_v0 }
 0x1b8   : > { %1500 = vrot.lane.b32.xlu0 %v850_v42, %s4945_s29  ;;  %v800_v42 = vmul.f32 %v5330_v47, %v5448_v0  ;;  %v805_v47 = vmul.f32 %v5338_v51, %v5460_v8 }
 0x1ba   : > { %v872_v45 = vpack.c.bf16 %v801_v41, %v800_v42  ;;  %v814_v42 = vmul.f32 %v5474_v22, %v5448_v0 }
 0x1bb   : > { %1594 = vrot.lane.b32.xlu1 %v859_v54, %s4945_s29  ;;  %v803_v54 = vmul.f32 %v5332_v48, %v5460_v8  ;;  %v804_v48 = vmul.f32 %v5345_v53, %v5448_v0  ;;  %v808_v53 = vmul.f32 %v5393_v17, %v5448_v0 }
 0x1bc   : > { %1502 = vrot.lane.b32.xlu0 %v851_v63, %s4945_s29  ;;  %v786_v63 = vmul.f32 %v5328_v46, %v5454_v4  ;;  %v806_v46 = vmul.f32 %v5365_v1, %v5448_v0 }
 0x1bd   : > { %v873_v2 = vpack.c.bf16 %v803_v54, %v802_v49  ;;  %v874_v10 = vpack.c.bf16 %v805_v47, %v804_v48 }
 0x1be   : > { %v865_v3 = vpack.c.bf16 %v787_v60, %v786_v63 }
 0x1bf   : > { %1596 = vrot.lane.b32.xlu1 %v860_v5, %s4945_s29  ;;  %v789_v5 = vmul.f32 %v5338_v51, %v5467_v18  ;;  %v790_v51 = vmul.f32 %v5365_v1, %v5454_v4  ;;  %v793_v1 = vmul.f32 %v5382_v11, %v5467_v18 }
 0x1c0   : > { %1504 = vrot.lane.b32.xlu0 %v852_v13, %s4945_s29  ;;  %v807_v13 = vmul.f32 %v5356_v61, %v5460_v8  ;;  %v876_v61 = vpack.c.bf16 %v809_v21, %v808_v53 }
 0x1c1   : > { %v866_v15 = vpack.c.bf16 %v789_v5, %v788_v7  ;;  %v867_v23 = vpack.c.bf16 %v791_v19, %v790_v51 }
 0x1c3   : > { %1598 = vrot.lane.b32.xlu1 %v861_v20, %s4945_s29  ;;  %v875_v20 = vpack.c.bf16 %v807_v13, %v806_v46 }
 0x1c4   : > { %1506 = vrot.lane.b32.xlu0 %v853_v26, %s4945_s29  ;;  %v792_v26 = vmul.f32 %v5393_v17, %v5454_v4  ;;  %v795_v17 = vmul.f32 %v5405_v24, %v5467_v18  ;;  %v797_v24 = vmul.f32 %v5436_v43, %v5467_v18 }
 0x1c6   : > { %v869_v41 = vpack.c.bf16 %v795_v17, %v794_v12  ;;  %v870_v43 = vpack.c.bf16 %v797_v24, %v796_v31  ;;  %v587_v17 = vmul.f32 0.5, %v5354_v59 }
 0x1c7   : > { %1600 = vrot.lane.b32.xlu1 %v862_v33, %s4945_s29  ;;  %v868_v33 = vpack.c.bf16 %v793_v1, %v792_v26 }
 0x1c8   : > { %1508 = vrot.lane.b32.xlu0 %v854_v37, %s4945_s29  ;;  %v812_v37 = vmul.f32 %v5443_v56, %v5448_v0  ;;  %v815_v56 = vmul.f32 %v5464_v16, %v5460_v8 }
 0x1ca   : > { %v878_v9 = vpack.c.bf16 %v813_v38, %v812_v37  ;;  %v879_v60 = vpack.c.bf16 %v815_v56, %v814_v42  ;;  %v584_v38 = vmul.f32 0.5, %v5351_v57 }
 0x1cb   : > { %1602 = vrot.lane.b32.xlu1 %v863_v40, %s4945_s29 }
 0x1cc   : > { %1510 = vrot.lane.b32.xlu0 %v855_v52, %s4945_s29 }
 0x1cf   : > { %1772 = vrot.lane.b32.xlu1 %v872_v45, %s4945_s29  ;;  %v799_v45 = vmul.f32 %v5464_v16, %v5467_v18 }
 0x1d0   : > { %1680 = vrot.lane.b32.xlu0 %v864_v58, %s4945_s29 }
 0x1d1   : > { %v871_v63 = vpack.c.bf16 %v799_v45, %v798_v44 }
 0x1d3   : > { %1774 = vrot.lane.b32.xlu1 %v873_v2, %s4945_s29 }
 0x1d4   : > { %1682 = vrot.lane.b32.xlu0 %v865_v3, %s4945_s29 }
 0x1d7   : > { %1776 = vrot.lane.b32.xlu1 %v874_v10, %s4945_s29 }
 0x1d8   : > { %1684 = vrot.lane.b32.xlu0 %v866_v15, %s4945_s29 }
 0x1db   : > { %1778 = vrot.lane.b32.xlu1 %v875_v20, %s4945_s29 }
 0x1dc   : > { %1686 = vrot.lane.b32.xlu0 %v867_v23, %s4945_s29 }
 0x1df   : > { %1780 = vrot.lane.b32.xlu1 %v876_v61, %s4945_s29 }
 0x1e0   : > { %1688 = vrot.lane.b32.xlu0 %v868_v33, %s4945_s29 }
 0x1e1   : > { %v1221_v11 = vpop.permute.xlu1 %1220 }
 0x1e2   : > { %v1240_v6 = vsel %vm462_vm0, %v1221_v11, 0  ;;  %v1129_v40 = vpop.permute.xlu0 %1128  ;;  %v585_v11 = vmul.f32 0.5, %v5359_v62 }
 0x1e3   : > { %4105 = vmatpush3.bf16.xpose.msra.mxu0 %v1240_v6  ;;  %1782 = vrot.lane.b32.xlu1 %v877_v14, %s4945_s29  ;;  %v1148_v52 = vsel %vm462_vm0, %v1129_v40, 0  ;;  %v586_v14 = vmul.f32 0.5, %v5348_v55 }
 0x1e4   : > { %1690 = vrot.lane.b32.xlu0 %v869_v41, %s4945_s29  ;;  %4085 = vmatpush3.bf16.xpose.msra.mxu1 %v1148_v52  ;;  %v600_v41 = vpack.c.bf16 %v585_v11, %v584_v38 }
 0x1e5   : > { %4106 = vmatprep.subr.bf16.mxu0 %v4944_v50  ;;  %4086 = vmatprep.subr.bf16.mxu1 %v4944_v50  ;;  %v1223_v54 = vpop.permute.xlu1 %1222  ;;  %v601_v40 = vpack.c.bf16 %v587_v17, %v586_v14 }
 0x1e6   : > { %v1131_v58 = vpop.permute.xlu0 %1130  ;;  %v1243_v49 = vsel %vm462_vm0, %v1223_v54, 0 }
 0x1e7   : > { %1784 = vrot.lane.b32.xlu1 %v878_v9, %s4945_s29  ;;  %v1151_v2 = vsel %vm462_vm0, %v1131_v58, 0 }
 0x1e8   : > { %1692 = vrot.lane.b32.xlu0 %v870_v43, %s4945_s29 }
 0x1e9   : > { %v1225_v16 = vpop.permute.xlu1 %1224 }
 0x1ea   : > { %v1133_v22 = vpop.permute.xlu0 %1132  ;;  %v1246_v47 = vsel %vm462_vm0, %v1225_v16, 0 }
 0x1eb   : > { %4107 = vmatpush3.bf16.xpose.msra.mxu0 %v1243_v49  ;;  %1786 = vrot.lane.b32.xlu1 %v879_v60, %s4945_s29  ;;  %v1154_v3 = vsel %vm462_vm0, %v1133_v22, 0 }
 0x1ec   : > { %1694 = vrot.lane.b32.xlu0 %v871_v63, %s4945_s29  ;;  %4087 = vmatpush3.bf16.xpose.msra.mxu1 %v1151_v2  ;;  %s4865_s29 = sshll.u32 %s4948_s13, 4  ;;  %s4866_s29 = int_to_ptr.vmem [resolvable:$false] %s4865_s29 }
 0x1ed   : > { %4108 = vmatprep.subr.bf16.mxu0 %v4944_v50  ;;  %4088 = vmatprep.subr.bf16.mxu1 %v4944_v50  ;;  %v1227_v5 = vpop.permute.xlu1 %1226  ;;  %s4867_s28 = scalar_lea.vmem %s4866_s29, 4096  ;;  %p4868_p12 = scmp.lt.s32.totalorder %s7274_s19, %s4866_s29 }
 0x1ee   : > { %v1135_v48 = vpop.permute.xlu0 %1134  ;;  %v1249_v7 = vsel %vm462_vm0, %v1227_v5, 0 }
 0x1ef   : > { %v1157_v10 = vsel %vm462_vm0, %v1135_v48, 0 }
 0x1f1   : > { %v1229_v46 = vpop.permute.xlu1 %1228 }
 0x1f2   : > { %v1137_v13 = vpop.permute.xlu0 %1136  ;;  %v1252_v15 = vsel %vm462_vm0, %v1229_v46, 0 }
 0x1f3   : > { %4109 = vmatpush3.bf16.xpose.msra.mxu0 %v1246_v47  ;;  %v1160_v51 = vsel %vm462_vm0, %v1137_v13, 0 }
 0x1f4   : > { %4089 = vmatpush3.bf16.xpose.msra.mxu1 %v1154_v3  ;;  %4110 = vmatprep.subr.bf16.mxu0 %v4944_v50 }
 0x1f5   : > { %4090 = vmatprep.subr.bf16.mxu1 %v4944_v50  ;;  %v1231_v19 = vpop.permute.xlu1 %1230 }
 0x1f6   : > { %v1139_v20 = vpop.permute.xlu0 %1138  ;;  %v1255_v53 = vsel %vm462_vm0, %v1231_v19, 0 }
 0x1f7   : > { %v1163_v21 = vsel %vm462_vm0, %v1139_v20, 0 }
 0x1f9   : > { %v1233_v23 = vpop.permute.xlu1 %1232 }
 0x1fa   : > { %v1141_v26 = vpop.permute.xlu0 %1140  ;;  %v1258_v1 = vsel %vm462_vm0, %v1233_v23, 0  ;;  %v591_v23 = vmul.f32 0.5, %v5481_v25 }
 0x1fb   : > { %4111 = vmatpush3.bf16.xpose.msra.mxu0 %v1249_v7  ;;  %v1166_v61 = vsel %vm462_vm0, %v1141_v26, 0  ;;  %v588_v26 = vmul.f32 0.5, %v5500_v36 }
 0x1fc   : > { %4091 = vmatpush3.bf16.xpose.msra.mxu1 %v1157_v10  ;;  %4112 = vmatprep.subr.bf16.mxu0 %v4944_v50 }
 0x1fd   : > { %4092 = vmatprep.subr.bf16.mxu1 %v4944_v50  ;;  %v1235_v27 = vpop.permute.xlu1 %1234 }
 0x1fe   : > { %v1143_v30 = vpop.permute.xlu0 %1142  ;;  %v1261_v33 = vsel %vm462_vm0, %v1235_v27, 0 }
 0x1ff   : > { %v1169_v12 = vsel %vm462_vm0, %v1143_v30, 0 }
 0x201   : > { %v1405_v37 = vpop.permute.xlu1 %1404 }
 0x202   : > { %v1313_v6 = vpop.permute.xlu0 %1312  ;;  %v1424_v31 = vsel %vm462_vm0, %v1405_v37, 0 }
 0x203   : > { %4113 = vmatpush3.bf16.xpose.msra.mxu0 %v1252_v15  ;;  %v1332_v24 = vsel %vm462_vm0, %v1313_v6, 0 }
 0x204   : > { %4093 = vmatpush3.bf16.xpose.msra.mxu1 %v1160_v51  ;;  %4114 = vmatprep.subr.bf16.mxu0 %v4944_v50 }
 0x205   : > { %4094 = vmatprep.subr.bf16.mxu1 %v4944_v50  ;;  %v1407_v52 = vpop.permute.xlu1 %1406 }
 0x206   : > { %v1315_v9 = vpop.permute.xlu0 %1314  ;;  %v1427_v42 = vsel %vm462_vm0, %v1407_v52, 0 }
 0x207   : > { %v1335_v56 = vsel %vm462_vm0, %v1315_v9, 0 }
 0x209   : > { %v1409_v43 = vpop.permute.xlu1 %1408 }
 0x20a   : > { %v1317_v44 = vpop.permute.xlu0 %1316  ;;  %v1430_v45 = vsel %vm462_vm0, %v1409_v43, 0 }
 0x20b   : > { %4115 = vmatpush3.bf16.xpose.msra.mxu0 %v1255_v53  ;;  %v1338_v54 = vsel %vm462_vm0, %v1317_v44, 0 }
 0x20c   : > { %4095 = vmatpush3.bf16.xpose.msra.mxu1 %v1163_v21  ;;  %4116 = vmatprep.subr.bf16.mxu0 %v4944_v50  ;;  %v590_v21 = vmul.f32 0.5, %v5493_v34 }
 0x20d   : > { %4096 = vmatprep.subr.bf16.mxu1 %v4944_v50  ;;  %v1411_v58 = vpop.permute.xlu1 %1410 }
 0x20e   : > { %v1319_v60 = vpop.permute.xlu0 %1318  ;;  %v1433_v49 = vsel %vm462_vm0, %v1411_v58, 0  ;;  %v603_v30 = vpack.c.bf16 %v591_v23, %v590_v21 }
 0x20f   : > { %v1341_v63 = vsel %vm462_vm0, %v1319_v60, 0 }
 0x211   : > { %v1413_v2 = vpop.permute.xlu1 %1412 }
 0x212   : > { %v1321_v16 = vpop.permute.xlu0 %1320  ;;  %v1436_v22 = vsel %vm462_vm0, %v1413_v2, 0 }
 0x213   : > { %4117 = vmatpush3.bf16.xpose.msra.mxu0 %v1258_v1  ;;  %v1344_v47 = vsel %vm462_vm0, %v1321_v16, 0  ;;  %v589_v1 = vmul.f32 0.5, %v5487_v29 }
 0x214   : > { %4097 = vmatpush3.bf16.xpose.msra.mxu1 %v1166_v61  ;;  %4118 = vmatprep.subr.bf16.mxu0 %v4944_v50 }
 0x215   : > { %4098 = vmatprep.subr.bf16.mxu1 %v4944_v50  ;;  %v1415_v3 = vpop.permute.xlu1 %1414 }
 0x216   : > { %v1323_v5 = vpop.permute.xlu0 %1322  ;;  %v1439_v48 = vsel %vm462_vm0, %v1415_v3, 0 }
 0x217   : > { %v1347_v7 = vsel %vm462_vm0, %v1323_v5, 0 }
 0x219   : > { %v1417_v10 = vpop.permute.xlu1 %1416 }
 0x21a   : > { %v1325_v46 = vpop.permute.xlu0 %1324  ;;  %v1442_v13 = vsel %vm462_vm0, %v1417_v10, 0  ;;  %v595_v10 = vmul.f32 0.5, %v5424_v35 }
 0x21b   : > { %4119 = vmatpush3.bf16.xpose.msra.mxu0 %v1261_v33  ;;  %v1350_v15 = vsel %vm462_vm0, %v1325_v46, 0  ;;  %v602_v33 = vpack.c.bf16 %v589_v1, %v588_v26  ;;  %v592_v46 = vmul.f32 0.5, %v5418_v32 }
 0x21c   : > { %4099 = vmatpush3.bf16.xpose.msra.mxu1 %v1169_v12  ;;  %4144 = vmatprep.subr.bf16.mxu0 %v4944_v50 }
 0x21d   : > { %4124 = vmatprep.subr.bf16.mxu1 %v4944_v50  ;;  %v1419_v51 = vpop.permute.xlu1 %1418 }
 0x21e   : > { %v1327_v19 = vpop.permute.xlu0 %1326  ;;  %v1445_v20 = vsel %vm462_vm0, %v1419_v51, 0 }
 0x21f   : > { %v1353_v53 = vsel %vm462_vm0, %v1327_v19, 0 }
 0x221   : > { %v1589_v61 = vpop.permute.xlu1 %1588 }
 0x222   : > { %4121 = vmatmul.mubr.msk.bf16.vlgmr.msra.gmra.mrb[16].mxu0 %vm462_vm0, %v601_v40  ;;  %v1497_v27 = vpop.permute.xlu0 %1496  ;;  %v1608_v12 = vsel %vm462_vm0, %v1589_v61, 0 }
 0x223   : > { %4101 = vmatmul.mubr.msk.bf16.vlgmr.msra.gmra.mrb[0].mxu1 %vm462_vm0, %v600_v41  ;;  %4145 = vmatpush3.bf16.xpose.msra.mxu0 %v1424_v31  ;;  %v1516_v17 = vsel %vm462_vm0, %v1497_v27, 0 }
 0x224   : > { %4125 = vmatpush3.bf16.xpose.msra.mxu1 %v1332_v24  ;;  %4146 = vmatprep.subr.bf16.mxu0 %v4944_v50 }
 0x225   : > { %4126 = vmatprep.subr.bf16.mxu1 %v4944_v50  ;;  %4160 = vmatprep.mubr.msk.bf16.mxu0 %vm4946_vm1, %v4944_v50  ;;  %v1591_v11 = vpop.permute.xlu1 %1590 }
 0x226   : > { %4140 = vmatprep.mubr.msk.bf16.mxu1 %vm4946_vm1, %v4944_v50  ;;  %v1499_v14 = vpop.permute.xlu0 %1498  ;;  %v1611_v37 = vsel %vm462_vm0, %v1591_v11, 0 }
 0x227   : > { %v1519_v38 = vsel %vm462_vm0, %v1499_v14, 0 }
 0x229   : > { %v1593_v6 = vpop.permute.xlu1 %1592 }
 0x22a   : > { %v1501_v40 = vpop.permute.xlu0 %1500  ;;  %v1614_v41 = vsel %vm462_vm0, %v1593_v6, 0 }
 0x22b   : > { %4147 = vmatpush3.bf16.xpose.msra.mxu0 %v1427_v42  ;;  %v1522_v31 = vsel %vm462_vm0, %v1501_v40, 0 }
 0x22c   : > { %4127 = vmatpush3.bf16.xpose.msra.mxu1 %v1335_v56  ;;  %4148 = vmatprep.subr.bf16.mxu0 %v4944_v50 }
 0x22d   : > { %4128 = vmatprep.subr.bf16.mxu1 %v4944_v50  ;;  %v1595_v24 = vpop.permute.xlu1 %1594 }
 0x22e   : > { %v1503_v52 = vpop.permute.xlu0 %1502  ;;  %v1617_v9 = vsel %vm462_vm0, %v1595_v24, 0 }
 0x22f   : > { %v1525_v42 = vsel %vm462_vm0, %v1503_v52, 0 }
 0x231   : > { %v1597_v56 = vpop.permute.xlu1 %1596 }
 0x232   : > { %v1505_v43 = vpop.permute.xlu0 %1504  ;;  %v1620_v44 = vsel %vm462_vm0, %v1597_v56, 0 }
 0x233   : > { %4149 = vmatpush3.bf16.xpose.msra.mxu0 %v1430_v45  ;;  %v1528_v45 = vsel %vm462_vm0, %v1505_v43, 0 }
 0x234   : > { %4129 = vmatpush3.bf16.xpose.msra.mxu1 %v1338_v54  ;;  %4150 = vmatprep.subr.bf16.mxu0 %v4944_v50 }
 0x235   : > { %4130 = vmatprep.subr.bf16.mxu1 %v4944_v50  ;;  %v1599_v54 = vpop.permute.xlu1 %1598 }
 0x236   : > { %v1507_v58 = vpop.permute.xlu0 %1506  ;;  %v1623_v60 = vsel %vm462_vm0, %v1599_v54, 0 }
 0x23a   : > { %v1509_v2 = vpop.permute.xlu0 %1508 }
 0x23b   : > { %4151 = vmatpush3.bf16.xpose.msra.mxu0 %v1433_v49  ;;  %v1531_v49 = vsel %vm462_vm0, %v1507_v58, 0 }
 0x23c   : > { %4131 = vmatpush3.bf16.xpose.msra.mxu1 %v1341_v63  ;;  %4152 = vmatprep.subr.bf16.mxu0 %v4944_v50  ;;  %v1601_v63 = vpop.permute.xlu1 %1600 }
 0x23d   : > { %4132 = vmatprep.subr.bf16.mxu1 %v4944_v50  ;;  %v1626_v16 = vsel %vm462_vm0, %v1601_v63, 0  ;;  %v599_v63 = vmul.f32 0.5, %v5460_v8 }
 0x23e   : > { %v1511_v3 = vpop.permute.xlu0 %1510 }
 0x242   : > { %v1681_v51 = vpop.permute.xlu0 %1680 }
 0x243   : > { %4153 = vmatpush3.bf16.xpose.msra.mxu0 %v1436_v22  ;;  %v1534_v22 = vsel %vm462_vm0, %v1509_v2, 0  ;;  %v1700_v21 = vsel %vm462_vm0, %v1681_v51, 0  ;;  %v596_v2 = vmul.f32 0.5, %v5454_v4  ;;  %v1944_v51 = vld [vmem:[%s7332_s9] sm:$0xff] }
 0x244   : > { %4133 = vmatpush3.bf16.xpose.msra.mxu1 %v1344_v47  ;;  %4154 = vmatprep.subr.bf16.mxu0 %v4944_v50  ;;  %v1603_v47 = vpop.permute.xlu1 %1602 }
 0x245   : > { %4134 = vmatprep.subr.bf16.mxu1 %v4944_v50  ;;  %v1629_v5 = vsel %vm462_vm0, %v1603_v47, 0 }
 0x246   : > { %v1683_v26 = vpop.permute.xlu0 %1682 }
 0x247   : > { %v1703_v61 = vsel %vm462_vm0, %v1683_v26, 0  ;;  %v1948_v26 = vld [vmem:[%s7332_s9 + $0x20] sm:$0xff] }
 0x24b   : > { %4155 = vmatpush3.bf16.xpose.msra.mxu0 %v1439_v48  ;;  %v1537_v48 = vsel %vm462_vm0, %v1511_v3, 0 }
 0x24c   : > { %4135 = vmatpush3.bf16.xpose.msra.mxu1 %v1347_v7  ;;  %4156 = vmatprep.subr.bf16.mxu0 %v4944_v50  ;;  %v594_v7 = vmul.f32 0.5, %v5410_v28 }
 0x24d   : > { %4136 = vmatprep.subr.bf16.mxu1 %v4944_v50 }
 0x24e   : > { %v605_v19 = vpack.c.bf16 %v595_v10, %v594_v7 }
 0x253   : > { %4157 = vmatpush3.bf16.xpose.msra.mxu0 %v1442_v13  ;;  %v593_v13 = vmul.f32 0.5, %v5429_v39 }
 0x254   : > { %4137 = vmatpush3.bf16.xpose.msra.mxu1 %v1350_v15  ;;  %4158 = vmatprep.subr.bf16.mxu0 %v4944_v50  ;;  %v1773_v15 = vpop.permute.xlu1 %1772 }
 0x255   : > { %4138 = vmatprep.subr.bf16.mxu1 %v4944_v50 }
 0x258   : > { %v1775_v23 = vpop.permute.xlu1 %1774 }
 0x259   : > { %v1795_v1 = vsel %vm462_vm0, %v1775_v23, 0 }
 0x25b   : > { %4159 = vmatpush3.bf16.xpose.msra.mxu0 %v1445_v20  ;;  %v604_v20 = vpack.c.bf16 %v593_v13, %v592_v46 }
 0x25c   : > { %4139 = vmatpush3.bf16.xpose.msra.mxu1 %v1353_v53  ;;  %4184 = vmatprep.subr.bf16.mxu0 %v4944_v50  ;;  %v1792_v53 = vsel %vm462_vm0, %v1773_v15, 0  ;;  %v1777_v27 = vpop.permute.xlu1 %1776 }
 0x25d   : > { %4164 = vmatprep.subr.bf16.mxu1 %v4944_v50 }
 0x262   : > { %4161 = vmatmul.mubr.msk.bf16.vlgmr.msra.gmra.mrb[20].mxu0 %vm462_vm0, %v603_v30  ;;  %v1685_v30 = vpop.permute.xlu0 %1684 }
 0x263   : > { %4141 = vmatmul.mubr.msk.bf16.vlgmr.msra.gmra.mrb[4].mxu1 %vm462_vm0, %v602_v33  ;;  %4185 = vmatpush3.bf16.xpose.msra.mxu0 %v1608_v12  ;;  %v1798_v33 = vsel %vm462_vm0, %v1777_v27, 0  ;;  %v1706_v12 = vsel %vm462_vm0, %v1685_v30, 0  ;;  %v1950_v27 = vld [vmem:[%s7332_s9 + $0x30] sm:$0xff]  ;;  %v1951_v30 = vld [vmem:[%s7332_s9 + $0x38] sm:$0xff] }
 0x264   : > { %4165 = vmatpush3.bf16.xpose.msra.mxu1 %v1516_v17  ;;  %4186 = vmatprep.subr.bf16.mxu0 %v4944_v50  ;;  %v1779_v17 = vpop.permute.xlu1 %1778 }
 0x265   : > { %4166 = vmatprep.subr.bf16.mxu1 %v4944_v50  ;;  %4200 = vmatprep.mubr.msk.bf16.mxu0 %vm4946_vm1, %v4944_v50  ;;  %v1801_v14 = vsel %vm462_vm0, %v1779_v17, 0  ;;  %v1953_v17 = vld [vmem:[%s7332_s9 + $0x48] sm:$0xff] }
 0x266   : > { %4180 = vmatprep.mubr.msk.bf16.mxu1 %vm4946_vm1, %v4944_v50  ;;  %v1687_v11 = vpop.permute.xlu0 %1686 }
 0x26a   : > { %v1689_v6 = vpop.permute.xlu0 %1688 }
 0x26b   : > { %4187 = vmatpush3.bf16.xpose.msra.mxu0 %v1611_v37  ;;  %v1709_v37 = vsel %vm462_vm0, %v1687_v11, 0  ;;  %v1954_v11 = vld [vmem:[%s7332_s9 + $0x50] sm:$0xff] }
 0x26c   : > { %4167 = vmatpush3.bf16.xpose.msra.mxu1 %v1519_v38  ;;  %4188 = vmatprep.subr.bf16.mxu0 %v4944_v50  ;;  %v1781_v38 = vpop.permute.xlu1 %1780 }
 0x26d   : > { %4168 = vmatprep.subr.bf16.mxu1 %v4944_v50  ;;  %v1804_v40 = vsel %vm462_vm0, %v1781_v38, 0 }
 0x26e   : > { %v1691_v24 = vpop.permute.xlu0 %1690 }
 0x272   : > { %v1693_v56 = vpop.permute.xlu0 %1692 }
 0x273   : > { %4189 = vmatpush3.bf16.xpose.msra.mxu0 %v1614_v41  ;;  %v1712_v41 = vsel %vm462_vm0, %v1689_v6, 0  ;;  %v1956_v6 = vld [vmem:[%s7332_s9 + $0x60] sm:$0xff] }
 0x274   : > { %4169 = vmatpush3.bf16.xpose.msra.mxu1 %v1522_v31  ;;  %4190 = vmatprep.subr.bf16.mxu0 %v4944_v50  ;;  %v1783_v31 = vpop.permute.xlu1 %1782 }
 0x275   : > { %4170 = vmatprep.subr.bf16.mxu1 %v4944_v50  ;;  %v1807_v52 = vsel %vm462_vm0, %v1783_v31, 0  ;;  %v1958_v31 = vld [vmem:[%s7332_s9 + $0x70] sm:$0xff] }
 0x276   : > { %v1695_v54 = vpop.permute.xlu0 %1694 }
 0x27b   : > { %4191 = vmatpush3.bf16.xpose.msra.mxu0 %v1617_v9  ;;  %v1715_v9 = vsel %vm462_vm0, %v1691_v24, 0  ;;  %v1959_v24 = vld [vmem:[%s7332_s9 + $0x78] sm:$0xff] }
 0x27c   : > { %4171 = vmatpush3.bf16.xpose.msra.mxu1 %v1525_v42  ;;  %4192 = vmatprep.subr.bf16.mxu0 %v4944_v50  ;;  %v1785_v42 = vpop.permute.xlu1 %1784 }
 0x27d   : > { %4172 = vmatprep.subr.bf16.mxu1 %v4944_v50  ;;  %v1810_v43 = vsel %vm462_vm0, %v1785_v42, 0 }
 0x283   : > { %4193 = vmatpush3.bf16.xpose.msra.mxu0 %v1620_v44  ;;  %v1718_v44 = vsel %vm462_vm0, %v1693_v56, 0 }
 0x284   : > { %4173 = vmatpush3.bf16.xpose.msra.mxu1 %v1528_v45  ;;  %4194 = vmatprep.subr.bf16.mxu0 %v4944_v50  ;;  %v1787_v45 = vpop.permute.xlu1 %1786 }
 0x285   : > { %4174 = vmatprep.subr.bf16.mxu1 %v4944_v50  ;;  %v1813_v58 = vsel %vm462_vm0, %v1787_v45, 0 }
 0x28b   : > { %4195 = vmatpush3.bf16.xpose.msra.mxu0 %v1623_v60  ;;  %v1721_v60 = vsel %vm462_vm0, %v1695_v54, 0 }
 0x28c   : > { %4175 = vmatpush3.bf16.xpose.msra.mxu1 %v1531_v49  ;;  %4196 = vmatprep.subr.bf16.mxu0 %v4944_v50  ;;  %v598_v49 = vmul.f32 0.5, %v5448_v0 }
 0x28d   : > { %4176 = vmatprep.subr.bf16.mxu1 %v4944_v50 }
 0x293   : > { %4197 = vmatpush3.bf16.xpose.msra.mxu0 %v1626_v16  ;;  %v597_v16 = vmul.f32 0.5, %v5467_v18 }
 0x294   : > { %4177 = vmatpush3.bf16.xpose.msra.mxu1 %v1534_v22  ;;  %4198 = vmatprep.subr.bf16.mxu0 %v4944_v50  ;;  %v607_v22 = vpack.c.bf16 %v599_v63, %v598_v49 }
 0x295   : > { %4178 = vmatprep.subr.bf16.mxu1 %v4944_v50  ;;  %v606_v47 = vpack.c.bf16 %v597_v16, %v596_v2 }
 0x29b   : > { %4199 = vmatpush3.bf16.xpose.msra.mxu0 %v1629_v5 }
 0x29c   : > { %4179 = vmatpush3.bf16.xpose.msra.mxu1 %v1537_v48  ;;  %4224 = vmatprep.subr.bf16.mxu0 %v4944_v50 }
 0x29d   : > { %4204 = vmatprep.subr.bf16.mxu1 %v4944_v50 }
 0x2a2   : > { %4201 = vmatmul.mubr.msk.bf16.vlgmr.msra.gmra.mrb[24].mxu0 %vm462_vm0, %v605_v19  ;;  %v1945_v19 = vld [vmem:[%s7332_s9 + $0x8] sm:$0xff] }
 0x2a3   : > { %4181 = vmatmul.mubr.msk.bf16.vlgmr.msra.gmra.mrb[8].mxu1 %vm462_vm0, %v604_v20  ;;  %4225 = vmatpush3.bf16.xpose.msra.mxu0 %v1792_v53  ;;  %v1946_v20 = vld [vmem:[%s7332_s9 + $0x10] sm:$0xff]  ;;  %v1960_v53 = vpack.c.bf16 %v1945_v19, %v1944_v51 }
 0x2a4   : > { %4205 = vmatpush3.bf16.xpose.msra.mxu1 %v1700_v21  ;;  %4226 = vmatprep.subr.bf16.mxu0 %v4944_v50  ;;  %v1947_v21 = vld [vmem:[%s7332_s9 + $0x18] sm:$0xff] }
 0x2a5   : > { %4206 = vmatprep.subr.bf16.mxu1 %v4944_v50  ;;  %4240 = vmatprep.mubr.msk.bf16.mxu0 %vm4946_vm1, %v4944_v50  ;;  %v1961_v23 = vpack.c.bf16 %v1947_v21, %v1946_v20 }
 0x2a6   : > { %4220 = vmatprep.mubr.msk.bf16.mxu1 %vm4946_vm1, %v4944_v50 }
 0x2ab   : > { %4227 = vmatpush3.bf16.xpose.msra.mxu0 %v1795_v1  ;;  %v1949_v1 = vld [vmem:[%s7332_s9 + $0x28] sm:$0xff] }
 0x2ac   : > { %4207 = vmatpush3.bf16.xpose.msra.mxu1 %v1703_v61  ;;  %4228 = vmatprep.subr.bf16.mxu0 %v4944_v50  ;;  %v1962_v61 = vpack.c.bf16 %v1949_v1, %v1948_v26 }
 0x2ad   : > { %4208 = vmatprep.subr.bf16.mxu1 %v4944_v50 }
 0x2b3   : > { %4229 = vmatpush3.bf16.xpose.msra.mxu0 %v1798_v33  ;;  %v1963_v33 = vpack.c.bf16 %v1951_v30, %v1950_v27 }
 0x2b4   : > { %4209 = vmatpush3.bf16.xpose.msra.mxu1 %v1706_v12  ;;  %4230 = vmatprep.subr.bf16.mxu0 %v4944_v50  ;;  %v1952_v12 = vld [vmem:[%s7332_s9 + $0x40] sm:$0xff] }
 0x2b5   : > { %4210 = vmatprep.subr.bf16.mxu1 %v4944_v50 }
 0x2bb   : > { %4231 = vmatpush3.bf16.xpose.msra.mxu0 %v1801_v14  ;;  %v1964_v14 = vpack.c.bf16 %v1953_v17, %v1952_v12 }
 0x2bc   : > { %4211 = vmatpush3.bf16.xpose.msra.mxu1 %v1709_v37  ;;  %4232 = vmatprep.subr.bf16.mxu0 %v4944_v50  ;;  %v1955_v37 = vld [vmem:[%s7332_s9 + $0x58] sm:$0xff] }
 0x2bd   : > { %4212 = vmatprep.subr.bf16.mxu1 %v4944_v50  ;;  %v1965_v38 = vpack.c.bf16 %v1955_v37, %v1954_v11 }
 0x2c3   : > { %4233 = vmatpush3.bf16.xpose.msra.mxu0 %v1804_v40  ;;  %v1957_v40 = vld [vmem:[%s7332_s9 + $0x68] sm:$0xff] }
 0x2c4   : > { %4213 = vmatpush3.bf16.xpose.msra.mxu1 %v1712_v41  ;;  %4234 = vmatprep.subr.bf16.mxu0 %v4944_v50  ;;  %v1966_v41 = vpack.c.bf16 %v1957_v40, %v1956_v6 }
 0x2c5   : > { %4214 = vmatprep.subr.bf16.mxu1 %v4944_v50 }
 0x2cb   : > { %4235 = vmatpush3.bf16.xpose.msra.mxu0 %v1807_v52  ;;  %v1967_v52 = vpack.c.bf16 %v1959_v24, %v1958_v31 }
 0x2cc   : > { %4215 = vmatpush3.bf16.xpose.msra.mxu1 %v1715_v9  ;;  %4236 = vmatprep.subr.bf16.mxu0 %v4944_v50 }
 0x2cd   : > { %4216 = vmatprep.subr.bf16.mxu1 %v4944_v50 }
 0x2d3   : > { %4237 = vmatpush3.bf16.xpose.msra.mxu0 %v1810_v43 }
 0x2d4   : > { %4217 = vmatpush3.bf16.xpose.msra.mxu1 %v1718_v44  ;;  %4238 = vmatprep.subr.bf16.mxu0 %v4944_v50 }
 0x2d5   : > { %4218 = vmatprep.subr.bf16.mxu1 %v4944_v50 }
 0x2db   : > { %4239 = vmatpush3.bf16.xpose.msra.mxu0 %v1813_v58 }
 0x2dc   : > { %4219 = vmatpush3.bf16.xpose.msra.mxu1 %v1721_v60  ;;  %4276 = vmatprep.subr.bf16.mxu0 %v4944_v50 }
 0x2dd   : > { %4244 = vmatprep.subr.bf16.mxu1 %v1960_v53 }
 0x2e2   : > { %4241 = vmatmul.mubr.msk.bf16.vlgmr.msra.gmra.mrb[28].mxu0 %vm462_vm0, %v607_v22 }
 0x2e3   : > { %4221 = vmatmul.mubr.msk.bf16.vlgmr.msra.gmra.mrb[12].mxu1 %vm462_vm0, %v606_v47  ;;  %4292 = vmatprep.mubr.msk.bf16.mxu0 %vm4946_vm1, %v4944_v50 }
 0x2e4   : > { %4245 = vmatpush3.bf16.msra.mxu1 %v1960_v53 }
 0x2e5   : > { %4246 = vmatprep.subr.bf16.mxu1 %v1961_v23 }
 0x2e8   : > { %4247 = vmatpush3.bf16.msra.mxu1 %v1961_v23 }
 0x2e9   : > { %4248 = vmatprep.subr.bf16.mxu1 %v1962_v61 }
 0x2ec   : > { %4249 = vmatpush3.bf16.msra.mxu1 %v1962_v61 }
 0x2ed   : > { %4250 = vmatprep.subr.bf16.mxu1 %v1963_v33 }
 0x2f0   : > { %4251 = vmatpush3.bf16.msra.mxu1 %v1963_v33 }
 0x2f1   : > { %4252 = vmatprep.subr.bf16.mxu1 %v1964_v14 }
 0x2f4   : > { %4253 = vmatpush3.bf16.msra.mxu1 %v1964_v14 }
 0x2f5   : > { %v5916_v3 = vpop.f32.mrb[16].mxu0  ;;  %4254 = vmatprep.subr.bf16.mxu1 %v1965_v38 }
 0x2f6   : > { %v5918_v5 = vpop.f32.mrb[0].mxu1  ;;  %v4122_v48 = vpop.f32.mrb[17].mxu0 }
 0x2f7   : > { %v5920_v7 = vpop.f32.mrb[18].mxu0  ;;  %1856 = vmax.xlane.f32.xlu0 %v5918_v5  ;;  %v4102_v10 = vpop.f32.mrb[1].mxu1 }
 0x2f8   : > { %v5923_v46 = vpop.f32.mrb[2].mxu1  ;;  %v4123_v13 = vpop.f32.mrb[19].mxu0  ;;  %4255 = vmatpush3.bf16.msra.mxu1 %v1965_v38 }
 0x2f9   : > { %1858 = vmax.xlane.f32.xlu1 %v5923_v46  ;;  %v4103_v15 = vpop.f32.mrb[3].mxu1  ;;  %4256 = vmatprep.subr.bf16.mxu1 %v1966_v41 }
 0x2fb   : > { %1860 = vmax.xlane.f32.xlu0 %v5916_v3 }
 0x2fc   : > { %4257 = vmatpush3.bf16.msra.mxu1 %v1966_v41 }
 0x2fd   : > { %4258 = vmatprep.subr.bf16.mxu1 %v1967_v52 }
 0x2ff   : > { %1862 = vmax.xlane.f32.xlu0 %v5920_v7 }
 0x300   : > { %4259 = vmatpush3.bf16.msra.mxu1 %v1967_v52 }
 0x301   : > { %4296 = vmatprep.subr.bf16.mxu1 %v4944_v50 }
 0x335   : > { %v5977_v9 = vpop.f32.mrb[20].mxu0 }
 0x336   : > { %v1389_v42 = vpop.f32.mrb[4].mxu1  ;;  %v4162_v56 = vpop.f32.mrb[21].mxu0 }
 0x337   : > { %v5979_v43 = vpop.f32.mrb[22].mxu0  ;;  %1864 = vmax.xlane.f32.xlu1 %v1389_v42  ;;  %v4142_v44 = vpop.f32.mrb[5].mxu1 }
 0x338   : > { %v1392_v45 = vpop.f32.mrb[6].mxu1  ;;  %v4163_v54 = vpop.f32.mrb[23].mxu0 }
 0x339   : > { %1866 = vmax.xlane.f32.xlu0 %v1392_v45  ;;  %v4143_v58 = vpop.f32.mrb[7].mxu1 }
 0x33b   : > { %1868 = vmax.xlane.f32.xlu1 %v5977_v9 }
 0x33d   : > { %1870 = vmax.xlane.f32.xlu0 %v5979_v43 }
 0x375   : > { %v5983_v60 = vpop.f32.mrb[24].mxu0 }
 0x376   : > { %v5985_v49 = vpop.f32.mrb[8].mxu1  ;;  %v4202_v63 = vpop.f32.mrb[25].mxu0 }
 0x377   : > { %v5987_v2 = vpop.f32.mrb[26].mxu0  ;;  %1872 = vmax.xlane.f32.xlu1 %v5985_v49  ;;  %v4182_v16 = vpop.f32.mrb[9].mxu1 }
 0x378   : > { %v5990_v22 = vpop.f32.mrb[10].mxu1  ;;  %v4203_v47 = vpop.f32.mrb[27].mxu0 }
 0x379   : > { %1874 = vmax.xlane.f32.xlu0 %v5990_v22  ;;  %v4183_v48 = vpop.f32.mrb[11].mxu1  ;;  %v4714_v47 = vld [vmem:[%s7331_s8] sm:$0xff] }
 0x37a   : > { %v4717_v48 = vld [vmem:[%s7331_s8 + $0x18] sm:$0xff] }
 0x37b   : > { %1876 = vmax.xlane.f32.xlu1 %v5983_v60 }
 0x37d   : > { %1878 = vmax.xlane.f32.xlu0 %v5987_v2 }
 0x384   : > { %v1857_v10 = vpop.xlane.xlu0 %1856 }
 0x385   : > { %v1888_v13 = vsub.f32 %v5918_v5, %v1857_v10 }
 0x386   : > { %v1859_v15 = vpop.xlane.xlu1 %1858 }
 0x387   : > { %v1904_v51 = vmul.f32 1.442695, %v1888_v13  ;;  %v1889_v19 = vsub.f32 %v5923_v46, %v1859_v15  ;;  %v4718_v15 = vld [vmem:[%s7331_s8 + $0x20] sm:$0xff] }
 0x388   : > { %v1861_v20 = vpop.xlane.xlu0 %1860 }
 0x389   : > { %v1906_v53 = vmul.f32 1.442695, %v1889_v19  ;;  %v1890_v21 = vsub.f32 %v5916_v3, %v1861_v20  ;;  %4586 = vpow2.f32 %v1904_v51  ;;  %v4719_v19 = vld [vmem:[%s7331_s8 + $0x28] sm:$0xff] }
 0x38b   : > { %4588 = vpow2.f32 %v1906_v53  ;;  %v1908_v23 = vmul.f32 1.442695, %v1890_v21  ;;  %v4720_v21 = vld [vmem:[%s7331_s8 + $0x30] sm:$0xff] }
 0x38c   : > { %v1863_v26 = vpop.xlane.xlu0 %1862 }
 0x38d   : > { %v1891_v1 = vsub.f32 %v5920_v7, %v1863_v26  ;;  %4590 = vpow2.f32 %v1908_v23  ;;  %v4721_v23 = vld [vmem:[%s7331_s8 + $0x38] sm:$0xff]  ;;  %v4722_v26 = vld [vmem:[%s7331_s8 + $0x40] sm:$0xff] }
 0x38f   : > { %v1910_v61 = vmul.f32 1.442695, %v1891_v1  ;;  %v4723_v1 = vld [vmem:[%s7331_s8 + $0x48] sm:$0xff] }
 0x391   : > { %4592 = vpow2.f32 %v1910_v61  ;;  %v4724_v61 = vld [vmem:[%s7331_s8 + $0x50] sm:$0xff] }
 0x393   : > { %v5999_v27 = vpop.eup %4586 }
 0x395   : > { %v6001_v5 = vpop.eup %4588 }
 0x396   : > { %v1936_v46 = vpack.c.bf16 %v6001_v5, %v5999_v27 }
 0x397   : > { %v6005_v30 = vpop.eup %4590 }
 0x398   : > { %4260 = vmatprep.mubr.bf16.mxu1 %v1936_v46  ;;  %v4725_v46 = vld [vmem:[%s7331_s8 + $0x58] sm:$0xff] }
 0x39b   : > { %v6007_v3 = vpop.eup %4592 }
 0x39c   : > { %v1937_v33 = vpack.c.bf16 %v6007_v3, %v6005_v30 }
 0x39e   : > { %4261 = vmatmul.mubr.bf16.vlgmr.msra.gmra.mrb[16].mxu1 %v1937_v33  ;;  %v4726_v33 = vld [vmem:[%s7331_s8 + $0x60] sm:$0xff] }
 0x3b5   : > { %v6011_v7 = vpop.f32.mrb[28].mxu0 }
 0x3b6   : > { %v6013_v12 = vpop.f32.mrb[12].mxu1  ;;  %v4242_v17 = vpop.f32.mrb[29].mxu0 }
 0x3b7   : > { %v6015_v11 = vpop.f32.mrb[30].mxu0  ;;  %1880 = vmax.xlane.f32.xlu1 %v6013_v12  ;;  %v4222_v14 = vpop.f32.mrb[13].mxu1  ;;  %v4727_v17 = vld [vmem:[%s7331_s8 + $0x68] sm:$0xff] }
 0x3b8   : > { %v6018_v37 = vpop.f32.mrb[14].mxu1  ;;  %v4243_v38 = vpop.f32.mrb[31].mxu0  ;;  %v4728_v14 = vld [vmem:[%s7331_s8 + $0x70] sm:$0xff] }
 0x3b9   : > { %1882 = vmax.xlane.f32.xlu0 %v6018_v37  ;;  %v4223_v6 = vpop.f32.mrb[15].mxu1  ;;  %v4729_v38 = vld [vmem:[%s7331_s8 + $0x78] sm:$0xff] }
 0x3bb   : > { %1884 = vmax.xlane.f32.xlu1 %v6011_v7 }
 0x3bd   : > { %1886 = vmax.xlane.f32.xlu0 %v6015_v11 }
 0x3c4   : > { %v1865_v40 = vpop.xlane.xlu1 %1864 }
 0x3c5   : > { %v1892_v41 = vsub.f32 %v1389_v42, %v1865_v40 }
 0x3c6   : > { %v1867_v31 = vpop.xlane.xlu0 %1866 }
 0x3c7   : > { %v1912_v24 = vmul.f32 1.442695, %v1892_v41  ;;  %v1893_v52 = vsub.f32 %v1392_v45, %v1867_v31 }
 0x3c8   : > { %v1869_v56 = vpop.xlane.xlu1 %1868 }
 0x3c9   : > { %v1914_v44 = vmul.f32 1.442695, %v1893_v52  ;;  %v1894_v54 = vsub.f32 %v5977_v9, %v1869_v56  ;;  %4594 = vpow2.f32 %v1912_v24  ;;  %v4715_v9 = vld [vmem:[%s7331_s8 + $0x10] sm:$0xff] }
 0x3ca   : > { %v1871_v58 = vpop.xlane.xlu0 %1870 }
 0x3cb   : > { %4596 = vpow2.f32 %v1914_v44  ;;  %v1916_v63 = vmul.f32 1.442695, %v1894_v54  ;;  %v1895_v16 = vsub.f32 %v5979_v43, %v1871_v58  ;;  %v4716_v43 = vld [vmem:[%s7331_s8 + $0x8] sm:$0xff] }
 0x3cc   : > { %880 = vrot.lane.b32.xlu1 %v4714_v47, %s4947_s25 }
 0x3cd   : > { %v1918_v42 = vmul.f32 1.442695, %v1895_v16  ;;  %4598 = vpow2.f32 %v1916_v63 }
 0x3cf   : > { %4600 = vpow2.f32 %v1918_v42 }
 0x3d0   : > { %884 = vrot.lane.b32.xlu1 %v4715_v9, %s4947_s25 }
 0x3d3   : > { %882 = vrot.lane.b32.xlu0 %v4716_v43, %s4947_s25  ;;  %v6037_v45 = vpop.eup %4594 }
 0x3d4   : > { %886 = vrot.lane.b32.xlu1 %v4717_v48, %s4947_s25 }
 0x3d5   : > { %v6043_v10 = vpop.eup %4596 }
 0x3d6   : > { %v1938_v13 = vpack.c.bf16 %v6043_v10, %v6037_v45 }
 0x3d7   : > { %888 = vrot.lane.b32.xlu0 %v4718_v15, %s4947_s25  ;;  %v6051_v51 = vpop.eup %4598 }
 0x3d8   : > { %4264 = vmatprep.mubr.bf16.mxu1 %v1938_v13  ;;  %890 = vrot.lane.b32.xlu1 %v4719_v19, %s4947_s25 }
 0x3d9   : > { %v6057_v20 = vpop.eup %4600 }
 0x3da   : > { %v1939_v53 = vpack.c.bf16 %v6057_v20, %v6051_v51 }
 0x3db   : > { %892 = vrot.lane.b32.xlu0 %v4720_v21, %s4947_s25 }
 0x3dc   : > { %4265 = vmatmul.mubr.bf16.gmra.mrb[20].mxu1 %v1939_v53  ;;  %894 = vrot.lane.b32.xlu1 %v4721_v23, %s4947_s25 }
 0x3df   : > { %896 = vrot.lane.b32.xlu0 %v4722_v26, %s4947_s25 }
 0x3e0   : > { %898 = vrot.lane.b32.xlu1 %v4723_v1, %s4947_s25 }
 0x3e3   : > { %900 = vrot.lane.b32.xlu0 %v4724_v61, %s4947_s25 }
 0x3e4   : > { %902 = vrot.lane.b32.xlu1 %v4725_v46, %s4947_s25 }
 0x3e7   : > { %904 = vrot.lane.b32.xlu0 %v4726_v33, %s4947_s25 }
 0x3e8   : > { %906 = vrot.lane.b32.xlu1 %v4727_v17, %s4947_s25 }
 0x3eb   : > { %908 = vrot.lane.b32.xlu0 %v4728_v14, %s4947_s25 }
 0x3ec   : > { %910 = vrot.lane.b32.xlu1 %v4729_v38, %s4947_s25 }
 0x404   : > { %v1873_v6 = vpop.xlane.xlu1 %1872 }
 0x405   : > { %v1896_v40 = vsub.f32 %v5985_v49, %v1873_v6 }
 0x406   : > { %v1875_v41 = vpop.xlane.xlu0 %1874 }
 0x407   : > { %v1920_v31 = vmul.f32 1.442695, %v1896_v40  ;;  %v1897_v24 = vsub.f32 %v5990_v22, %v1875_v41 }
 0x408   : > { %v1877_v52 = vpop.xlane.xlu1 %1876 }
 0x409   : > { %v1922_v56 = vmul.f32 1.442695, %v1897_v24  ;;  %v1898_v44 = vsub.f32 %v5983_v60, %v1877_v52  ;;  %4602 = vpow2.f32 %v1920_v31 }
 0x40a   : > { %v1879_v54 = vpop.xlane.xlu0 %1878 }
 0x40b   : > { %4604 = vpow2.f32 %v1922_v56  ;;  %v1924_v58 = vmul.f32 1.442695, %v1898_v44  ;;  %v1899_v63 = vsub.f32 %v5987_v2, %v1879_v54 }
 0x40d   : > { %v1926_v16 = vmul.f32 1.442695, %v1899_v63  ;;  %4606 = vpow2.f32 %v1924_v58 }
 0x40f   : > { %4608 = vpow2.f32 %v1926_v16 }
 0x413   : > { %v6105_v47 = vpop.eup %4602 }
 0x415   : > { %v6107_v49 = vpop.eup %4604 }
 0x416   : > { %v1940_v22 = vpack.c.bf16 %v6107_v49, %v6105_v47 }
 0x417   : > { %v6111_v42 = vpop.eup %4606 }
 0x418   : > { %4268 = vmatprep.mubr.bf16.mxu1 %v1940_v22 }
 0x419   : > { %v6113_v60 = vpop.eup %4608 }
 0x41a   : > { %v1941_v9 = vpack.c.bf16 %v6113_v60, %v6111_v42 }
 0x41c   : > { %4269 = vmatmul.mubr.bf16.gmra.mrb[24].mxu1 %v1941_v9 }
 0x444   : > { %v1881_v2 = vpop.xlane.xlu1 %1880 }
 0x445   : > { %v1900_v43 = vsub.f32 %v6013_v12, %v1881_v2 }
 0x446   : > { %v1883_v48 = vpop.xlane.xlu0 %1882 }
 0x447   : > { %v1928_v13 = vmul.f32 1.442695, %v1900_v43  ;;  %v1901_v15 = vsub.f32 %v6018_v37, %v1883_v48 }
 0x448   : > { %v1885_v19 = vpop.xlane.xlu1 %1884 }
 0x449   : > { %v1930_v53 = vmul.f32 1.442695, %v1901_v15  ;;  %v1902_v21 = vsub.f32 %v6011_v7, %v1885_v19  ;;  %4610 = vpow2.f32 %v1928_v13 }
 0x44a   : > { %v1887_v23 = vpop.xlane.xlu0 %1886 }
 0x44b   : > { %4612 = vpow2.f32 %v1930_v53  ;;  %v1932_v26 = vmul.f32 1.442695, %v1902_v21  ;;  %v1903_v1 = vsub.f32 %v6015_v11, %v1887_v23 }
 0x44c   : > { %v6121_v61 = vpop.permute.xlu1 %880 }
 0x44d   : > { %v1934_v46 = vmul.f32 1.442695, %v1903_v1  ;;  %4614 = vpow2.f32 %v1932_v26  ;;  %v944_v12 = vmul.f32 %v6121_v61, %v5348_v55  ;;  %v928_v7 = vmul.f32 %v6121_v61, %v5351_v57 }
 0x44e   : > { %v6123_v33 = vpop.permute.xlu0 %882 }
 0x44f   : > { %4616 = vpow2.f32 %v1934_v46  ;;  %v945_v37 = vmul.f32 %v6123_v33, %v5354_v59  ;;  %v929_v17 = vmul.f32 %v6123_v33, %v5359_v62 }
 0x450   : > { %v6133_v11 = vpop.permute.xlu1 %884 }
 0x451   : > { %v1064_v14 = vpack.c.bf16 %v945_v37, %v944_v12  ;;  %v1056_v38 = vpack.c.bf16 %v929_v17, %v928_v7  ;;  %v946_v24 = vmul.f32 %v6133_v11, %v5348_v55  ;;  %v930_v56 = vmul.f32 %v6133_v11, %v5351_v57 }
 0x452   : > { %v6135_v6 = vpop.permute.xlu0 %888 }
 0x453   : > { %2186 = vrot.lane.b32.xlu1 %v1064_v14, %s4947_s25  ;;  %2113 = vrot.lane.b32.xlu0 %v1056_v38, %s4947_s25  ;;  %v6139_v40 = vpop.eup %4610  ;;  %v948_v2 = vmul.f32 %v6135_v6, %v5348_v55  ;;  %v932_v13 = vmul.f32 %v6135_v6, %v5351_v57 }
 0x454   : > { %v6141_v41 = vpop.permute.xlu1 %886 }
 0x455   : > { %v6143_v31 = vpop.eup %4612  ;;  %v947_v52 = vmul.f32 %v6141_v41, %v5354_v59  ;;  %v931_v44 = vmul.f32 %v6141_v41, %v5359_v62 }
 0x456   : > { %v6153_v54 = vpop.permute.xlu0 %892  ;;  %v1942_v58 = vpack.c.bf16 %v6143_v31, %v6139_v40 }
 0x457   : > { %v1065_v63 = vpack.c.bf16 %v947_v52, %v946_v24  ;;  %v1057_v16 = vpack.c.bf16 %v931_v44, %v930_v56  ;;  %v6157_v22 = vpop.eup %4614  ;;  %v950_v1 = vmul.f32 %v6153_v54, %v5348_v55  ;;  %v934_v12 = vmul.f32 %v6153_v54, %v5351_v57 }
 0x458   : > { %v6159_v9 = vpop.permute.xlu1 %890  ;;  %4272 = vmatprep.mubr.bf16.mxu1 %v1942_v58 }
 0x459   : > { %v6163_v43 = vpop.eup %4616  ;;  %2188 = vrot.lane.b32.xlu1 %v1065_v63, %s4947_s25  ;;  %2115 = vrot.lane.b32.xlu0 %v1057_v16, %s4947_s25  ;;  %v949_v48 = vmul.f32 %v6159_v9, %v5354_v59  ;;  %v933_v15 = vmul.f32 %v6159_v9, %v5359_v62 }
 0x45a   : > { %v6173_v19 = vpop.permute.xlu0 %896  ;;  %v1943_v53 = vpack.c.bf16 %v6163_v43, %v6157_v22 }
 0x45b   : > { %v1066_v21 = vpack.c.bf16 %v949_v48, %v948_v2  ;;  %v1058_v23 = vpack.c.bf16 %v933_v15, %v932_v13  ;;  %v952_v24 = vmul.f32 %v6173_v19, %v5348_v55  ;;  %v936_v56 = vmul.f32 %v6173_v19, %v5351_v57 }
 0x45c   : > { %v6177_v26 = vpop.permute.xlu1 %894  ;;  %4273 = vmatmul.mubr.bf16.gmra.mrb[28].mxu1 %v1943_v53 }
 0x45d   : > { %2190 = vrot.lane.b32.xlu1 %v1066_v21, %s4947_s25  ;;  %2117 = vrot.lane.b32.xlu0 %v1058_v23, %s4947_s25  ;;  %v951_v46 = vmul.f32 %v6177_v26, %v5354_v59  ;;  %v935_v37 = vmul.f32 %v6177_v26, %v5359_v62 }
 0x45e   : > { %v6189_v7 = vpop.permute.xlu0 %900  ;;  %4312 = vmatprep.mubr.msk.bf16.mxu1 %vm4946_vm1, %v4944_v50 }
 0x45f   : > { %v1067_v17 = vpack.c.bf16 %v951_v46, %v950_v1  ;;  %v1059_v14 = vpack.c.bf16 %v935_v37, %v934_v12  ;;  %v954_v48 = vmul.f32 %v6189_v7, %v5348_v55  ;;  %v938_v15 = vmul.f32 %v6189_v7, %v5351_v57 }
 0x460   : > { %v6193_v38 = vpop.permute.xlu1 %898 }
 0x461   : > { %2192 = vrot.lane.b32.xlu1 %v1067_v17, %s4947_s25  ;;  %2119 = vrot.lane.b32.xlu0 %v1059_v14, %s4947_s25  ;;  %v953_v52 = vmul.f32 %v6193_v38, %v5354_v59  ;;  %v937_v44 = vmul.f32 %v6193_v38, %v5359_v62 }
 0x462   : > { %v6205_v58 = vpop.permute.xlu0 %904 }
 0x463   : > { %v1068_v63 = vpack.c.bf16 %v953_v52, %v952_v24  ;;  %v1060_v16 = vpack.c.bf16 %v937_v44, %v936_v56  ;;  %v956_v46 = vmul.f32 %v6205_v58, %v5348_v55  ;;  %v940_v17 = vmul.f32 %v6205_v58, %v5351_v57 }
 0x464   : > { %v6207_v2 = vpop.permute.xlu1 %902 }
 0x465   : > { %2194 = vrot.lane.b32.xlu1 %v1068_v63, %s4947_s25  ;;  %2121 = vrot.lane.b32.xlu0 %v1060_v16, %s4947_s25  ;;  %v955_v13 = vmul.f32 %v6207_v2, %v5354_v59  ;;  %v939_v53 = vmul.f32 %v6207_v2, %v5359_v62 }
 0x466   : > { %v6223_v12 = vpop.permute.xlu0 %908 }
 0x467   : > { %v1069_v21 = vpack.c.bf16 %v955_v13, %v954_v48  ;;  %v1061_v23 = vpack.c.bf16 %v939_v53, %v938_v15  ;;  %v958_v44 = vmul.f32 %v6223_v12, %v5348_v55  ;;  %v942_v16 = vmul.f32 %v6223_v12, %v5351_v57 }
 0x468   : > { %v6219_v1 = vpop.permute.xlu1 %906  ;;  %v977_v13 = vmul.f32 %v6123_v33, %v5481_v25  ;;  %v961_v55 = vmul.f32 %v6123_v33, %v5487_v29  ;;  %v960_v57 = vmul.f32 %v6121_v61, %v5500_v36 }
 0x469   : > { %2196 = vrot.lane.b32.xlu1 %v1069_v21, %s4947_s25  ;;  %2123 = vrot.lane.b32.xlu0 %v1061_v23, %s4947_s25  ;;  %v957_v37 = vmul.f32 %v6219_v1, %v5354_v59  ;;  %v941_v14 = vmul.f32 %v6219_v1, %v5359_v62  ;;  %v976_v21 = vmul.f32 %v6121_v61, %v5493_v34 }
 0x46b   : > { %v1070_v24 = vpack.c.bf16 %v957_v37, %v956_v46  ;;  %v1062_v52 = vpack.c.bf16 %v941_v14, %v940_v17  ;;  %v1080_v23 = vpack.c.bf16 %v977_v13, %v976_v21  ;;  %v1072_v37 = vpack.c.bf16 %v961_v55, %v960_v57 }
 0x46c   : > { %v6233_v56 = vpop.permute.xlu1 %910  ;;  %v979_v17 = vmul.f32 %v6141_v41, %v5481_v25  ;;  %v963_v14 = vmul.f32 %v6141_v41, %v5487_v29  ;;  %v965_v13 = vmul.f32 %v6159_v9, %v5487_v29  ;;  %v983_v55 = vmul.f32 %v6177_v26, %v5481_v25 }
 0x46d   : > { %2198 = vrot.lane.b32.xlu1 %v1070_v24, %s4947_s25  ;;  %2125 = vrot.lane.b32.xlu0 %v1062_v52, %s4947_s25  ;;  %v959_v63 = vmul.f32 %v6233_v56, %v5354_v59  ;;  %v943_v48 = vmul.f32 %v6233_v56, %v5359_v62  ;;  %v978_v52 = vmul.f32 %v6133_v11, %v5493_v34 }
 0x46e   : > { %v967_v57 = vmul.f32 %v6177_v26, %v5487_v29 }
 0x46f   : > { %v1071_v15 = vpack.c.bf16 %v959_v63, %v958_v44  ;;  %v1063_v53 = vpack.c.bf16 %v943_v48, %v942_v16  ;;  %v962_v44 = vmul.f32 %v6133_v11, %v5500_v36  ;;  %v1081_v63 = vpack.c.bf16 %v979_v17, %v978_v52 }
 0x470   : > { %v981_v48 = vmul.f32 %v6159_v9, %v5481_v25 }
 0x471   : > { %2200 = vrot.lane.b32.xlu1 %v1071_v15, %s4947_s25  ;;  %2127 = vrot.lane.b32.xlu0 %v1063_v53, %s4947_s25  ;;  %v4262_v59 = vpop.f32.mrb[16].mxu1  ;;  %v1073_v16 = vpack.c.bf16 %v963_v14, %v962_v44  ;;  %v980_v15 = vmul.f32 %v6135_v6, %v5493_v34  ;;  %v964_v53 = vmul.f32 %v6135_v6, %v5500_v36 }
 0x472   : > { %4618 = vrcp.f32 %v4262_v59  ;;  %v2002_v62 = vpop.f32.mrb[17].mxu1 }
 0x473   : > { %4620 = vrcp.f32 %v2002_v62  ;;  %v4263_v46 = vpop.f32.mrb[18].mxu1  ;;  %v1082_v21 = vpack.c.bf16 %v981_v48, %v980_v15  ;;  %v1074_v59 = vpack.c.bf16 %v965_v13, %v964_v53  ;;  %v984_v13 = vmul.f32 %v6173_v19, %v5493_v34 }
 0x474   : > { %4622 = vrcp.f32 %v4263_v46  ;;  %v2005_v24 = vpop.f32.mrb[19].mxu1 }
 0x475   : > { %4624 = vrcp.f32 %v2005_v24  ;;  %2332 = vrot.lane.b32.xlu1 %v1080_v23, %s4947_s25  ;;  %2259 = vrot.lane.b32.xlu0 %v1072_v37, %s4947_s25  ;;  %v982_v23 = vmul.f32 %v6153_v54, %v5493_v34  ;;  %v966_v37 = vmul.f32 %v6153_v54, %v5500_v36 }
 0x477   : > { %v1083_v14 = vpack.c.bf16 %v983_v55, %v982_v23  ;;  %v1075_v44 = vpack.c.bf16 %v967_v57, %v966_v37  ;;  %v971_v57 = vmul.f32 %v6207_v2, %v5487_v29  ;;  %v989_v37 = vmul.f32 %v6219_v1, %v5481_v25 }
 0x479   : > { %2334 = vrot.lane.b32.xlu1 %v1081_v63, %s4947_s25  ;;  %2261 = vrot.lane.b32.xlu0 %v1073_v16, %s4947_s25  ;;  %v985_v63 = vmul.f32 %v6193_v38, %v5481_v25  ;;  %v969_v16 = vmul.f32 %v6193_v38, %v5487_v29 }
 0x47b   : > { %v1084_v55 = vpack.c.bf16 %v985_v63, %v984_v13  ;;  %v975_v13 = vmul.f32 %v6233_v56, %v5487_v29 }
 0x47c   : > { %v4619_v62 = vpop.eup %4618 }
 0x47d   : > { %v4621_v46 = vpop.eup %4620  ;;  %2336 = vrot.lane.b32.xlu1 %v1082_v21, %s4947_s25  ;;  %2263 = vrot.lane.b32.xlu0 %v1074_v59, %s4947_s25  ;;  %v6293_v48 = vmul.f32 %v4619_v62, %v6005_v30  ;;  %v987_v59 = vmul.f32 %v6207_v2, %v5481_v25 }
 0x47e   : > { %v4623_v17 = vpop.eup %4622  ;;  %v6302_v15 = vmul.f32 %v4621_v46, %v5999_v27  ;;  %v986_v27 = vmul.f32 %v6189_v7, %v5493_v34 }
 0x47f   : > { %v4625_v24 = vpop.eup %4624  ;;  %v6286_v52 = vmul.f32 %v4623_v17, %v6007_v3  ;;  %v968_v3 = vmul.f32 %v6173_v19, %v5500_v36  ;;  %v973_v17 = vmul.f32 %v6219_v1, %v5487_v29  ;;  %v1008_v29 = vmul.f32 %v6121_v61, %v5410_v28 }
 0x480   : > { %v6305_v53 = vmul.f32 %v4625_v24, %v6001_v5  ;;  %v970_v5 = vmul.f32 %v6189_v7, %v5500_v36  ;;  %v1085_v23 = vpack.c.bf16 %v987_v59, %v986_v27  ;;  %v972_v24 = vmul.f32 %v6205_v58, %v5500_v36 }
 0x481   : > { %2338 = vrot.lane.b32.xlu1 %v1083_v14, %s4947_s25  ;;  %2265 = vrot.lane.b32.xlu0 %v1075_v44, %s4947_s25  ;;  %v2098_v30 = vpack.c.bf16 %v6286_v52, %v6293_v48  ;;  %v1076_v21 = vpack.c.bf16 %v969_v16, %v968_v3  ;;  %v988_v14 = vmul.f32 %v6205_v58, %v5493_v34 }
 0x482   : > { %v2097_v62 = vpack.c.bf16 %v6305_v53, %v6302_v15  ;;  %v1077_v46 = vpack.c.bf16 %v971_v57, %v970_v5  ;;  %v1078_v63 = vpack.c.bf16 %v973_v17, %v972_v24  ;;  %v991_v16 = vmul.f32 %v6233_v56, %v5481_v25 }
 0x483   : > { %v1086_v44 = vpack.c.bf16 %v989_v37, %v988_v14  ;;  %v990_v3 = vmul.f32 %v6223_v12, %v5493_v34  ;;  %v1009_v57 = vmul.f32 %v6123_v33, %v5424_v35  ;;  %v993_v25 = vmul.f32 %v6123_v33, %v5429_v39 }
 0x484   : > { %v992_v34 = vmul.f32 %v6121_v61, %v5418_v32  ;;  %v1011_v5 = vmul.f32 %v6141_v41, %v5424_v35  ;;  %v994_v37 = vmul.f32 %v6133_v11, %v5418_v32  ;;  %v1013_v24 = vmul.f32 %v6159_v9, %v5424_v35 }
 0x485   : > { %2340 = vrot.lane.b32.xlu1 %v1084_v55, %s4947_s25  ;;  %2267 = vrot.lane.b32.xlu0 %v1076_v21, %s4947_s25  ;;  %v974_v55 = vmul.f32 %v6223_v12, %v5500_v36  ;;  %v1087_v21 = vpack.c.bf16 %v991_v16, %v990_v3  ;;  %v1096_v27 = vpack.c.bf16 %v1009_v57, %v1008_v29 }
 0x486   : > { %v1088_v36 = vpack.c.bf16 %v993_v25, %v992_v34  ;;  %v996_v16 = vmul.f32 %v6135_v6, %v5418_v32  ;;  %v998_v57 = vmul.f32 %v6153_v54, %v5418_v32  ;;  %v1017_v34 = vmul.f32 %v6193_v38, %v5424_v35 }
 0x487   : > { %v1079_v59 = vpack.c.bf16 %v975_v13, %v974_v55  ;;  %v1015_v55 = vmul.f32 %v6177_v26, %v5424_v35 }
 0x489   : > { %2342 = vrot.lane.b32.xlu1 %v1085_v23, %s4947_s25  ;;  %2269 = vrot.lane.b32.xlu0 %v1077_v46, %s4947_s25  ;;  %v995_v23 = vmul.f32 %v6141_v41, %v5429_v39  ;;  %v1010_v46 = vmul.f32 %v6133_v11, %v5410_v28 }
 0x48b   : > { %v1097_v17 = vpack.c.bf16 %v1011_v5, %v1010_v46  ;;  %v1089_v14 = vpack.c.bf16 %v995_v23, %v994_v37  ;;  %v1000_v5 = vmul.f32 %v6173_v19, %v5418_v32  ;;  %v1019_v37 = vmul.f32 %v6207_v2, %v5424_v35 }
 0x48d   : > { %2344 = vrot.lane.b32.xlu1 %v1086_v44, %s4947_s25  ;;  %2271 = vrot.lane.b32.xlu0 %v1078_v63, %s4947_s25  ;;  %v997_v44 = vmul.f32 %v6159_v9, %v5429_v39  ;;  %v1012_v63 = vmul.f32 %v6135_v6, %v5410_v28 }
 0x48f   : > { %v1098_v13 = vpack.c.bf16 %v1013_v24, %v1012_v63  ;;  %v1090_v3 = vpack.c.bf16 %v997_v44, %v996_v16  ;;  %v1002_v24 = vmul.f32 %v6189_v7, %v5418_v32  ;;  %v1021_v16 = vmul.f32 %v6219_v1, %v5424_v35 }
 0x491   : > { %2346 = vrot.lane.b32.xlu1 %v1087_v21, %s4947_s25  ;;  %2273 = vrot.lane.b32.xlu0 %v1079_v59, %s4947_s25  ;;  %v999_v21 = vmul.f32 %v6177_v26, %v5429_v39  ;;  %v1014_v59 = vmul.f32 %v6153_v54, %v5410_v28 }
 0x493   : > { %v1099_v25 = vpack.c.bf16 %v1015_v55, %v1014_v59  ;;  %v1091_v29 = vpack.c.bf16 %v999_v21, %v998_v57  ;;  %v1004_v55 = vmul.f32 %v6205_v58, %v5418_v32  ;;  %v1023_v57 = vmul.f32 %v6233_v56, %v5424_v35 }
 0x494   : > { %v1025_v35 = vmul.f32 %v6123_v33, %v5467_v18 }
 0x495   : > { %2478 = vrot.lane.b32.xlu1 %v1096_v27, %s4947_s25  ;;  %2405 = vrot.lane.b32.xlu0 %v1088_v36, %s4947_s25  ;;  %v1001_v27 = vmul.f32 %v6193_v38, %v5429_v39  ;;  %v1016_v36 = vmul.f32 %v6173_v19, %v5410_v28 }
 0x497   : > { %v1100_v23 = vpack.c.bf16 %v1017_v34, %v1016_v36  ;;  %v1092_v46 = vpack.c.bf16 %v1001_v27, %v1000_v5  ;;  %v1006_v34 = vmul.f32 %v6223_v12, %v5418_v32  ;;  %v1041_v27 = vmul.f32 %v6123_v33, %v5460_v8 }
 0x498   : > { %v1024_v32 = vmul.f32 %v6121_v61, %v5454_v4  ;;  %v1043_v33 = vmul.f32 %v6141_v41, %v5460_v8 }
 0x499   : > { %2480 = vrot.lane.b32.xlu1 %v1097_v17, %s4947_s25  ;;  %2407 = vrot.lane.b32.xlu0 %v1089_v14, %s4947_s25  ;;  %v1003_v17 = vmul.f32 %v6207_v2, %v5429_v39  ;;  %v1018_v14 = vmul.f32 %v6189_v7, %v5410_v28 }
 0x49b   : > { %v1101_v44 = vpack.c.bf16 %v1019_v37, %v1018_v14  ;;  %v1093_v63 = vpack.c.bf16 %v1003_v17, %v1002_v24  ;;  %v1104_v14 = vpack.c.bf16 %v1025_v35, %v1024_v32  ;;  %v1027_v24 = vmul.f32 %v6141_v41, %v5467_v18 }
 0x49c   : > { %v1044_v41 = vmul.f32 %v6135_v6, %v5448_v0 }
 0x49d   : > { %2482 = vrot.lane.b32.xlu1 %v1098_v13, %s4947_s25  ;;  %2409 = vrot.lane.b32.xlu0 %v1090_v3, %s4947_s25  ;;  %v1005_v13 = vmul.f32 %v6219_v1, %v5429_v39  ;;  %v1020_v3 = vmul.f32 %v6205_v58, %v5410_v28 }
 0x49f   : > { %v1102_v21 = vpack.c.bf16 %v1021_v16, %v1020_v3  ;;  %v1094_v59 = vpack.c.bf16 %v1005_v13, %v1004_v55  ;;  %v1045_v13 = vmul.f32 %v6159_v9, %v5460_v8  ;;  %v1029_v3 = vmul.f32 %v6159_v9, %v5467_v18 }
 0x4a0   : > { %v1028_v55 = vmul.f32 %v6135_v6, %v5454_v4  ;;  %v1031_v9 = vmul.f32 %v6177_v26, %v5467_v18  ;;  %v1030_v6 = vmul.f32 %v6153_v54, %v5454_v4 }
 0x4a1   : > { %2484 = vrot.lane.b32.xlu1 %v1099_v25, %s4947_s25  ;;  %2411 = vrot.lane.b32.xlu0 %v1091_v29, %s4947_s25  ;;  %v1007_v25 = vmul.f32 %v6233_v56, %v5429_v39  ;;  %v1022_v29 = vmul.f32 %v6223_v12, %v5410_v28 }
 0x4a3   : > { %v1103_v5 = vpack.c.bf16 %v1023_v57, %v1022_v29  ;;  %v1114_v57 = vpack.c.bf16 %v1045_v13, %v1044_v41 }
 0x4a5   : > { %2486 = vrot.lane.b32.xlu1 %v1100_v23, %s4947_s25  ;;  %2413 = vrot.lane.b32.xlu0 %v1092_v46, %s4947_s25  ;;  %v1095_v23 = vpack.c.bf16 %v1007_v25, %v1006_v34  ;;  %v1040_v46 = vmul.f32 %v6121_v61, %v5448_v0  ;;  %v1026_v61 = vmul.f32 %v6133_v11, %v5454_v4 }
 0x4a6   : > { %v1106_v25 = vpack.c.bf16 %v1029_v3, %v1028_v55  ;;  %v1046_v34 = vmul.f32 %v6153_v54, %v5448_v0  ;;  %v1033_v54 = vmul.f32 %v6193_v38, %v5467_v18  ;;  %v1055_v55 = vmul.f32 %v6233_v56, %v5460_v8 }
 0x4a7   : > { %v1112_v17 = vpack.c.bf16 %v1041_v27, %v1040_v46  ;;  %v1105_v16 = vpack.c.bf16 %v1027_v24, %v1026_v61  ;;  %v1049_v46 = vmul.f32 %v6193_v38, %v5460_v8  ;;  %v1037_v61 = vmul.f32 %v6219_v1, %v5467_v18 }
 0x4a9   : > { %2488 = vrot.lane.b32.xlu1 %v1101_v44, %s4947_s25  ;;  %2415 = vrot.lane.b32.xlu0 %v1093_v63, %s4947_s25  ;;  %v1042_v44 = vmul.f32 %v6133_v11, %v5448_v0  ;;  %v1047_v11 = vmul.f32 %v6177_v26, %v5460_v8 }
 0x4ab   : > { %v1113_v63 = vpack.c.bf16 %v1043_v33, %v1042_v44 }
 0x4ad   : > { %2490 = vrot.lane.b32.xlu1 %v1102_v21, %s4947_s25  ;;  %2417 = vrot.lane.b32.xlu0 %v1094_v59, %s4947_s25 }
 0x4af   : > { %v4266_v36 = vpop.f32.mrb[20].mxu1 }
 0x4b0   : > { %4626 = vrcp.f32 %v4266_v36  ;;  %v2018_v39 = vpop.f32.mrb[21].mxu1 }
 0x4b1   : > { %4628 = vrcp.f32 %v2018_v39  ;;  %2492 = vrot.lane.b32.xlu1 %v1103_v5, %s4947_s25  ;;  %2419 = vrot.lane.b32.xlu0 %v1095_v23, %s4947_s25  ;;  %v4267_v28 = vpop.f32.mrb[22].mxu1  ;;  %v1115_v23 = vpack.c.bf16 %v1047_v11, %v1046_v34  ;;  %v1107_v39 = vpack.c.bf16 %v1031_v9, %v1030_v6 }
 0x4b2   : > { %4630 = vrcp.f32 %v4267_v28  ;;  %v2021_v37 = vpop.f32.mrb[23].mxu1  ;;  %v1051_v28 = vmul.f32 %v6207_v2, %v5460_v8 }
 0x4b3   : > { %4632 = vrcp.f32 %v2021_v37  ;;  %v1035_v37 = vmul.f32 %v6207_v2, %v5467_v18  ;;  %v1053_v2 = vmul.f32 %v6219_v1, %v5460_v8  ;;  %v1039_v1 = vmul.f32 %v6233_v56, %v5467_v18 }
 0x4b5   : > { %2624 = vrot.lane.b32.xlu1 %v1112_v17, %s4947_s25  ;;  %2551 = vrot.lane.b32.xlu0 %v1104_v14, %s4947_s25  ;;  %v1050_v17 = vmul.f32 %v6189_v7, %v5448_v0 }
 0x4b7   : > { %v1117_v24 = vpack.c.bf16 %v1051_v28, %v1050_v17 }
 0x4b9   : > { %2626 = vrot.lane.b32.xlu1 %v1113_v63, %s4947_s25  ;;  %2553 = vrot.lane.b32.xlu0 %v1105_v16, %s4947_s25  ;;  %v1036_v63 = vmul.f32 %v6205_v58, %v5454_v4 }
 0x4ba   : > { %v4627_v21 = vpop.eup %4626 }
 0x4bb   : > { %v4629_v59 = vpop.eup %4628  ;;  %v6462_v36 = vmul.f32 %v4627_v21, %v6051_v51  ;;  %v1110_v41 = vpack.c.bf16 %v1037_v61, %v1036_v63  ;;  %v1054_v21 = vmul.f32 %v6223_v12, %v5448_v0 }
 0x4bc   : > { %v4631_v29 = vpop.eup %4630  ;;  %v6468_v26 = vmul.f32 %v4629_v59, %v6037_v45  ;;  %v1048_v45 = vmul.f32 %v6173_v19, %v5448_v0 }
 0x4bd   : > { %v4633_v27 = vpop.eup %4632  ;;  %2628 = vrot.lane.b32.xlu1 %v1114_v57, %s4947_s25  ;;  %2555 = vrot.lane.b32.xlu0 %v1106_v25, %s4947_s25  ;;  %v6465_v5 = vmul.f32 %v4631_v29, %v6057_v20  ;;  %v1119_v59 = vpack.c.bf16 %v1055_v55, %v1054_v21 }
 0x4be   : > { %v6471_v35 = vmul.f32 %v4633_v27, %v6043_v10  ;;  %v1032_v10 = vmul.f32 %v6173_v19, %v5454_v4  ;;  %v1116_v38 = vpack.c.bf16 %v1049_v46, %v1048_v45  ;;  %v1034_v19 = vmul.f32 %v6189_v7, %v5454_v4 }
 0x4bf   : > { %v2100_v51 = vpack.c.bf16 %v6465_v5, %v6462_v36  ;;  %v1052_v7 = vmul.f32 %v6205_v58, %v5448_v0  ;;  %v1038_v58 = vmul.f32 %v6223_v12, %v5454_v4 }
 0x4c0   : > { %v2099_v20 = vpack.c.bf16 %v6471_v35, %v6468_v26  ;;  %v1108_v32 = vpack.c.bf16 %v1033_v54, %v1032_v10  ;;  %v1109_v44 = vpack.c.bf16 %v1035_v37, %v1034_v19 }
 0x4c1   : > { %2630 = vrot.lane.b32.xlu1 %v1115_v23, %s4947_s25  ;;  %2557 = vrot.lane.b32.xlu0 %v1107_v39, %s4947_s25  ;;  %v1118_v3 = vpack.c.bf16 %v1053_v2, %v1052_v7  ;;  %v1111_v18 = vpack.c.bf16 %v1039_v1, %v1038_v58 }
 0x4c5   : > { %v2187_v14 = vpop.permute.xlu1 %2186  ;;  %2632 = vrot.lane.b32.xlu1 %v1116_v38, %s4947_s25  ;;  %2559 = vrot.lane.b32.xlu0 %v1108_v32, %s4947_s25  ;;  %v2114_v33 = vpop.permute.xlu0 %2113 }
 0x4c6   : > { %4277 = vmatpush3.bf16.msra.mxu0 %v2114_v33  ;;  %4297 = vmatpush3.bf16.msra.mxu1 %v2187_v14 }
 0x4c7   : > { %4298 = vmatprep.subr.bf16.mxu1 %v4944_v50  ;;  %4278 = vmatprep.subr.bf16.mxu0 %v4944_v50 }
 0x4c9   : > { %2634 = vrot.lane.b32.xlu1 %v1117_v24, %s4947_s25  ;;  %2561 = vrot.lane.b32.xlu0 %v1109_v44, %s4947_s25 }
 0x4cb   : > { %v2189_v16 = vpop.permute.xlu1 %2188  ;;  %v2116_v13 = vpop.permute.xlu0 %2115 }
 0x4cc   : > { %4279 = vmatpush3.bf16.msra.mxu0 %v2116_v13  ;;  %4299 = vmatpush3.bf16.msra.mxu1 %v2189_v16 }
 0x4cd   : > { %2636 = vrot.lane.b32.xlu1 %v1118_v3, %s4947_s25  ;;  %2563 = vrot.lane.b32.xlu0 %v1110_v41, %s4947_s25 }
 0x4ce   : > { %4300 = vmatprep.subr.bf16.mxu1 %v4944_v50  ;;  %4280 = vmatprep.subr.bf16.mxu0 %v4944_v50 }
 0x4cf   : > { %v2191_v8 = vpop.permute.xlu1 %2190  ;;  %v2118_v11 = vpop.permute.xlu0 %2117 }
 0x4d0   : > { %4281 = vmatpush3.bf16.msra.mxu0 %v2118_v11  ;;  %4301 = vmatpush3.bf16.msra.mxu1 %v2191_v8 }
 0x4d1   : > { %2638 = vrot.lane.b32.xlu1 %v1119_v59, %s4947_s25  ;;  %2565 = vrot.lane.b32.xlu0 %v1111_v18, %s4947_s25  ;;  %s7360_s25 = sld [smem:[#allocation18_spill]] }
 0x4d2   : > { %4302 = vmatprep.subr.bf16.mxu1 %v4944_v50  ;;  %4282 = vmatprep.subr.bf16.mxu0 %v4944_v50 }
 0x4d3   : > { %v2193_v0 = vpop.permute.xlu1 %2192  ;;  %v2120_v4 = vpop.permute.xlu0 %2119 }
 0x4d4   : > { %4283 = vmatpush3.bf16.msra.mxu0 %v2120_v4  ;;  %4303 = vmatpush3.bf16.msra.mxu1 %v2193_v0 }
 0x4d5   : > { %4304 = vmatprep.subr.bf16.mxu1 %v4944_v50  ;;  %4284 = vmatprep.subr.bf16.mxu0 %v4944_v50 }
 0x4d7   : > { %v2195_v12 = vpop.permute.xlu1 %2194  ;;  %v2122_v56 = vpop.permute.xlu0 %2121  ;;  %s7272_s6 = scalar_lea.hbm %s7360_s25, %s3861_s27 }
 0x4d8   : > { %4285 = vmatpush3.bf16.msra.mxu0 %v2122_v56  ;;  %4305 = vmatpush3.bf16.msra.mxu1 %v2195_v12 }
 0x4d9   : > { %4306 = vmatprep.subr.bf16.mxu1 %v4944_v50  ;;  %4286 = vmatprep.subr.bf16.mxu0 %v4944_v50 }
 0x4db   : > { %v2197_v57 = vpop.permute.xlu1 %2196  ;;  %v2124_v25 = vpop.permute.xlu0 %2123 }
 0x4dc   : > { %4287 = vmatpush3.bf16.msra.mxu0 %v2124_v25  ;;  %4307 = vmatpush3.bf16.msra.mxu1 %v2197_v57 }
 0x4dd   : > { %4308 = vmatprep.subr.bf16.mxu1 %v4944_v50  ;;  %4288 = vmatprep.subr.bf16.mxu0 %v4944_v50 }
 0x4df   : > { %v2199_v9 = vpop.permute.xlu1 %2198  ;;  %v2126_v29 = vpop.permute.xlu0 %2125 }
 0x4e0   : > { %4289 = vmatpush3.bf16.msra.mxu0 %v2126_v29  ;;  %4309 = vmatpush3.bf16.msra.mxu1 %v2199_v9 }
 0x4e1   : > { %4310 = vmatprep.subr.bf16.mxu1 %v4944_v50  ;;  %4290 = vmatprep.subr.bf16.mxu0 %v4944_v50 }
 0x4e3   : > { %v2201_v34 = vpop.permute.xlu1 %2200  ;;  %v2128_v27 = vpop.permute.xlu0 %2127 }
 0x4e4   : > { %4291 = vmatpush3.bf16.msra.mxu0 %v2128_v27  ;;  %4311 = vmatpush3.bf16.msra.mxu1 %v2201_v34 }
 0x4e5   : > { %4336 = vmatprep.subr.bf16.mxu1 %v4944_v50  ;;  %4316 = vmatprep.subr.bf16.mxu0 %v4944_v50 }
 0x4e7   : > { %v2333_v6 = vpop.permute.xlu1 %2332  ;;  %v2260_v23 = vpop.permute.xlu0 %2259  ;;  %4293 = vmatmul.mubr.bf16.vlgmr.msra.gmra.mrb[32].mxu0 %v2097_v62  ;;  %4313 = vmatmul.mubr.bf16.vlgmr.msra.gmra.mrb[32].mxu1 %v2098_v30 }
 0x4e8   : > { %4317 = vmatpush3.bf16.msra.mxu0 %v2260_v23  ;;  %4337 = vmatpush3.bf16.msra.mxu1 %v2333_v6 }
 0x4e9   : > { %4318 = vmatprep.subr.bf16.mxu0 %v4944_v50  ;;  %4338 = vmatprep.subr.bf16.mxu1 %v4944_v50 }
 0x4ea   : > { %4332 = vmatprep.mubr.msk.bf16.mxu0 %vm4946_vm1, %v4944_v50  ;;  %4352 = vmatprep.mubr.msk.bf16.mxu1 %vm4946_vm1, %v4944_v50 }
 0x4eb   : > { %v2335_v39 = vpop.permute.xlu1 %2334  ;;  %v2262_v46 = vpop.permute.xlu0 %2261 }
 0x4ec   : > { %4319 = vmatpush3.bf16.msra.mxu0 %v2262_v46  ;;  %4339 = vmatpush3.bf16.msra.mxu1 %v2335_v39 }
 0x4ed   : > { %4320 = vmatprep.subr.bf16.mxu0 %v4944_v50  ;;  %4340 = vmatprep.subr.bf16.mxu1 %v4944_v50 }
 0x4ef   : > { %v2337_v52 = vpop.permute.xlu1 %2336  ;;  %v2264_v48 = vpop.permute.xlu0 %2263 }
 0x4f0   : > { %v4270_v15 = vpop.f32.mrb[24].mxu1  ;;  %4321 = vmatpush3.bf16.msra.mxu0 %v2264_v48  ;;  %4341 = vmatpush3.bf16.msra.mxu1 %v2337_v52 }
 0x4f1   : > { %4634 = vrcp.f32 %v4270_v15  ;;  %v2034_v53 = vpop.f32.mrb[25].mxu1  ;;  %4322 = vmatprep.subr.bf16.mxu0 %v4944_v50  ;;  %4342 = vmatprep.subr.bf16.mxu1 %v4944_v50 }
 0x4f2   : > { %4636 = vrcp.f32 %v2034_v53  ;;  %v4271_v30 = vpop.f32.mrb[26].mxu1 }
 0x4f3   : > { %4638 = vrcp.f32 %v4271_v30  ;;  %v2037_v62 = vpop.f32.mrb[27].mxu1  ;;  %v2339_v54 = vpop.permute.xlu1 %2338 }
 0x4f4   : > { %4640 = vrcp.f32 %v2037_v62  ;;  %v2266_v45 = vpop.permute.xlu0 %2265  ;;  %4343 = vmatpush3.bf16.msra.mxu1 %v2339_v54 }
 0x4f5   : > { %4323 = vmatpush3.bf16.msra.mxu0 %v2266_v45  ;;  %4344 = vmatprep.subr.bf16.mxu1 %v4944_v50 }
 0x4f6   : > { %4324 = vmatprep.subr.bf16.mxu0 %v4944_v50 }
 0x4f7   : > { %v2341_v10 = vpop.permute.xlu1 %2340 }
 0x4f8   : > { %v2268_v28 = vpop.permute.xlu0 %2267  ;;  %4345 = vmatpush3.bf16.msra.mxu1 %v2341_v10 }
 0x4f9   : > { %4325 = vmatpush3.bf16.msra.mxu0 %v2268_v28  ;;  %4346 = vmatprep.subr.bf16.mxu1 %v4944_v50  ;;  %v2697_v28 = vld [vmem:[#allocation5] sm:$0xff] }
 0x4fa   : > { %4326 = vmatprep.subr.bf16.mxu0 %v4944_v50 }
 0x4fb   : > { %v4635_v38 = vpop.eup %4634  ;;  %v2343_v32 = vpop.permute.xlu1 %2342 }
 0x4fc   : > { %v4637_v37 = vpop.eup %4636  ;;  %v2270_v17 = vpop.permute.xlu0 %2269  ;;  %4347 = vmatpush3.bf16.msra.mxu1 %v2343_v32  ;;  %v6558_v19 = vmul.f32 %v4635_v38, %v6111_v42  ;;  %v2698_v38 = vld [vmem:[#allocation5 + $0x8] sm:$0xff] }
 0x4fd   : > { %v4639_v14 = vpop.eup %4638  ;;  %4327 = vmatpush3.bf16.msra.mxu0 %v2270_v17  ;;  %4348 = vmatprep.subr.bf16.mxu1 %v4944_v50  ;;  %v6564_v2 = vmul.f32 %v4637_v37, %v6105_v47  ;;  %v2699_v17 = vld [vmem:[#allocation5 + $0x10] sm:$0xff] }
 0x4fe   : > { %v4641_v33 = vpop.eup %4640  ;;  %4328 = vmatprep.subr.bf16.mxu0 %v4944_v50  ;;  %v6561_v24 = vmul.f32 %v4639_v14, %v6113_v60  ;;  %v2700_v14 = vld [vmem:[#allocation5 + $0x18] sm:$0xff] }
 0x4ff   : > { %v2345_v44 = vpop.permute.xlu1 %2344  ;;  %v6567_v61 = vmul.f32 %v4641_v33, %v6107_v49 }
 0x500   : > { %v2272_v7 = vpop.permute.xlu0 %2271  ;;  %4349 = vmatpush3.bf16.msra.mxu1 %v2345_v44  ;;  %v2102_v63 = vpack.c.bf16 %v6561_v24, %v6558_v19 }
 0x501   : > { %4329 = vmatpush3.bf16.msra.mxu0 %v2272_v7  ;;  %4350 = vmatprep.subr.bf16.mxu1 %v4944_v50  ;;  %v2101_v42 = vpack.c.bf16 %v6567_v61, %v6564_v2 }
 0x502   : > { %4330 = vmatprep.subr.bf16.mxu0 %v4944_v50 }
 0x503   : > { %v2347_v60 = vpop.permute.xlu1 %2346 }
 0x504   : > { %v2274_v16 = vpop.permute.xlu0 %2273  ;;  %4351 = vmatpush3.bf16.msra.mxu1 %v2347_v60 }
 0x505   : > { %4331 = vmatpush3.bf16.msra.mxu0 %v2274_v16  ;;  %4376 = vmatprep.subr.bf16.mxu1 %v4944_v50 }
 0x506   : > { %4356 = vmatprep.subr.bf16.mxu0 %v4944_v50 }
 0x507   : > { %v2479_v47 = vpop.permute.xlu1 %2478  ;;  %4353 = vmatmul.mubr.bf16.vlgmr.msra.gmra.mrb[36].mxu1 %v2100_v51 }
 0x508   : > { %v2406_v49 = vpop.permute.xlu0 %2405  ;;  %4333 = vmatmul.mubr.bf16.vlgmr.msra.gmra.mrb[36].mxu0 %v2099_v20  ;;  %4377 = vmatpush3.bf16.msra.mxu1 %v2479_v47 }
 0x509   : > { %4357 = vmatpush3.bf16.msra.mxu0 %v2406_v49  ;;  %4378 = vmatprep.subr.bf16.mxu1 %v4944_v50 }
 0x50a   : > { %4358 = vmatprep.subr.bf16.mxu0 %v4944_v50  ;;  %4372 = vmatprep.mubr.msk.bf16.mxu0 %vm4946_vm1, %v4944_v50 }
 0x50b   : > { %v2481_v13 = vpop.permute.xlu1 %2480  ;;  %4392 = vmatprep.mubr.msk.bf16.mxu1 %vm4946_vm1, %v4944_v50 }
 0x50c   : > { %v2408_v36 = vpop.permute.xlu0 %2407  ;;  %4379 = vmatpush3.bf16.msra.mxu1 %v2481_v13 }
 0x50d   : > { %4359 = vmatpush3.bf16.msra.mxu0 %v2408_v36  ;;  %4380 = vmatprep.subr.bf16.mxu1 %v4944_v50 }
 0x50e   : > { %4360 = vmatprep.subr.bf16.mxu0 %v4944_v50 }
 0x50f   : > { %v2483_v5 = vpop.permute.xlu1 %2482 }
 0x510   : > { %v2410_v26 = vpop.permute.xlu0 %2409  ;;  %4381 = vmatpush3.bf16.msra.mxu1 %v2483_v5 }
 0x511   : > { %4361 = vmatpush3.bf16.msra.mxu0 %v2410_v26  ;;  %4382 = vmatprep.subr.bf16.mxu1 %v4944_v50 }
 0x512   : > { %4362 = vmatprep.subr.bf16.mxu0 %v4944_v50 }
 0x513   : > { %v2485_v35 = vpop.permute.xlu1 %2484 }
 0x514   : > { %v2412_v51 = vpop.permute.xlu0 %2411  ;;  %4383 = vmatpush3.bf16.msra.mxu1 %v2485_v35 }
 0x515   : > { %4363 = vmatpush3.bf16.msra.mxu0 %v2412_v51  ;;  %4384 = vmatprep.subr.bf16.mxu1 %v4944_v50 }
 0x516   : > { %4364 = vmatprep.subr.bf16.mxu0 %v4944_v50 }
 0x517   : > { %v2487_v20 = vpop.permute.xlu1 %2486 }
 0x518   : > { %v2414_v3 = vpop.permute.xlu0 %2413  ;;  %4385 = vmatpush3.bf16.msra.mxu1 %v2487_v20 }
 0x519   : > { %4365 = vmatpush3.bf16.msra.mxu0 %v2414_v3  ;;  %4386 = vmatprep.subr.bf16.mxu1 %v4944_v50 }
 0x51a   : > { %4366 = vmatprep.subr.bf16.mxu0 %v4944_v50 }
 0x51b   : > { %v2489_v41 = vpop.permute.xlu1 %2488 }
 0x51c   : > { %v2416_v55 = vpop.permute.xlu0 %2415  ;;  %4387 = vmatpush3.bf16.msra.mxu1 %v2489_v41 }
 0x51d   : > { %4367 = vmatpush3.bf16.msra.mxu0 %v2416_v55  ;;  %4388 = vmatprep.subr.bf16.mxu1 %v4944_v50 }
 0x51e   : > { %4368 = vmatprep.subr.bf16.mxu0 %v4944_v50 }
 0x51f   : > { %v2491_v1 = vpop.permute.xlu1 %2490 }
 0x520   : > { %v2418_v21 = vpop.permute.xlu0 %2417  ;;  %4389 = vmatpush3.bf16.msra.mxu1 %v2491_v1 }
 0x521   : > { %4369 = vmatpush3.bf16.msra.mxu0 %v2418_v21  ;;  %4390 = vmatprep.subr.bf16.mxu1 %v4944_v50 }
 0x522   : > { %4370 = vmatprep.subr.bf16.mxu0 %v4944_v50 }
 0x523   : > { %v2493_v58 = vpop.permute.xlu1 %2492 }
 0x524   : > { %v2420_v8 = vpop.permute.xlu0 %2419  ;;  %4391 = vmatpush3.bf16.msra.mxu1 %v2493_v58 }
 0x525   : > { %4371 = vmatpush3.bf16.msra.mxu0 %v2420_v8  ;;  %4416 = vmatprep.subr.bf16.mxu1 %v4944_v50 }
 0x526   : > { %4396 = vmatprep.subr.bf16.mxu0 %v4944_v50 }
 0x527   : > { %v2625_v11 = vpop.permute.xlu1 %2624  ;;  %4393 = vmatmul.mubr.bf16.vlgmr.msra.gmra.mrb[40].mxu1 %v2102_v63 }
 0x528   : > { %v2552_v59 = vpop.permute.xlu0 %2551  ;;  %4373 = vmatmul.mubr.bf16.vlgmr.msra.gmra.mrb[40].mxu0 %v2101_v42  ;;  %4417 = vmatpush3.bf16.msra.mxu1 %v2625_v11 }
 0x529   : > { %4397 = vmatpush3.bf16.msra.mxu0 %v2552_v59  ;;  %4418 = vmatprep.subr.bf16.mxu1 %v4944_v50 }
 0x52a   : > { %4398 = vmatprep.subr.bf16.mxu0 %v4944_v50  ;;  %4412 = vmatprep.mubr.msk.bf16.mxu0 %vm4946_vm1, %v4944_v50 }
 0x52b   : > { %v2627_v18 = vpop.permute.xlu1 %2626  ;;  %4432 = vmatprep.mubr.msk.bf16.mxu1 %vm4946_vm1, %v4944_v50 }
 0x52c   : > { %v2554_v0 = vpop.permute.xlu0 %2553  ;;  %4419 = vmatpush3.bf16.msra.mxu1 %v2627_v18 }
 0x52d   : > { %4399 = vmatpush3.bf16.msra.mxu0 %v2554_v0  ;;  %4420 = vmatprep.subr.bf16.mxu1 %v4944_v50 }
 0x52e   : > { %4400 = vmatprep.subr.bf16.mxu0 %v4944_v50 }
 0x52f   : > { %v2629_v4 = vpop.permute.xlu1 %2628  ;;  %v4274_v12 = vpop.f32.mrb[28].mxu1 }
 0x530   : > { %v2556_v56 = vpop.permute.xlu0 %2555  ;;  %4642 = vrcp.f32 %v4274_v12  ;;  %v2050_v57 = vpop.f32.mrb[29].mxu1  ;;  %4421 = vmatpush3.bf16.msra.mxu1 %v2629_v4 }
 0x531   : > { %4644 = vrcp.f32 %v2050_v57  ;;  %4401 = vmatpush3.bf16.msra.mxu0 %v2556_v56  ;;  %v4275_v25 = vpop.f32.mrb[30].mxu1  ;;  %4422 = vmatprep.subr.bf16.mxu1 %v4944_v50 }
 0x532   : > { %4646 = vrcp.f32 %v4275_v25  ;;  %v2053_v9 = vpop.f32.mrb[31].mxu1  ;;  %4402 = vmatprep.subr.bf16.mxu0 %v4944_v50 }
 0x533   : > { %4648 = vrcp.f32 %v2053_v9  ;;  %v2631_v29 = vpop.permute.xlu1 %2630 }
 0x534   : > { %v2558_v34 = vpop.permute.xlu0 %2557  ;;  %4423 = vmatpush3.bf16.msra.mxu1 %v2631_v29 }
 0x535   : > { %4403 = vmatpush3.bf16.msra.mxu0 %v2558_v34  ;;  %4424 = vmatprep.subr.bf16.mxu1 %v4944_v50 }
 0x536   : > { %4404 = vmatprep.subr.bf16.mxu0 %v4944_v50 }
 0x537   : > { %v2633_v27 = vpop.permute.xlu1 %2632 }
 0x538   : > { %v2560_v6 = vpop.permute.xlu0 %2559  ;;  %4425 = vmatpush3.bf16.msra.mxu1 %v2633_v27  ;;  %v2703_v27 = vlaneseq }
 0x539   : > { %4405 = vmatpush3.bf16.msra.mxu0 %v2560_v6  ;;  %4426 = vmatprep.subr.bf16.mxu1 %v4944_v50 }
 0x53a   : > { %v4643_v23 = vpop.eup %4642  ;;  %4406 = vmatprep.subr.bf16.mxu0 %v4944_v50  ;;  %v6636_v6 = vshrl.u32 %v2703_v27, 7 }
 0x53b   : > { %v4645_v39 = vpop.eup %4644  ;;  %v2635_v46 = vpop.permute.xlu1 %2634  ;;  %v2095_v53 = vmul.f32 %v4643_v23, %v6157_v22  ;;  %v2701_v22 = vpack.c.bf16 %v2698_v38, %v2697_v28  ;;  %v4731_v28 = vld [vmem:[%s5214_s10 + $0x10] sm:$0xff] }
 0x53c   : > { %v4647_v52 = vpop.eup %4646  ;;  %v2562_v48 = vpop.permute.xlu0 %2561  ;;  %4427 = vmatpush3.bf16.msra.mxu1 %v2635_v46  ;;  %v2093_v62 = vmul.f32 %v4645_v39, %v6139_v40  ;;  %v2702_v40 = vpack.c.bf16 %v2700_v14, %v2699_v17  ;;  %v2705_v23 = vsub.s32 0, %v6636_v6  ;;  %v6642_v39 = vld [vmem:[%s7330_s7] sm:$0x3f]  ;;  %v4733_v14 = vld [vmem:[%s5214_s10 + $0x18] sm:$0xff] }
 0x53d   : > { %v4649_v15 = vpop.eup %4648  ;;  %4407 = vmatpush3.bf16.msra.mxu0 %v2562_v48  ;;  %4428 = vmatprep.subr.bf16.mxu1 %v4944_v50  ;;  %v2096_v30 = vmul.f32 %v4647_v52, %v6163_v43 }
 0x53e   : > { %4408 = vmatprep.subr.bf16.mxu0 %v4944_v50  ;;  %v2094_v54 = vmul.f32 %v4649_v15, %v6143_v31  ;;  %v6645_v46 = vrot.slane %v6642_v39, %v2705_v23 }
 0x53f   : > { %v2637_v45 = vpop.permute.xlu1 %2636  ;;  %v2104_v10 = vpack.c.bf16 %v2096_v30, %v2095_v53 }
 0x540   : > { %v2564_v32 = vpop.permute.xlu0 %2563  ;;  %4429 = vmatpush3.bf16.msra.mxu1 %v2637_v45  ;;  %v2103_v37 = vpack.c.bf16 %v2094_v54, %v2093_v62  ;;  %v4730_v54 = vld [vmem:[%s5214_s10] sm:$0xff] }
 0x541   : > { %4409 = vmatpush3.bf16.msra.mxu0 %v2564_v32  ;;  %4430 = vmatprep.subr.bf16.mxu1 %v4944_v50 }
 0x542   : > { %4410 = vmatprep.subr.bf16.mxu0 %v4944_v50 }
 0x543   : > { %v2639_v43 = vpop.permute.xlu1 %2638 }
 0x544   : > { %v2566_v33 = vpop.permute.xlu0 %2565  ;;  %4431 = vmatpush3.bf16.msra.mxu1 %v2639_v43 }
 0x545   : > { %4411 = vmatpush3.bf16.msra.mxu0 %v2566_v33 }
 0x546   : > { %4436 = vmatprep.subr.bf16.mxu0 %v2701_v22 }
 0x547   : > { %4433 = vmatmul.mubr.bf16.vlgmr.msra.gmra.mrb[44].mxu1 %v2104_v10 }
 0x548   : > { %4413 = vmatmul.mubr.bf16.vlgmr.msra.gmra.mrb[44].mxu0 %v2103_v37  ;;  %v4732_v37 = vld [vmem:[%s5214_s10 + $0x8] sm:$0xff] }
 0x549   : > { %4437 = vmatpush3.bf16.msra.mxu0 %v2701_v22 }
 0x54a   : > { %4438 = vmatprep.subr.bf16.mxu0 %v2702_v40 }
 0x54d   : > { %4439 = vmatpush3.bf16.msra.mxu0 %v2702_v40 }
 0x5ba   : > { %v2171_v31 = vpop.f32.mrb[32].mxu0  ;;  %v2244_v19 = vpop.f32.mrb[32].mxu1 }
 0x5bb   : > { %v4294_v24 = vpop.f32.mrb[33].mxu0  ;;  %v4314_v44 = vpop.f32.mrb[33].mxu1 }
 0x5bc   : > { %v2174_v2 = vpop.f32.mrb[34].mxu0  ;;  %v2247_v50 = vpop.f32.mrb[34].mxu1 }
 0x5bd   : > { %v2689_v61 = vpack.c.bf16 %v2174_v2, %v2171_v31  ;;  %v2690_v7 = vpack.c.bf16 %v2247_v50, %v2244_v19  ;;  %v4295_v63 = vpop.f32.mrb[35].mxu0  ;;  %v4315_v42 = vpop.f32.mrb[35].mxu1 }
 0x5bf   : > { %4440 = vmatprep.mubr.msk.bf16.mxu0 %vm462_vm0, %v2689_v61 }
 0x5c0   : > { %4441 = vmatmul.mubr.msk.bf16.vlgmr.msra.gmra.mrb[48].mxu0 %vm462_vm0, %v2690_v7  ;;  %v4734_v7 = vld [vmem:[%s5214_s10 + $0x20] sm:$0xff] }
 0x5da   : > { %v2390_v60 = vpop.f32.mrb[36].mxu1 }
 0x5db   : > { %v2317_v16 = vpop.f32.mrb[36].mxu0  ;;  %v4354_v47 = vpop.f32.mrb[37].mxu1 }
 0x5dc   : > { %v4334_v49 = vpop.f32.mrb[37].mxu0  ;;  %v2393_v13 = vpop.f32.mrb[38].mxu1 }
 0x5dd   : > { %v2320_v36 = vpop.f32.mrb[38].mxu0  ;;  %v2692_v5 = vpack.c.bf16 %v2393_v13, %v2390_v60  ;;  %v4355_v26 = vpop.f32.mrb[39].mxu1  ;;  %v4736_v49 = vld [vmem:[%s5214_s10 + $0x28] sm:$0xff] }
 0x5de   : > { %v2691_v35 = vpack.c.bf16 %v2320_v36, %v2317_v16  ;;  %v4335_v51 = vpop.f32.mrb[39].mxu0  ;;  %v4735_v16 = vld [vmem:[%s5214_s10 + $0x30] sm:$0xff] }
 0x5e0   : > { %4444 = vmatprep.mubr.msk.bf16.mxu0 %vm462_vm0, %v2691_v35 }
 0x5e1   : > { %4445 = vmatmul.mubr.msk.bf16.gmra.mrb[52].mxu0 %vm462_vm0, %v2692_v5  ;;  %v4737_v5 = vld [vmem:[%s5214_s10 + $0x38] sm:$0xff] }
 0x5fa   : > { %v2536_v20 = vpop.f32.mrb[40].mxu1 }
 0x5fb   : > { %v2463_v3 = vpop.f32.mrb[40].mxu0  ;;  %v4394_v41 = vpop.f32.mrb[41].mxu1 }
 0x5fc   : > { %v4374_v55 = vpop.f32.mrb[41].mxu0  ;;  %v2539_v1 = vpop.f32.mrb[42].mxu1 }
 0x5fd   : > { %v2466_v21 = vpop.f32.mrb[42].mxu0  ;;  %v2694_v58 = vpack.c.bf16 %v2539_v1, %v2536_v20  ;;  %v4395_v8 = vpop.f32.mrb[43].mxu1 }
 0x5fe   : > { %v2693_v11 = vpack.c.bf16 %v2466_v21, %v2463_v3  ;;  %v4375_v59 = vpop.f32.mrb[43].mxu0  ;;  %v4738_v8 = vld [vmem:[%s5214_s10 + $0x40] sm:$0xff] }
 0x600   : > { %4448 = vmatprep.mubr.msk.bf16.mxu0 %vm462_vm0, %v2693_v11 }
 0x601   : > { %4449 = vmatmul.mubr.msk.bf16.gmra.mrb[56].mxu0 %vm462_vm0, %v2694_v58 }
 0x61a   : > { %v2682_v18 = vpop.f32.mrb[44].mxu1 }
 0x61b   : > { %v2609_v0 = vpop.f32.mrb[44].mxu0  ;;  %v4434_v4 = vpop.f32.mrb[45].mxu1 }
 0x61c   : > { %v4414_v12 = vpop.f32.mrb[45].mxu0  ;;  %v2685_v56 = vpop.f32.mrb[46].mxu1 }
 0x61d   : > { %v2612_v57 = vpop.f32.mrb[46].mxu0  ;;  %v2696_v25 = vpack.c.bf16 %v2685_v56, %v2682_v18  ;;  %v4435_v9 = vpop.f32.mrb[47].mxu1  ;;  %v4740_v12 = vld [vmem:[%s5214_s10 + $0x48] sm:$0xff] }
 0x61e   : > { %v2695_v29 = vpack.c.bf16 %v2612_v57, %v2609_v0  ;;  %v4415_v34 = vpop.f32.mrb[47].mxu0  ;;  %v4739_v0 = vld [vmem:[%s5214_s10 + $0x50] sm:$0xff] }
 0x620   : > { %4452 = vmatprep.mubr.msk.bf16.mxu0 %vm462_vm0, %v2695_v29 }
 0x621   : > { %4453 = vmatmul.mubr.msk.bf16.gmra.mrb[60].mxu0 %vm462_vm0, %v2696_v25  ;;  %v4741_v25 = vld [vmem:[%s5214_s10 + $0x58] sm:$0xff] }
 0x693   : > { %v4442_v52 = vpop.f32.mrb[48].mxu0 }
 0x694   : > { %v2765_v48 = vpop.f32.mrb[49].mxu0  ;;  %v2774_v15 = vadd.f32 %v4442_v52, %v6645_v46 }
 0x695   : > { %v2766_v53 = vadd.f32 %v2765_v48, %v6645_v46  ;;  %v4443_v30 = vpop.f32.mrb[50].mxu0 }
 0x696   : > { %v2768_v62 = vpop.f32.mrb[51].mxu0  ;;  %v6654_v38 = vadd.f32 %v4731_v28, %v2774_v15  ;;  %v2777_v32 = vadd.f32 %v4443_v30, %v6645_v46 }
 0x697   : > { %v6650_v45 = vadd.f32 %v4730_v54, %v2766_v53  ;;  %v2769_v10 = vadd.f32 %v2768_v62, %v6645_v46  ;;  %v4742_v62 = vld [vmem:[%s5214_s10 + $0x60] sm:$0xff] }
 0x698   : > { %v6665_v33 = vadd.f32 %v4733_v14, %v2777_v32  ;;  %v2850_v40 = vsel %vm462_vm0, %v6654_v38, 0.0  ;;  %v4743_v32 = vld [vmem:[%s5214_s10 + $0x70] sm:$0xff] }
 0x699   : > { %v6658_v22 = vadd.f32 %v4732_v37, %v2769_v10  ;;  %v2844_v43 = vsel %vm462_vm0, %v6650_v45, 0.0 }
 0x69a   : > { %2845 = vadd.xlane.f32.xlu0 %v2844_v43  ;;  %v2853_v31 = vsel %vm462_vm0, %v6665_v33, 0.0  ;;  %v4744_v43 = vld [vmem:[%s5214_s10 + $0x68] sm:$0xff] }
 0x69b   : > { %v2847_v17 = vsel %vm462_vm0, %v6658_v22, 0.0 }
 0x69c   : > { %2848 = vadd.xlane.f32.xlu1 %v2847_v17 }
 0x69e   : > { %2851 = vadd.xlane.f32.xlu0 %v2850_v40  ;;  %v4745_v40 = vld [vmem:[%s5214_s10 + $0x78] sm:$0xff]  ;;  %s4861_s10 = scalar_lea.vmem %s7274_s19, 2048 }
 0x69f   : > { %p4862_p10 = scmp.ne.s32.totalorder %s7274_s19, %s4861_s10  ;;  %p4869_p1 = scmp.lt.s32.totalorder %s4867_s28, %s4861_s10 }
 0x6a1   : > { %p4863_p3 = pnand %p4862_p10, %p5157_p5  ;;  %p4870_p2 = por %p4869_p1, %p4868_p12 }
 0x6a2   : > { %2854 = vadd.xlane.f32.xlu0 %v2853_v31 }
 0x6a3   : > { %p4864_p7 = pneg %p4863_p3 }
 0x6a5   : > { %p4871_p4 = pnand %p4870_p2, %p4864_p7 }
 0x6b4   : > { %v4446_v19 = vpop.f32.mrb[52].mxu0 }
 0x6b5   : > { %v2781_v24 = vpop.f32.mrb[53].mxu0  ;;  %v2790_v44 = vadd.f32 %v4446_v19, %v6645_v46 }
 0x6b6   : > { %v2782_v2 = vadd.f32 %v2781_v24, %v6645_v46  ;;  %v4447_v50 = vpop.f32.mrb[54].mxu0 }
 0x6b7   : > { %v2784_v61 = vpop.f32.mrb[55].mxu0  ;;  %v2793_v42 = vadd.f32 %v4447_v50, %v6645_v46  ;;  %v6679_v47 = vadd.f32 %v4735_v16, %v2790_v44 }
 0x6b8   : > { %v6674_v63 = vadd.f32 %v4734_v7, %v2782_v2  ;;  %v2785_v60 = vadd.f32 %v2784_v61, %v6645_v46 }
 0x6b9   : > { %v6687_v26 = vadd.f32 %v4737_v5, %v2793_v42  ;;  %v2862_v51 = vsel %vm462_vm0, %v6679_v47, 0.0 }
 0x6ba   : > { %v6682_v13 = vadd.f32 %v4736_v49, %v2785_v60  ;;  %v2856_v36 = vsel %vm462_vm0, %v6674_v63, 0.0 }
 0x6bb   : > { %2857 = vadd.xlane.f32.xlu1 %v2856_v36  ;;  %v2865_v20 = vsel %vm462_vm0, %v6687_v26, 0.0 }
 0x6bc   : > { %v2859_v35 = vsel %vm462_vm0, %v6682_v13, 0.0 }
 0x6bd   : > { %2860 = vadd.xlane.f32.xlu0 %v2859_v35 }
 0x6bf   : > { %2863 = vadd.xlane.f32.xlu1 %v2862_v51 }
 0x6c1   : > { %2866 = vadd.xlane.f32.xlu0 %v2865_v20 }
 0x6d4   : > { %v4450_v3 = vpop.f32.mrb[56].mxu0 }
 0x6d5   : > { %v2797_v41 = vpop.f32.mrb[57].mxu0  ;;  %v2806_v55 = vadd.f32 %v4450_v3, %v6645_v46 }
 0x6d6   : > { %v2798_v1 = vadd.f32 %v2797_v41, %v6645_v46  ;;  %v4451_v21 = vpop.f32.mrb[58].mxu0 }
 0x6d7   : > { %v2800_v58 = vpop.f32.mrb[59].mxu0  ;;  %v2809_v59 = vadd.f32 %v4451_v21, %v6645_v46  ;;  %v6703_v4 = vadd.f32 %v4739_v0, %v2806_v55 }
 0x6d8   : > { %v6698_v11 = vadd.f32 %v4738_v8, %v2798_v1  ;;  %v2801_v18 = vadd.f32 %v2800_v58, %v6645_v46 }
 0x6d9   : > { %v6711_v9 = vadd.f32 %v4741_v25, %v2809_v59  ;;  %v2874_v34 = vsel %vm462_vm0, %v6703_v4, 0.0 }
 0x6da   : > { %v6706_v56 = vadd.f32 %v4740_v12, %v2801_v18  ;;  %v2868_v57 = vsel %vm462_vm0, %v6698_v11, 0.0 }
 0x6db   : > { %2869 = vadd.xlane.f32.xlu1 %v2868_v57  ;;  %v2877_v27 = vsel %vm462_vm0, %v6711_v9, 0.0 }
 0x6dc   : > { %v2871_v29 = vsel %vm462_vm0, %v6706_v56, 0.0 }
 0x6dd   : > { %2872 = vadd.xlane.f32.xlu0 %v2871_v29 }
 0x6df   : > { %2875 = vadd.xlane.f32.xlu1 %v2874_v34 }
 0x6e1   : > { %2878 = vadd.xlane.f32.xlu0 %v2877_v27 }
 0x6f4   : > { %v4454_v23 = vpop.f32.mrb[60].mxu0 }
 0x6f5   : > { %v2813_v52 = vpop.f32.mrb[61].mxu0  ;;  %v2822_v48 = vadd.f32 %v4454_v23, %v6645_v46 }
 0x6f6   : > { %v2814_v15 = vadd.f32 %v2813_v52, %v6645_v46  ;;  %v4455_v53 = vpop.f32.mrb[62].mxu0 }
 0x6f7   : > { %v2816_v30 = vpop.f32.mrb[63].mxu0  ;;  %v2825_v10 = vadd.f32 %v4455_v53, %v6645_v46  ;;  %v6727_v37 = vadd.f32 %v4743_v32, %v2822_v48  ;;  %v3102_v53 = vld [vmem:[#allocation7 + $0x8] sm:$0xff] }
 0x6f8   : > { %v6722_v54 = vadd.f32 %v4742_v62, %v2814_v15  ;;  %v2817_v28 = vadd.f32 %v2816_v30, %v6645_v46  ;;  %v3101_v15 = vld [vmem:[#allocation7] sm:$0xff]  ;;  %v3103_v30 = vld [vmem:[#allocation7 + $0x10] sm:$0xff]  ;;  %v3104_v62 = vld [vmem:[#allocation7 + $0x18] sm:$0xff] }
 0x6f9   : > { %v6735_v31 = vadd.f32 %v4745_v40, %v2825_v10  ;;  %v2886_v46 = vsel %vm462_vm0, %v6727_v37, 0.0  ;;  %v3106_v10 = vpack.c.bf16 %v3104_v62, %v3103_v30 }
 0x6fa   : > { %v6730_v17 = vadd.f32 %v4744_v43, %v2817_v28  ;;  %v2880_v14 = vsel %vm462_vm0, %v6722_v54, 0.0 }
 0x6fb   : > { %2881 = vadd.xlane.f32.xlu1 %v2880_v14  ;;  %v2889_v24 = vsel %vm462_vm0, %v6735_v31, 0.0 }
 0x6fc   : > { %v2883_v19 = vsel %vm462_vm0, %v6730_v17, 0.0 }
 0x6fd   : > { %2884 = vadd.xlane.f32.xlu0 %v2883_v19 }
 0x6ff   : > { %2887 = vadd.xlane.f32.xlu1 %v2886_v46 }
 0x701   : > { %2890 = vadd.xlane.f32.xlu0 %v2889_v24 }
 0x727   : > { %v2846_v44 = vpop.xlane.xlu0 %2845 }
 0x728   : > { %v2893_v2 = vmul.f32 0.03125, %v2846_v44 }
 0x729   : > { %v2849_v50 = vpop.xlane.xlu1 %2848 }
 0x72a   : > { %v6744_v61 = vsub.f32 %v6650_v45, %v2893_v2  ;;  %v2894_v7 = vmul.f32 0.03125, %v2849_v50 }
 0x72b   : > { %v2852_v42 = vpop.xlane.xlu0 %2851 }
 0x72c   : > { %v6747_v60 = vsub.f32 %v6658_v22, %v2894_v7  ;;  %v2895_v16 = vmul.f32 0.03125, %v2852_v42  ;;  %v2925_v49 = vmul.f32 %v6744_v61, %v6744_v61 }
 0x72e   : > { %v6752_v36 = vsub.f32 %v6654_v38, %v2895_v16  ;;  %v2941_v5 = vsel %vm462_vm0, %v2925_v49, 0.0  ;;  %v2926_v35 = vmul.f32 %v6747_v60, %v6747_v60 }
 0x72f   : > { %2942 = vadd.xlane.f32.xlu1 %v2941_v5  ;;  %v2855_v45 = vpop.xlane.xlu0 %2854 }
 0x730   : > { %v2896_v51 = vmul.f32 0.03125, %v2855_v45  ;;  %v2944_v20 = vsel %vm462_vm0, %v2926_v35, 0.0  ;;  %v2927_v22 = vmul.f32 %v6752_v36, %v6752_v36 }
 0x731   : > { %2945 = vadd.xlane.f32.xlu0 %v2944_v20 }
 0x732   : > { %v6761_v3 = vsub.f32 %v6665_v33, %v2896_v51  ;;  %v2947_v38 = vsel %vm462_vm0, %v2927_v22, 0.0 }
 0x733   : > { %2948 = vadd.xlane.f32.xlu1 %v2947_v38 }
 0x734   : > { %v2928_v41 = vmul.f32 %v6761_v3, %v6761_v3 }
 0x736   : > { %v2950_v55 = vsel %vm462_vm0, %v2928_v41, 0.0 }
 0x737   : > { %2951 = vadd.xlane.f32.xlu0 %v2950_v55 }
 0x748   : > { %v2858_v1 = vpop.xlane.xlu1 %2857 }
 0x749   : > { %v2897_v21 = vmul.f32 0.03125, %v2858_v1 }
 0x74a   : > { %v2861_v58 = vpop.xlane.xlu0 %2860 }
 0x74b   : > { %v6768_v8 = vsub.f32 %v6674_v63, %v2897_v21  ;;  %v2898_v59 = vmul.f32 0.03125, %v2861_v58 }
 0x74c   : > { %v2864_v18 = vpop.xlane.xlu1 %2863 }
 0x74d   : > { %v6771_v33 = vsub.f32 %v6682_v13, %v2898_v59  ;;  %v2899_v0 = vmul.f32 0.03125, %v2864_v18  ;;  %v2929_v12 = vmul.f32 %v6768_v8, %v6768_v8 }
 0x74e   : > { %v2867_v57 = vpop.xlane.xlu0 %2866 }
 0x74f   : > { %v6776_v25 = vsub.f32 %v6679_v47, %v2899_v0  ;;  %v2900_v29 = vmul.f32 0.03125, %v2867_v57  ;;  %v2953_v34 = vsel %vm462_vm0, %v2929_v12, 0.0  ;;  %v2930_v63 = vmul.f32 %v6771_v33, %v6771_v33 }
 0x750   : > { %2954 = vadd.xlane.f32.xlu1 %v2953_v34  ;;  %v3260_v34 = vld [vmem:[%s7359_s18 + $0x8] sm:$0xff] }
 0x751   : > { %v6782_v27 = vsub.f32 %v6687_v26, %v2900_v29  ;;  %v2956_v13 = vsel %vm462_vm0, %v2930_v63, 0.0  ;;  %v2931_v23 = vmul.f32 %v6776_v25, %v6776_v25  ;;  %v3105_v26 = vpack.c.bf16 %v3102_v53, %v3101_v15  ;;  %v3261_v63 = vld [vmem:[%s7359_s18 + $0x10] sm:$0xff] }
 0x752   : > { %2957 = vadd.xlane.f32.xlu0 %v2956_v13 }
 0x753   : > { %v2959_v52 = vsel %vm462_vm0, %v2931_v23, 0.0  ;;  %v2932_v47 = vmul.f32 %v6782_v27, %v6782_v27  ;;  %4456 = vmatprep.subr.bf16.mxu1 %v3105_v26 }
 0x754   : > { %2960 = vadd.xlane.f32.xlu1 %v2959_v52  ;;  %4457 = vmatpush3.bf16.msra.mxu1 %v3105_v26  ;;  %v3262_v52 = vld [vmem:[%s7359_s18 + $0x18] sm:$0xff] }
 0x755   : > { %v2962_v48 = vsel %vm462_vm0, %v2932_v47, 0.0  ;;  %4458 = vmatprep.subr.bf16.mxu1 %v3106_v10 }
 0x756   : > { %2963 = vadd.xlane.f32.xlu0 %v2962_v48  ;;  %v3268_v48 = vpack.c.bf16 %v3262_v52, %v3261_v63 }
 0x758   : > { %4459 = vmatpush3.bf16.msra.mxu1 %v3106_v10 }
 0x768   : > { %v2870_v28 = vpop.xlane.xlu1 %2869 }
 0x769   : > { %v2901_v32 = vmul.f32 0.03125, %v2870_v28 }
 0x76a   : > { %v2873_v43 = vpop.xlane.xlu0 %2872 }
 0x76b   : > { %v6792_v14 = vsub.f32 %v6698_v11, %v2901_v32  ;;  %v2902_v40 = vmul.f32 0.03125, %v2873_v43 }
 0x76c   : > { %v2876_v19 = vpop.xlane.xlu1 %2875 }
 0x76d   : > { %v6795_v46 = vsub.f32 %v6706_v56, %v2902_v40  ;;  %v2903_v24 = vmul.f32 0.03125, %v2876_v19  ;;  %v2933_v44 = vmul.f32 %v6792_v14, %v6792_v14  ;;  %v3055_v40 = vsub.s32 1, %v6636_v6 }
 0x76e   : > { %v2879_v2 = vpop.xlane.xlu0 %2878 }
 0x76f   : > { %v6800_v50 = vsub.f32 %v6703_v4, %v2903_v24  ;;  %v2904_v7 = vmul.f32 0.03125, %v2879_v2  ;;  %v2965_v42 = vsel %vm462_vm0, %v2933_v44, 0.0  ;;  %v2934_v11 = vmul.f32 %v6795_v46, %v6795_v46 }
 0x770   : > { %2966 = vadd.xlane.f32.xlu1 %v2965_v42  ;;  %v6853_v24 = vrot.slane %v6642_v39, %v3055_v40  ;;  %v3075_v44 = vsub.s32 2, %v6636_v6 }
 0x771   : > { %v6806_v16 = vsub.f32 %v6711_v9, %v2904_v7  ;;  %v2968_v56 = vsel %vm462_vm0, %v2934_v11, 0.0  ;;  %v2935_v49 = vmul.f32 %v6800_v50, %v6800_v50 }
 0x772   : > { %2969 = vadd.xlane.f32.xlu0 %v2968_v56 }
 0x773   : > { %v2971_v5 = vsel %vm462_vm0, %v2935_v49, 0.0  ;;  %v2936_v4 = vmul.f32 %v6806_v16, %v6806_v16  ;;  %v6860_v49 = vrot.slane %v6642_v39, %v3075_v44 }
 0x774   : > { %2972 = vadd.xlane.f32.xlu1 %v2971_v5 }
 0x775   : > { %v2974_v35 = vsel %vm462_vm0, %v2936_v4, 0.0 }
 0x776   : > { %2975 = vadd.xlane.f32.xlu0 %v2974_v35 }
 0x788   : > { %v2882_v45 = vpop.xlane.xlu1 %2881 }
 0x789   : > { %v2905_v51 = vmul.f32 0.03125, %v2882_v45 }
 0x78a   : > { %v2885_v20 = vpop.xlane.xlu0 %2884 }
 0x78b   : > { %v6816_v9 = vsub.f32 %v6722_v54, %v2905_v51  ;;  %v2906_v22 = vmul.f32 0.03125, %v2885_v20 }
 0x78c   : > { %v2888_v38 = vpop.xlane.xlu1 %2887 }
 0x78d   : > { %v6819_v41 = vsub.f32 %v6730_v17, %v2906_v22  ;;  %v2907_v55 = vmul.f32 0.03125, %v2888_v38  ;;  %v2937_v1 = vmul.f32 %v6816_v9, %v6816_v9 }
 0x78e   : > { %v2891_v21 = vpop.xlane.xlu0 %2890 }
 0x78f   : > { %v6824_v58 = vsub.f32 %v6727_v37, %v2907_v55  ;;  %v2908_v59 = vmul.f32 0.03125, %v2891_v21  ;;  %v2977_v18 = vsel %vm462_vm0, %v2937_v1, 0.0  ;;  %v2938_v54 = vmul.f32 %v6819_v41, %v6819_v41 }
 0x790   : > { %2978 = vadd.xlane.f32.xlu1 %v2977_v18 }
 0x791   : > { %v6830_v0 = vsub.f32 %v6735_v31, %v2908_v59  ;;  %v2980_v17 = vsel %vm462_vm0, %v2938_v54, 0.0  ;;  %v2939_v12 = vmul.f32 %v6824_v58, %v6824_v58  ;;  %v3259_v31 = vld [vmem:[%s7359_s18] sm:$0xff] }
 0x792   : > { %2981 = vadd.xlane.f32.xlu0 %v2980_v17  ;;  %v3267_v23 = vpack.c.bf16 %v3260_v34, %v3259_v31 }
 0x793   : > { %v2983_v57 = vsel %vm462_vm0, %v2939_v12, 0.0  ;;  %v2940_v37 = vmul.f32 %v6830_v0, %v6830_v0 }
 0x794   : > { %2984 = vadd.xlane.f32.xlu1 %v2983_v57  ;;  %4476 = vmatprep.subr.bf16.mxu0 %v3267_v23 }
 0x795   : > { %v2986_v29 = vsel %vm462_vm0, %v2940_v37, 0.0  ;;  %4477 = vmatpush3.bf16.msra.mxu0 %v3267_v23 }
 0x796   : > { %2987 = vadd.xlane.f32.xlu0 %v2986_v29  ;;  %4478 = vmatprep.subr.bf16.mxu0 %v3268_v48 }
 0x799   : > { %4479 = vmatpush3.bf16.msra.mxu0 %v3268_v48 }
 0x7bc   : > { %v2943_v13 = vpop.xlane.xlu1 %2942 }
 0x7bd   : > { %v2989_v47 = vmul.f32 0.03125, %v2943_v13 }
 0x7be   : > { %v2946_v15 = vpop.xlane.xlu0 %2945 }
 0x7bf   : > { %v3005_v53 = vadd.f32 1e-05, %v2989_v47  ;;  %v2990_v30 = vmul.f32 0.03125, %v2946_v15 }
 0x7c0   : > { %v2949_v26 = vpop.xlane.xlu1 %2948 }
 0x7c1   : > { %4650 = vrsqrt.f32 %v3005_v53  ;;  %v3006_v62 = vadd.f32 1e-05, %v2990_v30  ;;  %v2991_v10 = vmul.f32 0.03125, %v2949_v26 }
 0x7c3   : > { %4652 = vrsqrt.f32 %v3006_v62  ;;  %v3007_v28 = vadd.f32 1e-05, %v2991_v10 }
 0x7c4   : > { %v2952_v32 = vpop.xlane.xlu0 %2951 }
 0x7c5   : > { %4654 = vrsqrt.f32 %v3007_v28  ;;  %v2992_v43 = vmul.f32 0.03125, %v2952_v32 }
 0x7c7   : > { %v3008_v19 = vadd.f32 1e-05, %v2992_v43 }
 0x7c9   : > { %4656 = vrsqrt.f32 %v3008_v19 }
 0x7cb   : > { %v4651_v2 = vpop.eup %4650 }
 0x7cc   : > { %v3037_v7 = vmul.f32 %v4651_v2, %v6744_v61 }
 0x7cd   : > { %v4653_v42 = vpop.eup %4652 }
 0x7ce   : > { %v3038_v11 = vmul.f32 %v4653_v42, %v6747_v60  ;;  %v3057_v56 = vmul.f32 %v6853_v24, %v3037_v7 }
 0x7cf   : > { %v4655_v5 = vpop.eup %4654 }
 0x7d0   : > { %v3039_v4 = vmul.f32 %v4655_v5, %v6752_v36  ;;  %v3058_v35 = vmul.f32 %v6853_v24, %v3038_v11  ;;  %v6865_v45 = vadd.f32 %v6860_v49, %v3057_v56 }
 0x7d2   : > { %v6868_v51 = vadd.f32 %v6860_v49, %v3058_v35  ;;  %v3059_v20 = vmul.f32 %v6853_v24, %v3039_v4 }
 0x7d3   : > { %v4657_v61 = vpop.eup %4656 }
 0x7d4   : > { %v3040_v60 = vmul.f32 %v4657_v61, %v6761_v3  ;;  %v3093_v22 = vpack.c.bf16 %v6868_v51, %v6865_v45  ;;  %v6877_v36 = vadd.f32 %v6860_v49, %v3059_v20 }
 0x7d6   : > { %v3060_v38 = vmul.f32 %v6853_v24, %v3040_v60  ;;  %4460 = vmatprep.mubr.msk.bf16.mxu1 %vm462_vm0, %v3093_v22 }
 0x7d8   : > { %v6880_v55 = vadd.f32 %v6860_v49, %v3060_v38 }
 0x7da   : > { %v3094_v1 = vpack.c.bf16 %v6880_v55, %v6877_v36 }
 0x7dc   : > { %4461 = vmatmul.mubr.msk.bf16.vlgmr.msra.gmra.mrb[48].mxu1 %vm462_vm0, %v3094_v1 }
 0x7dd   : > { %v2955_v21 = vpop.xlane.xlu1 %2954 }
 0x7de   : > { %v2993_v3 = vmul.f32 0.03125, %v2955_v21 }
 0x7df   : > { %v2958_v59 = vpop.xlane.xlu0 %2957 }
 0x7e0   : > { %v3009_v18 = vadd.f32 1e-05, %v2993_v3  ;;  %v2994_v54 = vmul.f32 0.03125, %v2958_v59 }
 0x7e1   : > { %v2961_v17 = vpop.xlane.xlu1 %2960 }
 0x7e2   : > { %4658 = vrsqrt.f32 %v3009_v18  ;;  %v3010_v12 = vadd.f32 1e-05, %v2994_v54  ;;  %v2995_v57 = vmul.f32 0.03125, %v2961_v17 }
 0x7e3   : > { %v2964_v37 = vpop.xlane.xlu0 %2963 }
 0x7e4   : > { %4660 = vrsqrt.f32 %v3010_v12  ;;  %v3011_v29 = vadd.f32 1e-05, %v2995_v57  ;;  %v2996_v31 = vmul.f32 0.03125, %v2964_v37 }
 0x7e6   : > { %4662 = vrsqrt.f32 %v3011_v29  ;;  %v3012_v34 = vadd.f32 1e-05, %v2996_v31 }
 0x7e8   : > { %4664 = vrsqrt.f32 %v3012_v34 }
 0x7ec   : > { %v4659_v63 = vpop.eup %4658 }
 0x7ed   : > { %v3041_v13 = vmul.f32 %v4659_v63, %v6768_v8 }
 0x7ee   : > { %v4661_v23 = vpop.eup %4660 }
 0x7ef   : > { %v3042_v52 = vmul.f32 %v4661_v23, %v6771_v33  ;;  %v3061_v47 = vmul.f32 %v6853_v24, %v3041_v13 }
 0x7f0   : > { %v4663_v48 = vpop.eup %4662 }
 0x7f1   : > { %v3043_v15 = vmul.f32 %v4663_v48, %v6776_v25  ;;  %v3062_v53 = vmul.f32 %v6853_v24, %v3042_v52  ;;  %v6892_v62 = vadd.f32 %v6860_v49, %v3061_v47 }
 0x7f2   : > { %v4665_v30 = vpop.eup %4664 }
 0x7f3   : > { %v3044_v26 = vmul.f32 %v4665_v30, %v6782_v27  ;;  %v6895_v10 = vadd.f32 %v6860_v49, %v3062_v53  ;;  %v3063_v8 = vmul.f32 %v6853_v24, %v3043_v15 }
 0x7f5   : > { %v3095_v33 = vpack.c.bf16 %v6895_v10, %v6892_v62  ;;  %v3064_v28 = vmul.f32 %v6853_v24, %v3044_v26  ;;  %v6903_v25 = vadd.f32 %v6860_v49, %v3063_v8 }
 0x7f7   : > { %4464 = vmatprep.mubr.msk.bf16.mxu1 %vm462_vm0, %v3095_v33  ;;  %v6906_v27 = vadd.f32 %v6860_v49, %v3064_v28 }
 0x7f9   : > { %v3096_v32 = vpack.c.bf16 %v6906_v27, %v6903_v25 }
 0x7fb   : > { %4465 = vmatmul.mubr.msk.bf16.gmra.mrb[52].mxu1 %vm462_vm0, %v3096_v32 }
 0x7fd   : > { %v2967_v43 = vpop.xlane.xlu1 %2966 }
 0x7fe   : > { %v2997_v40 = vmul.f32 0.03125, %v2967_v43 }
 0x7ff   : > { %v2970_v19 = vpop.xlane.xlu0 %2969 }
 0x800   : > { %v3013_v44 = vadd.f32 1e-05, %v2997_v40  ;;  %v2998_v2 = vmul.f32 0.03125, %v2970_v19 }
 0x801   : > { %v2973_v7 = vpop.xlane.xlu1 %2972 }
 0x802   : > { %4666 = vrsqrt.f32 %v3013_v44  ;;  %v3014_v42 = vadd.f32 1e-05, %v2998_v2  ;;  %v2999_v11 = vmul.f32 0.03125, %v2973_v7 }
 0x803   : > { %v2976_v56 = vpop.xlane.xlu0 %2975 }
 0x804   : > { %4668 = vrsqrt.f32 %v3014_v42  ;;  %v3015_v5 = vadd.f32 1e-05, %v2999_v11  ;;  %v3000_v4 = vmul.f32 0.03125, %v2976_v56  ;;  %v3263_v11 = vld [vmem:[%s7359_s18 + $0x20] sm:$0xff]  ;;  %v3264_v56 = vld [vmem:[%s7359_s18 + $0x28] sm:$0xff] }
 0x806   : > { %4670 = vrsqrt.f32 %v3015_v5  ;;  %v3016_v35 = vadd.f32 1e-05, %v3000_v4  ;;  %v3269_v5 = vpack.c.bf16 %v3264_v56, %v3263_v11  ;;  %v3266_v4 = vld [vmem:[%s7359_s18 + $0x38] sm:$0xff] }
 0x808   : > { %4672 = vrsqrt.f32 %v3016_v35  ;;  %4480 = vmatprep.subr.bf16.mxu0 %v3269_v5 }
 0x809   : > { %4481 = vmatpush3.bf16.msra.mxu0 %v3269_v5 }
 0x80c   : > { %v4667_v61 = vpop.eup %4666 }
 0x80d   : > { %v3045_v20 = vmul.f32 %v4667_v61, %v6792_v14  ;;  %v3835_v61 = vld [vmem:[#allocation8] ss:$0 sm:$0xff] }
 0x80e   : > { %v4669_v60 = vpop.eup %4668 }
 0x80f   : > { %v3046_v22 = vmul.f32 %v4669_v60, %v6795_v46  ;;  %v3065_v38 = vmul.f32 %v6853_v24, %v3045_v20 }
 0x810   : > { %v4671_v1 = vpop.eup %4670 }
 0x811   : > { %v3047_v21 = vmul.f32 %v4671_v1, %v6800_v50  ;;  %v3066_v3 = vmul.f32 %v6853_v24, %v3046_v22  ;;  %v6918_v54 = vadd.f32 %v6860_v49, %v3065_v38 }
 0x812   : > { %v4673_v59 = vpop.eup %4672 }
 0x813   : > { %v3048_v18 = vmul.f32 %v4673_v59, %v6806_v16  ;;  %v6921_v17 = vadd.f32 %v6860_v49, %v3066_v3  ;;  %v3067_v14 = vmul.f32 %v6853_v24, %v3047_v21 }
 0x815   : > { %v3097_v46 = vpack.c.bf16 %v6921_v17, %v6918_v54  ;;  %v3068_v12 = vmul.f32 %v6853_v24, %v3048_v18  ;;  %v6929_v50 = vadd.f32 %v6860_v49, %v3067_v14 }
 0x817   : > { %4468 = vmatprep.mubr.msk.bf16.mxu1 %vm462_vm0, %v3097_v46  ;;  %v6932_v16 = vadd.f32 %v6860_v49, %v3068_v12 }
 0x819   : > { %v3098_v57 = vpack.c.bf16 %v6932_v16, %v6929_v50 }
 0x81b   : > { %4469 = vmatmul.mubr.msk.bf16.gmra.mrb[56].mxu1 %vm462_vm0, %v3098_v57 }
 0x81d   : > { %v2979_v37 = vpop.xlane.xlu1 %2978 }
 0x81e   : > { %v3001_v29 = vmul.f32 0.03125, %v2979_v37 }
 0x81f   : > { %v2982_v31 = vpop.xlane.xlu0 %2981 }
 0x820   : > { %v3017_v34 = vadd.f32 1e-05, %v3001_v29  ;;  %v3002_v63 = vmul.f32 0.03125, %v2982_v31 }
 0x821   : > { %v2985_v13 = vpop.xlane.xlu1 %2984 }
 0x822   : > { %4674 = vrsqrt.f32 %v3017_v34  ;;  %v3018_v23 = vadd.f32 1e-05, %v3002_v63  ;;  %v3003_v52 = vmul.f32 0.03125, %v2985_v13 }
 0x823   : > { %v2988_v47 = vpop.xlane.xlu0 %2987 }
 0x824   : > { %4676 = vrsqrt.f32 %v3018_v23  ;;  %v3019_v48 = vadd.f32 1e-05, %v3003_v52  ;;  %v3004_v15 = vmul.f32 0.03125, %v2988_v47 }
 0x826   : > { %4678 = vrsqrt.f32 %v3019_v48  ;;  %v3020_v53 = vadd.f32 1e-05, %v3004_v15 }
 0x828   : > { %4680 = vrsqrt.f32 %v3020_v53 }
 0x82c   : > { %v4675_v30 = vpop.eup %4674 }
 0x82d   : > { %v3049_v26 = vmul.f32 %v4675_v30, %v6816_v9 }
 0x82e   : > { %v4677_v8 = vpop.eup %4676 }
 0x82f   : > { %v3050_v33 = vmul.f32 %v4677_v8, %v6819_v41  ;;  %v3069_v28 = vmul.f32 %v6853_v24, %v3049_v26 }
 0x830   : > { %v4679_v32 = vpop.eup %4678 }
 0x831   : > { %v3051_v43 = vmul.f32 %v4679_v32, %v6824_v58  ;;  %v3070_v40 = vmul.f32 %v6853_v24, %v3050_v33  ;;  %v6944_v2 = vadd.f32 %v6860_v49, %v3069_v28 }
 0x832   : > { %v4681_v19 = vpop.eup %4680 }
 0x833   : > { %v3052_v44 = vmul.f32 %v4681_v19, %v6830_v0  ;;  %v6947_v7 = vadd.f32 %v6860_v49, %v3070_v40  ;;  %v3071_v9 = vmul.f32 %v6853_v24, %v3051_v43 }
 0x835   : > { %v3099_v41 = vpack.c.bf16 %v6947_v7, %v6944_v2  ;;  %v3072_v42 = vmul.f32 %v6853_v24, %v3052_v44  ;;  %v6955_v58 = vadd.f32 %v6860_v49, %v3071_v9  ;;  %v3265_v24 = vld [vmem:[%s7359_s18 + $0x30] sm:$0xff] }
 0x836   : > { %v3270_v35 = vpack.c.bf16 %v3266_v4, %v3265_v24 }
 0x837   : > { %4472 = vmatprep.mubr.msk.bf16.mxu1 %vm462_vm0, %v3099_v41  ;;  %v6958_v0 = vadd.f32 %v6860_v49, %v3072_v42 }
 0x838   : > { %4482 = vmatprep.subr.bf16.mxu0 %v3270_v35 }
 0x839   : > { %v3100_v49 = vpack.c.bf16 %v6958_v0, %v6955_v58  ;;  %4483 = vmatpush3.bf16.msra.mxu0 %v3270_v35 }
 0x83b   : > { %4473 = vmatmul.mubr.msk.bf16.gmra.mrb[60].mxu1 %vm462_vm0, %v3100_v49 }
 0x8af   : > { %v4462_v20 = vpop.f32.mrb[48].mxu1 }
 0x8b0   : > { %v3181_v60 = vadd.f32 %v4462_v20, %v3835_v61  ;;  %v3172_v22 = vpop.f32.mrb[49].mxu1 }
 0x8b1   : > { %v3173_v38 = vadd.f32 %v3835_v61, %v3172_v22  ;;  %v4463_v1 = vpop.f32.mrb[50].mxu1 }
 0x8b2   : > { %v3184_v21 = vadd.f32 %v4463_v1, %v3835_v61  ;;  %v3175_v3 = vpop.f32.mrb[51].mxu1  ;;  %v3237_v18 = vmax.f32 %v3181_v60, 0.0 }
 0x8b3   : > { %v3176_v59 = vadd.f32 %v3835_v61, %v3175_v3  ;;  %v3235_v46 = vmax.f32 %v3173_v38, 0.0 }
 0x8b4   : > { %v3238_v14 = vmax.f32 %v3184_v21, 0.0 }
 0x8b5   : > { %v3236_v12 = vmax.f32 %v3176_v59, 0.0 }
 0x8b6   : > { %v3252_v57 = vpack.c.bf16 %v3238_v14, %v3237_v18 }
 0x8b7   : > { %v3251_v37 = vpack.c.bf16 %v3236_v12, %v3235_v46  ;;  %v3273_v12 = vsub.s32 3, %v6636_v6 }
 0x8b9   : > { %4484 = vmatprep.mubr.msk.bf16.mxu0 %vm3275_vm2, %v3251_v37 }
 0x8ba   : > { %4485 = vmatmul.mubr.msk.bf16.vlgmr.msra.gmra.mrb[64].mxu0 %vm3275_vm2, %v3252_v57  ;;  %v6985_v57 = vrot.slane %v6642_v39, %v3273_v12 }
 0x8ce   : > { %v4466_v29 = vpop.f32.mrb[52].mxu1 }
 0x8cf   : > { %v3197_v31 = vadd.f32 %v4466_v29, %v3835_v61  ;;  %v3188_v34 = vpop.f32.mrb[53].mxu1 }
 0x8d0   : > { %v3189_v63 = vadd.f32 %v3835_v61, %v3188_v34  ;;  %v4467_v13 = vpop.f32.mrb[54].mxu1 }
 0x8d1   : > { %v3200_v23 = vadd.f32 %v4467_v13, %v3835_v61  ;;  %v3191_v52 = vpop.f32.mrb[55].mxu1  ;;  %v3241_v48 = vmax.f32 %v3197_v31, 0.0 }
 0x8d2   : > { %v3192_v47 = vadd.f32 %v3835_v61, %v3191_v52  ;;  %v3239_v53 = vmax.f32 %v3189_v63, 0.0 }
 0x8d3   : > { %v3242_v15 = vmax.f32 %v3200_v23, 0.0 }
 0x8d4   : > { %v3240_v30 = vmax.f32 %v3192_v47, 0.0 }
 0x8d5   : > { %v3254_v26 = vpack.c.bf16 %v3242_v15, %v3241_v48 }
 0x8d6   : > { %v3253_v8 = vpack.c.bf16 %v3240_v30, %v3239_v53 }
 0x8d8   : > { %4488 = vmatprep.mubr.msk.bf16.mxu0 %vm3275_vm2, %v3253_v8 }
 0x8d9   : > { %4489 = vmatmul.mubr.msk.bf16.gmra.mrb[68].mxu0 %vm3275_vm2, %v3254_v26 }
 0x8ee   : > { %v4470_v33 = vpop.f32.mrb[56].mxu1 }
 0x8ef   : > { %v3213_v28 = vadd.f32 %v4470_v33, %v3835_v61  ;;  %v3204_v32 = vpop.f32.mrb[57].mxu1 }
 0x8f0   : > { %v3205_v43 = vadd.f32 %v3835_v61, %v3204_v32  ;;  %v4471_v40 = vpop.f32.mrb[58].mxu1 }
 0x8f1   : > { %v3216_v19 = vadd.f32 %v4471_v40, %v3835_v61  ;;  %v3207_v44 = vpop.f32.mrb[59].mxu1  ;;  %v3245_v41 = vmax.f32 %v3213_v28, 0.0 }
 0x8f2   : > { %v3208_v9 = vadd.f32 %v3835_v61, %v3207_v44  ;;  %v3243_v11 = vmax.f32 %v3205_v43, 0.0 }
 0x8f3   : > { %v3246_v42 = vmax.f32 %v3216_v19, 0.0 }
 0x8f4   : > { %v3244_v56 = vmax.f32 %v3208_v9, 0.0 }
 0x8f5   : > { %v3256_v24 = vpack.c.bf16 %v3246_v42, %v3245_v41 }
 0x8f6   : > { %v3255_v5 = vpack.c.bf16 %v3244_v56, %v3243_v11 }
 0x8f8   : > { %4492 = vmatprep.mubr.msk.bf16.mxu0 %vm3275_vm2, %v3255_v5 }
 0x8f9   : > { %4493 = vmatmul.mubr.msk.bf16.gmra.mrb[72].mxu0 %vm3275_vm2, %v3256_v24 }
 0x90e   : > { %v4474_v4 = vpop.f32.mrb[60].mxu1 }
 0x90f   : > { %v3229_v49 = vadd.f32 %v4474_v4, %v3835_v61  ;;  %v3220_v35 = vpop.f32.mrb[61].mxu1 }
 0x910   : > { %v3221_v20 = vadd.f32 %v3835_v61, %v3220_v35  ;;  %v4475_v60 = vpop.f32.mrb[62].mxu1 }
 0x911   : > { %v3232_v22 = vadd.f32 %v4475_v60, %v3835_v61  ;;  %v3223_v38 = vpop.f32.mrb[63].mxu1  ;;  %v3249_v21 = vmax.f32 %v3229_v49, 0.0 }
 0x912   : > { %v3224_v1 = vadd.f32 %v3835_v61, %v3223_v38  ;;  %v3247_v59 = vmax.f32 %v3221_v20, 0.0 }
 0x913   : > { %v3250_v3 = vmax.f32 %v3232_v22, 0.0 }
 0x914   : > { %v3248_v18 = vmax.f32 %v3224_v1, 0.0 }
 0x915   : > { %v3258_v14 = vpack.c.bf16 %v3250_v3, %v3249_v21 }
 0x916   : > { %v3257_v46 = vpack.c.bf16 %v3248_v18, %v3247_v59 }
 0x918   : > { %4496 = vmatprep.mubr.msk.bf16.mxu0 %vm3275_vm2, %v3257_v46 }
 0x919   : > { %4497 = vmatmul.mubr.msk.bf16.gmra.mrb[76].mxu0 %vm3275_vm2, %v3258_v14 }
 0x98d   : > { %v4486_v37 = vpop.f32.mrb[64].mxu0 }
 0x98e   : > { %v3343_v29 = vadd.f32 %v4486_v37, %v6985_v57  ;;  %v3334_v31 = vpop.f32.mrb[65].mxu0 }
 0x98f   : > { %v3335_v61 = vadd.f32 %v3334_v31, %v6985_v57  ;;  %v4487_v34 = vpop.f32.mrb[66].mxu0 }
 0x990   : > { %v6990_v63 = vadd.f32 %v3343_v29, %v6877_v36  ;;  %v3346_v13 = vadd.f32 %v4487_v34, %v6985_v57  ;;  %v3337_v23 = vpop.f32.mrb[67].mxu0 }
 0x991   : > { %v3338_v52 = vadd.f32 %v3337_v23, %v6985_v57  ;;  %v6995_v47 = vadd.f32 %v3335_v61, %v6865_v45 }
 0x992   : > { %v6998_v39 = vadd.f32 %v3346_v13, %v6880_v55  ;;  %v3419_v48 = vsel %vm462_vm0, %v6990_v63, 0.0 }
 0x993   : > { %3420 = vadd.xlane.f32.xlu1 %v3419_v48  ;;  %v7003_v15 = vadd.f32 %v3338_v52, %v6868_v51  ;;  %v3413_v53 = vsel %vm462_vm0, %v6995_v47, 0.0 }
 0x994   : > { %v3422_v36 = vsel %vm462_vm0, %v6998_v39, 0.0 }
 0x995   : > { %3423 = vadd.xlane.f32.xlu0 %v3422_v36  ;;  %v3416_v45 = vsel %vm462_vm0, %v7003_v15, 0.0 }
 0x997   : > { %3414 = vadd.xlane.f32.xlu1 %v3413_v53 }
 0x999   : > { %3417 = vadd.xlane.f32.xlu0 %v3416_v45 }
 0x9ac   : > { %v4490_v55 = vpop.f32.mrb[68].mxu0 }
 0x9ad   : > { %v3359_v30 = vadd.f32 %v4490_v55, %v6985_v57  ;;  %v3350_v26 = vpop.f32.mrb[69].mxu0 }
 0x9ae   : > { %v3351_v8 = vadd.f32 %v3350_v26, %v6985_v57  ;;  %v4491_v51 = vpop.f32.mrb[70].mxu0 }
 0x9af   : > { %v7014_v33 = vadd.f32 %v3359_v30, %v6903_v25  ;;  %v3362_v28 = vadd.f32 %v4491_v51, %v6985_v57  ;;  %v3353_v32 = vpop.f32.mrb[71].mxu0 }
 0x9b0   : > { %v3354_v43 = vadd.f32 %v3353_v32, %v6985_v57  ;;  %v7019_v40 = vadd.f32 %v3351_v8, %v6892_v62 }
 0x9b1   : > { %v7022_v19 = vadd.f32 %v3362_v28, %v6906_v27  ;;  %v3431_v44 = vsel %vm462_vm0, %v7014_v33, 0.0 }
 0x9b2   : > { %3432 = vadd.xlane.f32.xlu1 %v3431_v44  ;;  %v7027_v9 = vadd.f32 %v3354_v43, %v6895_v10  ;;  %v3425_v41 = vsel %vm462_vm0, %v7019_v40, 0.0 }
 0x9b3   : > { %v3434_v25 = vsel %vm462_vm0, %v7022_v19, 0.0 }
 0x9b4   : > { %3435 = vadd.xlane.f32.xlu0 %v3434_v25  ;;  %v3428_v62 = vsel %vm462_vm0, %v7027_v9, 0.0 }
 0x9b6   : > { %3426 = vadd.xlane.f32.xlu1 %v3425_v41 }
 0x9b8   : > { %3429 = vadd.xlane.f32.xlu0 %v3428_v62 }
 0x9cc   : > { %v4494_v27 = vpop.f32.mrb[72].mxu0 }
 0x9cd   : > { %v3375_v42 = vadd.f32 %v4494_v27, %v6985_v57  ;;  %v3366_v11 = vpop.f32.mrb[73].mxu0 }
 0x9ce   : > { %v3367_v56 = vadd.f32 %v3366_v11, %v6985_v57  ;;  %v4495_v10 = vpop.f32.mrb[74].mxu0 }
 0x9cf   : > { %v7038_v24 = vadd.f32 %v3375_v42, %v6929_v50  ;;  %v3378_v5 = vadd.f32 %v4495_v10, %v6985_v57  ;;  %v3369_v4 = vpop.f32.mrb[75].mxu0 }
 0x9d0   : > { %v3370_v49 = vadd.f32 %v3369_v4, %v6985_v57  ;;  %v7043_v35 = vadd.f32 %v3367_v56, %v6918_v54 }
 0x9d1   : > { %v7046_v20 = vadd.f32 %v3378_v5, %v6932_v16  ;;  %v3443_v60 = vsel %vm462_vm0, %v7038_v24, 0.0 }
 0x9d2   : > { %3444 = vadd.xlane.f32.xlu1 %v3443_v60  ;;  %v7051_v22 = vadd.f32 %v3370_v49, %v6921_v17  ;;  %v3437_v38 = vsel %vm462_vm0, %v7043_v35, 0.0 }
 0x9d3   : > { %v3446_v50 = vsel %vm462_vm0, %v7046_v20, 0.0 }
 0x9d4   : > { %3447 = vadd.xlane.f32.xlu0 %v3446_v50  ;;  %v3440_v54 = vsel %vm462_vm0, %v7051_v22, 0.0 }
 0x9d6   : > { %3438 = vadd.xlane.f32.xlu1 %v3437_v38 }
 0x9d8   : > { %3441 = vadd.xlane.f32.xlu0 %v3440_v54 }
 0x9ec   : > { %v4498_v16 = vpop.f32.mrb[76].mxu0 }
 0x9ed   : > { %v3382_v1 = vpop.f32.mrb[77].mxu0  ;;  %v3391_v21 = vadd.f32 %v4498_v16, %v6985_v57 }
 0x9ee   : > { %v3383_v3 = vadd.f32 %v3382_v1, %v6985_v57  ;;  %v4499_v17 = vpop.f32.mrb[78].mxu0 }
 0x9ef   : > { %v3385_v59 = vpop.f32.mrb[79].mxu0  ;;  %v3394_v14 = vadd.f32 %v4499_v17, %v6985_v57  ;;  %v7067_v12 = vadd.f32 %v3391_v21, %v6955_v58 }
 0x9f0   : > { %v7062_v18 = vadd.f32 %v3383_v3, %v6944_v2  ;;  %v3386_v46 = vadd.f32 %v3385_v59, %v6985_v57 }
 0x9f1   : > { %v7075_v31 = vadd.f32 %v3394_v14, %v6958_v0  ;;  %v3455_v57 = vsel %vm462_vm0, %v7067_v12, 0.0 }
 0x9f2   : > { %v7070_v37 = vadd.f32 %v3386_v46, %v6947_v7  ;;  %v3449_v29 = vsel %vm462_vm0, %v7062_v18, 0.0 }
 0x9f3   : > { %3450 = vadd.xlane.f32.xlu1 %v3449_v29  ;;  %v3458_v58 = vsel %vm462_vm0, %v7075_v31, 0.0 }
 0x9f4   : > { %v3452_v2 = vsel %vm462_vm0, %v7070_v37, 0.0 }
 0x9f5   : > { %3453 = vadd.xlane.f32.xlu0 %v3452_v2 }
 0x9f7   : > { %3456 = vadd.xlane.f32.xlu1 %v3455_v57 }
 0x9f9   : > { %3459 = vadd.xlane.f32.xlu0 %v3458_v58 }
 0xa20   : > { %v3421_v7 = vpop.xlane.xlu1 %3420 }
 0xa21   : > { %v3463_v34 = vmul.f32 0.03125, %v3421_v7 }
 0xa22   : > { %v3424_v61 = vpop.xlane.xlu0 %3423 }
 0xa23   : > { %v3464_v23 = vmul.f32 0.03125, %v3424_v61  ;;  %v7084_v48 = vsub.f32 %v6990_v63, %v3463_v34 }
 0xa24   : > { %v3415_v13 = vpop.xlane.xlu1 %3414 }
 0xa25   : > { %v3461_v52 = vmul.f32 0.03125, %v3415_v13  ;;  %v7090_v45 = vsub.f32 %v6998_v39, %v3464_v23  ;;  %v3495_v63 = vmul.f32 %v7084_v48, %v7084_v48 }
 0xa26   : > { %v3418_v0 = vpop.xlane.xlu0 %3417 }
 0xa27   : > { %v7087_v36 = vsub.f32 %v6995_v47, %v3461_v52  ;;  %v3462_v53 = vmul.f32 0.03125, %v3418_v0  ;;  %v3496_v39 = vmul.f32 %v7090_v45, %v7090_v45 }
 0xa29   : > { %v7093_v55 = vsub.f32 %v7003_v15, %v3462_v53  ;;  %v3493_v30 = vmul.f32 %v7087_v36, %v7087_v36  ;;  %v3515_v15 = vsel %vm462_vm0, %v3495_v63, 0.0  ;;  %v3518_v51 = vsel %vm462_vm0, %v3496_v39, 0.0 }
 0xa2b   : > { %v3509_v26 = vsel %vm462_vm0, %v3493_v30, 0.0  ;;  %v3494_v8 = vmul.f32 %v7093_v55, %v7093_v55 }
 0xa2c   : > { %3510 = vadd.xlane.f32.xlu1 %v3509_v26 }
 0xa2d   : > { %v3512_v47 = vsel %vm462_vm0, %v3494_v8, 0.0 }
 0xa2e   : > { %3513 = vadd.xlane.f32.xlu0 %v3512_v47 }
 0xa30   : > { %3516 = vadd.xlane.f32.xlu1 %v3515_v15 }
 0xa32   : > { %3519 = vadd.xlane.f32.xlu0 %v3518_v51 }
 0xa3f   : > { %v3433_v28 = vpop.xlane.xlu1 %3432 }
 0xa40   : > { %v3467_v32 = vmul.f32 0.03125, %v3433_v28 }
 0xa41   : > { %v3436_v43 = vpop.xlane.xlu0 %3435 }
 0xa42   : > { %v7108_v44 = vsub.f32 %v7014_v33, %v3467_v32  ;;  %v3468_v25 = vmul.f32 0.03125, %v3436_v43 }
 0xa43   : > { %v3427_v41 = vpop.xlane.xlu1 %3426 }
 0xa44   : > { %v7111_v62 = vsub.f32 %v7022_v19, %v3468_v25  ;;  %v3465_v27 = vmul.f32 0.03125, %v3427_v41  ;;  %v3499_v42 = vmul.f32 %v7108_v44, %v7108_v44 }
 0xa45   : > { %v3430_v11 = vpop.xlane.xlu0 %3429 }
 0xa46   : > { %v7116_v56 = vsub.f32 %v7019_v40, %v3465_v27  ;;  %v3466_v10 = vmul.f32 0.03125, %v3430_v11  ;;  %v3527_v5 = vsel %vm462_vm0, %v3499_v42, 0.0  ;;  %v3500_v33 = vmul.f32 %v7111_v62, %v7111_v62 }
 0xa47   : > { %3528 = vadd.xlane.f32.xlu1 %v3527_v5 }
 0xa48   : > { %v7122_v4 = vsub.f32 %v7027_v9, %v3466_v10  ;;  %v3530_v19 = vsel %vm462_vm0, %v3500_v33, 0.0  ;;  %v3497_v49 = vmul.f32 %v7116_v56, %v7116_v56 }
 0xa49   : > { %3531 = vadd.xlane.f32.xlu0 %v3530_v19 }
 0xa4a   : > { %v3521_v60 = vsel %vm462_vm0, %v3497_v49, 0.0  ;;  %v3498_v40 = vmul.f32 %v7122_v4, %v7122_v4 }
 0xa4b   : > { %3522 = vadd.xlane.f32.xlu1 %v3521_v60  ;;  %v3623_v60 = vsub.s32 4, %v6636_v6 }
 0xa4c   : > { %v3524_v50 = vsel %vm462_vm0, %v3498_v40, 0.0  ;;  %v3643_v40 = vsub.s32 5, %v6636_v6 }
 0xa4d   : > { %3525 = vadd.xlane.f32.xlu0 %v3524_v50  ;;  %v4746_v50 = vld [vmem:[%s7330_s7] sm:$0x3f] }
 0xa5f   : > { %v3445_v38 = vpop.xlane.xlu1 %3444 }
 0xa60   : > { %v3471_v54 = vmul.f32 0.03125, %v3445_v38  ;;  %v7184_v38 = vrot.slane %v4746_v50, %v3623_v60 }
 0xa61   : > { %v3448_v16 = vpop.xlane.xlu0 %3447 }
 0xa62   : > { %v7132_v9 = vsub.f32 %v7038_v24, %v3471_v54  ;;  %v3472_v1 = vmul.f32 0.03125, %v3448_v16  ;;  %v7186_v16 = vrot.slane %v4746_v50, %v3643_v40 }
 0xa63   : > { %v3439_v21 = vpop.xlane.xlu1 %3438 }
 0xa64   : > { %v7135_v3 = vsub.f32 %v7046_v20, %v3472_v1  ;;  %v3469_v17 = vmul.f32 0.03125, %v3439_v21  ;;  %v3503_v59 = vmul.f32 %v7132_v9, %v7132_v9 }
 0xa65   : > { %v3442_v14 = vpop.xlane.xlu0 %3441 }
 0xa66   : > { %v7140_v46 = vsub.f32 %v7043_v35, %v3469_v17  ;;  %v3470_v29 = vmul.f32 0.03125, %v3442_v14  ;;  %v3539_v2 = vsel %vm462_vm0, %v3503_v59, 0.0  ;;  %v3504_v24 = vmul.f32 %v7135_v3, %v7135_v3 }
 0xa67   : > { %3540 = vadd.xlane.f32.xlu1 %v3539_v2 }
 0xa68   : > { %v7146_v57 = vsub.f32 %v7051_v22, %v3470_v29  ;;  %v3542_v20 = vsel %vm462_vm0, %v3504_v24, 0.0  ;;  %v3501_v58 = vmul.f32 %v7140_v46, %v7140_v46 }
 0xa69   : > { %3543 = vadd.xlane.f32.xlu0 %v3542_v20 }
 0xa6a   : > { %v3533_v7 = vsel %vm462_vm0, %v3501_v58, 0.0  ;;  %v3502_v35 = vmul.f32 %v7146_v57, %v7146_v57 }
 0xa6b   : > { %3534 = vadd.xlane.f32.xlu1 %v3533_v7 }
 0xa6c   : > { %v3536_v61 = vsel %vm462_vm0, %v3502_v35, 0.0 }
 0xa6d   : > { %3537 = vadd.xlane.f32.xlu0 %v3536_v61 }
 0xa80   : > { %v3451_v34 = vpop.xlane.xlu1 %3450 }
 0xa81   : > { %v3473_v13 = vmul.f32 0.03125, %v3451_v34 }
 0xa82   : > { %v3454_v23 = vpop.xlane.xlu0 %3453 }
 0xa83   : > { %v7156_v22 = vsub.f32 %v7062_v18, %v3473_v13  ;;  %v3474_v52 = vmul.f32 0.03125, %v3454_v23 }
 0xa84   : > { %v3457_v0 = vpop.xlane.xlu1 %3456 }
 0xa85   : > { %v7159_v53 = vsub.f32 %v7070_v37, %v3474_v52  ;;  %v3475_v30 = vmul.f32 0.03125, %v3457_v0  ;;  %v3505_v26 = vmul.f32 %v7156_v22, %v7156_v22 }
 0xa86   : > { %v3460_v8 = vpop.xlane.xlu0 %3459 }
 0xa87   : > { %v7164_v63 = vsub.f32 %v7067_v12, %v3475_v30  ;;  %v3476_v47 = vmul.f32 0.03125, %v3460_v8  ;;  %v3545_v39 = vsel %vm462_vm0, %v3505_v26, 0.0  ;;  %v3506_v18 = vmul.f32 %v7159_v53, %v7159_v53 }
 0xa88   : > { %3546 = vadd.xlane.f32.xlu1 %v3545_v39 }
 0xa89   : > { %v7170_v15 = vsub.f32 %v7075_v31, %v3476_v47  ;;  %v3548_v37 = vsel %vm462_vm0, %v3506_v18, 0.0  ;;  %v3507_v51 = vmul.f32 %v7164_v63, %v7164_v63 }
 0xa8a   : > { %3549 = vadd.xlane.f32.xlu0 %v3548_v37 }
 0xa8b   : > { %v3551_v28 = vsel %vm462_vm0, %v3507_v51, 0.0  ;;  %v3508_v12 = vmul.f32 %v7170_v15, %v7170_v15 }
 0xa8c   : > { %3552 = vadd.xlane.f32.xlu1 %v3551_v28 }
 0xa8d   : > { %v3554_v32 = vsel %vm462_vm0, %v3508_v12, 0.0 }
 0xa8e   : > { %3555 = vadd.xlane.f32.xlu0 %v3554_v32 }
 0xab9   : > { %v3511_v43 = vpop.xlane.xlu1 %3510 }
 0xaba   : > { %v3557_v25 = vmul.f32 0.03125, %v3511_v43 }
 0xabb   : > { %v3514_v41 = vpop.xlane.xlu0 %3513 }
 0xabc   : > { %v3573_v31 = vadd.f32 1e-05, %v3557_v25  ;;  %v3558_v27 = vmul.f32 0.03125, %v3514_v41 }
 0xabd   : > { %v3517_v42 = vpop.xlane.xlu1 %3516 }
 0xabe   : > { %4682 = vrsqrt.f32 %v3573_v31  ;;  %v3574_v11 = vadd.f32 1e-05, %v3558_v27  ;;  %v3559_v10 = vmul.f32 0.03125, %v3517_v42 }
 0xabf   : > { %v3520_v5 = vpop.xlane.xlu0 %3519 }
 0xac0   : > { %4684 = vrsqrt.f32 %v3574_v11  ;;  %v3575_v33 = vadd.f32 1e-05, %v3559_v10  ;;  %v3560_v19 = vmul.f32 0.03125, %v3520_v5 }
 0xac2   : > { %4686 = vrsqrt.f32 %v3575_v33  ;;  %v3576_v49 = vadd.f32 1e-05, %v3560_v19 }
 0xac4   : > { %4688 = vrsqrt.f32 %v3576_v49 }
 0xac8   : > { %v4683_v54 = vpop.eup %4682 }
 0xac9   : > { %v3605_v1 = vmul.f32 %v4683_v54, %v7087_v36 }
 0xaca   : > { %v4685_v21 = vpop.eup %4684 }
 0xacb   : > { %v3625_v17 = vmul.f32 %v7184_v38, %v3605_v1  ;;  %v3606_v59 = vmul.f32 %v4685_v21, %v7093_v55 }
 0xacc   : > { %v4687_v14 = vpop.eup %4686 }
 0xacd   : > { %v3645_v29 = vadd.f32 %v7186_v16, %v3625_v17  ;;  %v3626_v6 = vmul.f32 %v7184_v38, %v3606_v59  ;;  %v3607_v2 = vmul.f32 %v4687_v14, %v7084_v48 }
 0xace   : > { %v4689_v24 = vpop.eup %4688 }
 0xacf   : > { %3661 = vst.msk [vmem:[%s7196_s30] sm:$0xff] %vm462_vm0, %v3645_v29  ;;  %v3646_v36 = vadd.f32 %v7186_v16, %v3626_v6  ;;  %v3627_v55 = vmul.f32 %v7184_v38, %v3607_v2  ;;  %v3608_v20 = vmul.f32 %v4689_v24, %v7090_v45 }
 0xad1   : > { %3662 = vst.msk [vmem:[%s7196_s30 + $0x8] sm:$0xff] %vm462_vm0, %v3646_v36  ;;  %v3647_v48 = vadd.f32 %v7186_v16, %v3627_v55  ;;  %v3628_v58 = vmul.f32 %v7184_v38, %v3608_v20 }
 0xad3   : > { %3663 = vst.msk [vmem:[%s7196_s30 + $0x10] sm:$0xff] %vm462_vm0, %v3647_v48  ;;  %v3648_v7 = vadd.f32 %v7186_v16, %v3628_v58 }
 0xad4   : > { %v3529_v35 = vpop.xlane.xlu1 %3528 }
 0xad5   : > { %3664 = vst.msk [vmem:[%s7196_s30 + $0x18] sm:$0xff] %vm462_vm0, %v3648_v7  ;;  %v3563_v61 = vmul.f32 0.03125, %v3529_v35 }
 0xad6   : > { %v3532_v34 = vpop.xlane.xlu0 %3531 }
 0xad7   : > { %v3579_v13 = vadd.f32 1e-05, %v3563_v61  ;;  %v3564_v23 = vmul.f32 0.03125, %v3532_v34 }
 0xad8   : > { %v3523_v52 = vpop.xlane.xlu1 %3522 }
 0xad9   : > { %4690 = vrsqrt.f32 %v3579_v13  ;;  %v3580_v45 = vadd.f32 1e-05, %v3564_v23  ;;  %v3561_v0 = vmul.f32 0.03125, %v3523_v52 }
 0xada   : > { %v3526_v30 = vpop.xlane.xlu0 %3525 }
 0xadb   : > { %4692 = vrsqrt.f32 %v3580_v45  ;;  %v3577_v26 = vadd.f32 1e-05, %v3561_v0  ;;  %v3562_v8 = vmul.f32 0.03125, %v3526_v30 }
 0xadd   : > { %4694 = vrsqrt.f32 %v3577_v26  ;;  %v3578_v47 = vadd.f32 1e-05, %v3562_v8 }
 0xadf   : > { %4696 = vrsqrt.f32 %v3578_v47 }
 0xae3   : > { %v4691_v39 = vpop.eup %4690 }
 0xae4   : > { %v3611_v18 = vmul.f32 %v4691_v39, %v7108_v44 }
 0xae5   : > { %v4693_v37 = vpop.eup %4692 }
 0xae6   : > { %v3631_v51 = vmul.f32 %v7184_v38, %v3611_v18  ;;  %v3612_v28 = vmul.f32 %v4693_v37, %v7111_v62 }
 0xae7   : > { %v4695_v12 = vpop.eup %4694 }
 0xae8   : > { %v3651_v32 = vadd.f32 %v7186_v16, %v3631_v51  ;;  %v3632_v43 = vmul.f32 %v7184_v38, %v3612_v28  ;;  %v3609_v25 = vmul.f32 %v4695_v12, %v7116_v56 }
 0xae9   : > { %v4697_v41 = vpop.eup %4696 }
 0xaea   : > { %3667 = vst.msk [vmem:[%s7196_s30 + $0x30] sm:$0xff] %vm462_vm0, %v3651_v32  ;;  %v3652_v31 = vadd.f32 %v7186_v16, %v3632_v43  ;;  %v3629_v44 = vmul.f32 %v7184_v38, %v3609_v25  ;;  %v3610_v27 = vmul.f32 %v4697_v41, %v7122_v4 }
 0xaec   : > { %3668 = vst.msk [vmem:[%s7196_s30 + $0x38] sm:$0xff] %vm462_vm0, %v3652_v31  ;;  %v3649_v62 = vadd.f32 %v7186_v16, %v3629_v44  ;;  %v3630_v42 = vmul.f32 %v7184_v38, %v3610_v27 }
 0xaee   : > { %3665 = vst.msk [vmem:[%s7196_s30 + $0x20] sm:$0xff] %vm462_vm0, %v3649_v62  ;;  %v3650_v11 = vadd.f32 %v7186_v16, %v3630_v42 }
 0xaf0   : > { %3666 = vst.msk [vmem:[%s7196_s30 + $0x28] sm:$0xff] %vm462_vm0, %v3650_v11 }
 0xaf4   : > { %v3541_v56 = vpop.xlane.xlu1 %3540 }
 0xaf5   : > { %v3567_v10 = vmul.f32 0.03125, %v3541_v56 }
 0xaf6   : > { %v3544_v5 = vpop.xlane.xlu0 %3543 }
 0xaf7   : > { %v3583_v33 = vadd.f32 1e-05, %v3567_v10  ;;  %v3568_v19 = vmul.f32 0.03125, %v3544_v5 }
 0xaf8   : > { %v3535_v49 = vpop.xlane.xlu1 %3534 }
 0xaf9   : > { %4698 = vrsqrt.f32 %v3583_v33  ;;  %v3584_v4 = vadd.f32 1e-05, %v3568_v19  ;;  %v3565_v60 = vmul.f32 0.03125, %v3535_v49 }
 0xafa   : > { %v3538_v40 = vpop.xlane.xlu0 %3537 }
 0xafb   : > { %4700 = vrsqrt.f32 %v3584_v4  ;;  %v3581_v50 = vadd.f32 1e-05, %v3565_v60  ;;  %v3566_v54 = vmul.f32 0.03125, %v3538_v40 }
 0xafd   : > { %4702 = vrsqrt.f32 %v3581_v50  ;;  %v3582_v1 = vadd.f32 1e-05, %v3566_v54 }
 0xaff   : > { %4704 = vrsqrt.f32 %v3582_v1 }
 0xb03   : > { %v4699_v21 = vpop.eup %4698 }
 0xb04   : > { %v3615_v17 = vmul.f32 %v4699_v21, %v7132_v9 }
 0xb05   : > { %v4701_v59 = vpop.eup %4700 }
 0xb06   : > { %v3635_v14 = vmul.f32 %v7184_v38, %v3615_v17  ;;  %v3616_v29 = vmul.f32 %v4701_v59, %v7135_v3 }
 0xb07   : > { %v4703_v6 = vpop.eup %4702 }
 0xb08   : > { %v3655_v2 = vadd.f32 %v7186_v16, %v3635_v14  ;;  %v3636_v24 = vmul.f32 %v7184_v38, %v3616_v29  ;;  %v3613_v36 = vmul.f32 %v4703_v6, %v7140_v46 }
 0xb09   : > { %v4705_v55 = vpop.eup %4704 }
 0xb0a   : > { %3671 = vst.msk [vmem:[%s7196_s30 + $0x50] sm:$0xff] %vm462_vm0, %v3655_v2  ;;  %v3656_v20 = vadd.f32 %v7186_v16, %v3636_v24  ;;  %v3633_v9 = vmul.f32 %v7184_v38, %v3613_v36  ;;  %v3614_v48 = vmul.f32 %v4705_v55, %v7146_v57 }
 0xb0c   : > { %3672 = vst.msk [vmem:[%s7196_s30 + $0x58] sm:$0xff] %vm462_vm0, %v3656_v20  ;;  %v3653_v3 = vadd.f32 %v7186_v16, %v3633_v9  ;;  %v3634_v58 = vmul.f32 %v7184_v38, %v3614_v48 }
 0xb0e   : > { %3669 = vst.msk [vmem:[%s7196_s30 + $0x40] sm:$0xff] %vm462_vm0, %v3653_v3  ;;  %v3654_v7 = vadd.f32 %v7186_v16, %v3634_v58 }
 0xb10   : > { %3670 = vst.msk [vmem:[%s7196_s30 + $0x48] sm:$0xff] %vm462_vm0, %v3654_v7 }
 0xb15   : > { %v3547_v46 = vpop.xlane.xlu1 %3546 }
 0xb16   : > { %v3569_v35 = vmul.f32 0.03125, %v3547_v46 }
 0xb17   : > { %v3550_v61 = vpop.xlane.xlu0 %3549 }
 0xb18   : > { %v3585_v34 = vadd.f32 1e-05, %v3569_v35  ;;  %v3570_v13 = vmul.f32 0.03125, %v3550_v61 }
 0xb19   : > { %v3553_v23 = vpop.xlane.xlu1 %3552 }
 0xb1a   : > { %4706 = vrsqrt.f32 %v3585_v34  ;;  %v3586_v57 = vadd.f32 1e-05, %v3570_v13  ;;  %v3571_v52 = vmul.f32 0.03125, %v3553_v23 }
 0xb1b   : > { %v3556_v45 = vpop.xlane.xlu0 %3555 }
 0xb1c   : > { %4708 = vrsqrt.f32 %v3586_v57  ;;  %v3587_v0 = vadd.f32 1e-05, %v3571_v52  ;;  %v3572_v30 = vmul.f32 0.03125, %v3556_v45 }
 0xb1e   : > { %4710 = vrsqrt.f32 %v3587_v0  ;;  %v3588_v26 = vadd.f32 1e-05, %v3572_v30 }
 0xb20   : > { %4712 = vrsqrt.f32 %v3588_v26 }
 0xb24   : > { %v4707_v8 = vpop.eup %4706 }
 0xb25   : > { %v3617_v47 = vmul.f32 %v4707_v8, %v7156_v22 }
 0xb26   : > { %v4709_v39 = vpop.eup %4708 }
 0xb27   : > { %v3637_v18 = vmul.f32 %v7184_v38, %v3617_v47  ;;  %v3618_v37 = vmul.f32 %v4709_v39, %v7159_v53 }
 0xb28   : > { %v4711_v51 = vpop.eup %4710 }
 0xb29   : > { %v3657_v28 = vadd.f32 %v7186_v16, %v3637_v18  ;;  %v3638_v12 = vmul.f32 %v7184_v38, %v3618_v37  ;;  %v3619_v32 = vmul.f32 %v4711_v51, %v7164_v63 }
 0xb2a   : > { %v4713_v43 = vpop.eup %4712 }
 0xb2b   : > { %3673 = vst.msk [vmem:[%s7196_s30 + $0x60] sm:$0xff] %vm462_vm0, %v3657_v28  ;;  %v3658_v22 = vadd.f32 %v7186_v16, %v3638_v12  ;;  %v3639_v25 = vmul.f32 %v7184_v38, %v3619_v32  ;;  %v3620_v53 = vmul.f32 %v4713_v43, %v7170_v15 }
 0xb2d   : > { %3674 = vst.msk [vmem:[%s7196_s30 + $0x68] sm:$0xff] %vm462_vm0, %v3658_v22  ;;  %v3659_v41 = vadd.f32 %v7186_v16, %v3639_v25  ;;  %v3640_v31 = vmul.f32 %v7184_v38, %v3620_v53 }
 0xb2f   : > { %3675 = vst.msk [vmem:[%s7196_s30 + $0x70] sm:$0xff] %vm462_vm0, %v3659_v41  ;;  %v3660_v63 = vadd.f32 %v7186_v16, %v3640_v31 }
 0xb31   : > { %3676 = vst.msk [vmem:[%s7196_s30 + $0x78] sm:$0xff] %vm462_vm0, %v3660_v63 }
 0xb32   : > { %4874 = shalt.err (!%p4871_p4)
}
 0xb33   : > { %s4875_s26 = scalar_lea.hbm %s7272_s6, 2048  ;;  %s4879_s27 = scalar_lea.hbm %s7360_s25, 4096 }
 0xb34   : > { %p4876_p9 = scmp.ne.s32.totalorder %s7272_s6, %s4875_s26  ;;  %p4880_p8 = scmp.lt.u32.totalorder %s7272_s6, %s7360_s25 }
 0xb35   : > { %p4881_p13 = scmp.lt.u32.totalorder %s4879_s27, %s4875_s26  ;;  %p4883_p10 = scmp.lt.u32.totalorder %s4875_s26, %s7272_s6 }
 0xb36   : > { %p4877_p0 = pnand %p4876_p9, %p5157_p5 }
 0xb37   : > { %p4882_p6 = por %p4881_p13, %p4880_p8 }
 0xb38   : > { %p4878_p11 = pneg %p4877_p0 }
 0xb39   : > { %p4884_p3 = por %p4883_p10, %p4882_p6 }
 0xb3b   : > { %p4885_p7 = pnand %p4884_p3, %p4878_p11 }
 0xb3d   : > { %4888 = shalt.err (!%p4885_p7)
}
 0xb3e   : > { %s4949_s10 = smov 128   ;;  %s4950_s13 = smov 8  }
 0xb3f   : > { %4514 = dma.vmem_to_hbm [thread:$0]  (%p5157_p5), %s7274_s19, 2048, %s7272_s6, %s3678_s17, %s4949_s10, %s4949_s10, %s4950_s13  }
 0xb40 PF: > { %s7361_s29 = sld [smem:[#allocation15_spill]]  ;;  %s7362_s28 = sld [smem:[#allocation16_spill]] }
 0xb41   : > { %p7364_p1 = scmp.ge.s32.totalorder %s4935_s16, 2 }
 0xb46   : > { %s3707_s21 = sand.u32 1, %s7361_s29   ;;  %p7363_p12 = scmp.ne.s32.totalorder %s7362_s28, 0 }
 0xb47   : > { %s3708_s26 = scalar_lea.sflag [#allocation4], %s3707_s21 }
 0xb48   : > { %p4531_p2 = pnand %p7364_p1, %p7363_p12 }
 0xb4a   : > { %4918 = dma.done.wait (!%p4531_p2), %s3708_s26, 2048  }
 0xb4b   : > { %4920 = vsyncadd (!%p4531_p2), %s3708_s26, 4294965248  ;;  %p25_p4 = scmp.ge.s32.totalorder %s5143_s22, 4   ;;  %s7365_s13 = smov %s4927_s14 }
 0xb4c   : > { %s7366_s14 = smov %s4931_s15  ;;  %s7367_s15 = smov %s5153_s20 }
 0xb4d   : > { %s7368_s16 = smov %s5143_s22  ;;  %27 = sbr.rel (!%p25_p4) target bundleno = 10 (0xa), region = 117 }
 0xb54   :  { %3713 = vsyncpa [#allocation3], 1 }
 0xb55   :  { %3715 = vsyncpa [#allocation3 + $0x1], 1 }
 0xb56   :  { %3716 = vsyncpa [#allocation6], 1 }
 0xb57   :  { %3717 = vsyncpa [#allocation9], 1 }
 0xb58   :  { %3718 = vsyncpa [#allocation4], 1 }
 0xb59   :  { %3720 = vsyncpa [#allocation4 + $0x1], 1 }

</bundles_post_ra>
